<compile_context>
chip_gen: v5e
topology: v5e:2x2
jax: 0.10.0
libtpu: 0.0.40
codegen_flags: <defaults>
</compile_context>

<pallas_src>
import functools
import math

import jax
import jax.numpy as jnp
from jax import lax
from jax.experimental import pallas as pl
from jax.experimental.pallas import tpu as pltpu

# ----------------------------- small ViT config -----------------------------
BATCH      = 2
CHANNELS   = 3
IMG        = 32          # image height/width
PATCH      = 16          # patch size (same as vit_b_16)
HIDDEN     = 128         # hidden dim (ViT-B uses 768; both are 128-multiples)
NUM_HEADS  = 2           # head_dim = 64, same per-head width as real ViT-B
MLP_DIM    = 4 * HIDDEN  # same 4x ratio as ViT-B
NUM_LAYERS = 2           # ViT-B uses 12; hook captures the LAST block's output
LN_EPS     = 1e-6        # torchvision ViT uses LayerNorm(eps=1e-6)

N_PATCHES  = (IMG // PATCH) ** 2
SEQ        = N_PATCHES + 1           # +1 class token
PATCH_K    = CHANNELS * PATCH * PATCH
HEAD_DIM   = HIDDEN // NUM_HEADS
ATTN_SCALE = 1.0 / math.sqrt(HEAD_DIM)


def _round_up(x, m):
    return (x + m - 1) // m * m


# ------------------------------ kernel helpers ------------------------------
def _layer_norm(x, w, b, eps=LN_EPS):
    mean = jnp.mean(x, axis=-1, keepdims=True)
    xc = x - mean
    var = jnp.mean(xc * xc, axis=-1, keepdims=True)
    return xc * lax.rsqrt(var + eps) * w + b


def _gelu_tanh(x):
    # tanh-approximation GELU: tanh lowers to the EUP slot instead of a long
    # VALU polynomial (approx; ~1e-3 relative deviation from exact erf-GELU).
    c = 0.7978845608028654  # sqrt(2/pi)
    return 0.5 * x * (1.0 + jnp.tanh(c * (x + 0.044715 * x * x * x)))


# --------------------------- fused ViT forward kernel ------------------------
def vit_fused_kernel(patches_ref, proj_w_ref, proj_b_ref, cls_ref, pos_ref,
                     ln1w_ref, ln1b_ref, qkvw_ref, qkvb_ref, ow_ref, ob_ref,
                     ln2w_ref, ln2b_ref, f1w_ref, f1b_ref, f2w_ref, f2b_ref,
                     o_ref, *, batch, n_patches, num_heads, num_layers, rows):
    bn = batch * n_patches
    d = proj_w_ref.shape[1]
    hd = d // num_heads
    n_pad = rows - bn - batch

    # ---- patch embedding: single (B*N, K) @ (K, D) bf16 matmul --------------
    tok = jnp.dot(patches_ref[...].astype(jnp.bfloat16),
                  proj_w_ref[...].astype(jnp.bfloat16),
                  preferred_element_type=jnp.float32) + proj_b_ref[...]

    # ---- token layout (built in registers, sublane-aligned, no scratch) -----
    #   rows [0, B*N)      : patch tokens, batch-major (matches the output)
    #   rows [B*N, B*N+B)  : class tokens (one per batch)
    #   rows [B*N+B, rows) : zero padding up to a multiple of 8 sublanes
    pos_patch = jnp.concatenate([pos_ref[1:, :]] * batch, axis=0)   # (B*N, D)
    cls_row = cls_ref[...] + pos_ref[0:1, :]                        # (1, D)
    cls_rows = jnp.concatenate([cls_row] * batch, axis=0)           # (B, D)
    pieces = [tok + pos_patch, cls_rows]
    if n_pad > 0:
        pieces.append(jnp.zeros((n_pad, d), jnp.float32))
    x = jnp.concatenate(pieces, axis=0)                             # (rows, D)

    # ---- block-diagonal mask computed in-kernel (no HBM bias input) ---------
    ridx = lax.broadcasted_iota(jnp.int32, (rows, rows), 0)
    cidx = lax.broadcasted_iota(jnp.int32, (rows, rows), 1)
    allow = (ridx >= bn + batch) & (cidx >= bn + batch)   # pads attend pads
    for b in range(batch):
        in_b_r = (((ridx >= b * n_patches) & (ridx < (b + 1) * n_patches))
                  | (ridx == bn + b))
        in_b_c = (((cidx >= b * n_patches) & (cidx < (b + 1) * n_patches))
                  | (cidx == bn + b))
        allow = allow | (in_b_r & in_b_c)
    mask = jnp.where(allow, jnp.float32(0.0), jnp.float32(-1e30))   # f32

    # ---- encoder blocks, unrolled; all weights stay resident in VMEM --------
    for li in range(num_layers):
        # LN1 + MHSA (1/sqrt(head_dim) is pre-folded into q columns of qkv_w).
        h = _layer_norm(x, ln1w_ref[li], ln1b_ref[li])
        qkv = jnp.dot(h.astype(jnp.bfloat16),
                      qkvw_ref[li].astype(jnp.bfloat16),
                      preferred_element_type=jnp.float32) + qkvb_ref[li]
        q = qkv[:, 0 * d:1 * d]
        k = qkv[:, 1 * d:2 * d]
        v = qkv[:, 2 * d:3 * d]
        heads = []
        for hi in range(num_heads):
            sl = slice(hi * hd, (hi + 1) * hd)
            qh = q[:, sl].astype(jnp.bfloat16)
            kh = k[:, sl].astype(jnp.bfloat16)
            vh = v[:, sl].astype(jnp.bfloat16)
            # q @ k^T expressed via dot_general (contract minor dims, no
            # explicit transpose); mask added to f32 scores before exp.
            s = lax.dot_general(qh, kh, (((1,), (1,)), ((), ())),
                                preferred_element_type=jnp.float32) + mask
            s = s - jnp.max(s, axis=-1, keepdims=True)
            e = jnp.exp(s)
            p = e * pl.reciprocal(jnp.sum(e, axis=-1, keepdims=True),
                                  approx=True)
            heads.append(jnp.dot(p.astype(jnp.bfloat16), vh,
                                 preferred_element_type=jnp.float32))
        attn_in = jnp.concatenate(heads, axis=-1)          # head merge in regs
        attn = jnp.dot(attn_in.astype(jnp.bfloat16),
                       ow_ref[li].astype(jnp.bfloat16),
                       preferred_element_type=jnp.float32) + ob_ref[li]
        x = x + attn

        # LN2 + MLP.
        h2 = _layer_norm(x, ln2w_ref[li], ln2b_ref[li])
        m = jnp.dot(h2.astype(jnp.bfloat16),
                    f1w_ref[li].astype(jnp.bfloat16),
                    preferred_element_type=jnp.float32) + f1b_ref[li]
        m = _gelu_tanh(m)
        m = jnp.dot(m.astype(jnp.bfloat16),
                    f2w_ref[li].astype(jnp.bfloat16),
                    preferred_element_type=jnp.float32) + f2b_ref[li]
        x = x + m

    # ---- hook semantics: last block output, class token dropped -------------
    # Patch tokens are rows [0, B*N): one aligned, lane-dense (128-wide) store.
    o_ref[...] = x[0:bn, :].astype(o_ref.dtype)


# --------------------------------- glue --------------------------------------
def extract_patches(images, patch):
    # NCHW -> (B*N, C*P*P): patch index row-major over the (H/P, W/P) grid,
    # per-patch flattening order (C, Ph, Pw) -- identical to conv_proj +
    # reshape + permute in torchvision's VisionTransformer._process_input.
    B, C, H, W = images.shape
    nh, nw = H // patch, W // patch
    x = images.reshape(B, C, nh, patch, nw, patch)
    x = x.transpose(0, 2, 4, 1, 3, 5)
    return x.reshape(B * nh * nw, C * patch * patch)


def _cost_estimate(batch, rows):
    flops = 2 * batch * N_PATCHES * PATCH_K * HIDDEN            # patch embed
    per_layer = (2 * rows * HIDDEN * 3 * HIDDEN                 # qkv proj
                 + 2 * 2 * NUM_HEADS * rows * rows * HEAD_DIM   # scores + pv
                 + 2 * rows * HIDDEN * HIDDEN                   # out proj
                 + 2 * 2 * rows * HIDDEN * MLP_DIM)             # mlp
    flops += NUM_LAYERS * per_layer
    transcendentals = NUM_LAYERS * (NUM_HEADS * rows * rows     # exp
                                    + rows * MLP_DIM            # tanh
                                    + NUM_HEADS * rows          # reciprocal
                                    + 2 * rows)                 # rsqrt
    param_elems = (PATCH_K * HIDDEN + HIDDEN + HIDDEN + SEQ * HIDDEN
                   + NUM_LAYERS * (4 * HIDDEN
                                   + HIDDEN * 3 * HIDDEN + 3 * HIDDEN
                                   + HIDDEN * HIDDEN + HIDDEN
                                   + HIDDEN * MLP_DIM + MLP_DIM
                                   + MLP_DIM * HIDDEN + HIDDEN))
    bytes_accessed = 4 * (batch * N_PATCHES * PATCH_K           # patches in
                          + param_elems                         # all weights
                          + batch * N_PATCHES * HIDDEN)         # output
    return pl.CostEstimate(flops=flops, transcendentals=transcendentals,
                           bytes_accessed=bytes_accessed)


def vit_encoder_forward(images, params):
    B = images.shape[0]
    rows = _round_up(B * N_PATCHES + B, 8)       # sublane-aligned token count
    patches = extract_patches(images, PATCH)     # (B*N, K)

    kernel = functools.partial(
        vit_fused_kernel, batch=B, n_patches=N_PATCHES,
        num_heads=NUM_HEADS, num_layers=NUM_LAYERS, rows=rows)

    # Single fused invocation (no grid): at this geometry everything fits in
    # VMEM and a grid would only add per-step overhead on v5e/v6e.
    out = pl.pallas_call(
        kernel,
        out_shape=jax.ShapeDtypeStruct((B * N_PATCHES, HIDDEN), jnp.float32),
        compiler_params=pltpu.CompilerParams(vmem_limit_bytes=32 * 1024 * 1024),
        cost_estimate=_cost_estimate(B, rows),
    )(patches,
      params["proj_w"], params["proj_b"], params["cls_token"], params["pos_emb"],
      params["ln1_w"], params["ln1_b"], params["qkv_w"], params["qkv_b"],
      params["out_w"], params["out_b"], params["ln2_w"], params["ln2_b"],
      params["fc1_w"], params["fc1_b"], params["fc2_w"], params["fc2_b"])
    return out.reshape(B, N_PATCHES, HIDDEN)


# ----------------------------- deterministic init ----------------------------
def init_params(key):
    def nrm(k, shape, scale=0.02):
        return scale * jax.random.normal(k, shape, jnp.float32)

    n_keys = 4 + 8 * NUM_LAYERS
    keys = iter(jax.random.split(key, n_keys))

    params = {
        # conv_proj weight (D, C, P, P) flattened & transposed to (K, D)
        "proj_w": nrm(next(keys), (HIDDEN, PATCH_K)).T,
        "proj_b": nrm(next(keys), (1, HIDDEN)),
        "cls_token": nrm(next(keys), (1, HIDDEN)),
        "pos_emb": nrm(next(keys), (SEQ, HIDDEN)),
    }
    # Fold the attention scale 1/sqrt(head_dim) into the q portion of the qkv
    # projection (weight AND bias) -- a one-time weight transform, so no
    # per-call wrapper work and no per-layer VALU multiply in the kernel.
    qscale = jnp.concatenate([
        jnp.full((HIDDEN,), ATTN_SCALE, jnp.float32),
        jnp.ones((2 * HIDDEN,), jnp.float32)])
    layers = []
    for _ in range(NUM_LAYERS):
        qkv_w = nrm(next(keys), (3 * HIDDEN, HIDDEN))   # torch in_proj_weight
        qkv_b = nrm(next(keys), (1, 3 * HIDDEN))
        layers.append(dict(
            ln1_w=jnp.ones((1, HIDDEN), jnp.float32),
            ln1_b=jnp.zeros((1, HIDDEN), jnp.float32),
            qkv_w=(qkv_w * qscale[:, None]).T,          # (D, 3D), q pre-scaled
            qkv_b=qkv_b * qscale[None, :],
            out_w=nrm(next(keys), (HIDDEN, HIDDEN)).T,
            out_b=nrm(next(keys), (1, HIDDEN)),
            ln2_w=jnp.ones((1, HIDDEN), jnp.float32),
            ln2_b=jnp.zeros((1, HIDDEN), jnp.float32),
            fc1_w=nrm(next(keys), (MLP_DIM, HIDDEN)).T,
            fc1_b=nrm(next(keys), (1, MLP_DIM)),
            fc2_w=nrm(next(keys), (HIDDEN, MLP_DIM)).T,
            fc2_b=nrm(next(keys), (1, HIDDEN)),
        ))
    # stack per-layer tensors along a leading layer axis; the fused kernel
    # indexes them with a static layer id inside an unrolled loop.
    for name in layers[0]:
        params[name] = jnp.stack([lp[name] for lp in layers], axis=0)
    return params


# ----------------------------------- main ------------------------------------
if __name__ == "__main__":
    key = jax.random.PRNGKey(0)
    k_params, k_img = jax.random.split(key)
    params = init_params(k_params)
    images = jax.random.normal(k_img, (BATCH, CHANNELS, IMG, IMG), jnp.float32)

    out = jax.jit(vit_encoder_forward)(images, params)
    out = jax.block_until_ready(out)

    assert out.shape == (BATCH, N_PATCHES, HIDDEN), out.shape
    assert bool(jnp.all(jnp.isfinite(out)))
    print("KERNEL_OK")
</pallas_src>

<mosaic_0001>
module attributes {stable_mosaic.version = 11 : i64} {
  func.func @vit_fused_kernel(%arg0: memref<8x768xf32, #tpu.memory_space<vmem>>, %arg1: memref<768x128xf32, #tpu.memory_space<vmem>>, %arg2: memref<1x128xf32, #tpu.memory_space<vmem>>, %arg3: memref<1x128xf32, #tpu.memory_space<vmem>>, %arg4: memref<5x128xf32, #tpu.memory_space<vmem>>, %arg5: memref<2x1x128xf32, #tpu.memory_space<vmem>>, %arg6: memref<2x1x128xf32, #tpu.memory_space<vmem>>, %arg7: memref<2x128x384xf32, #tpu.memory_space<vmem>>, %arg8: memref<2x1x384xf32, #tpu.memory_space<vmem>>, %arg9: memref<2x128x128xf32, #tpu.memory_space<vmem>>, %arg10: memref<2x1x128xf32, #tpu.memory_space<vmem>>, %arg11: memref<2x1x128xf32, #tpu.memory_space<vmem>>, %arg12: memref<2x1x128xf32, #tpu.memory_space<vmem>>, %arg13: memref<2x128x512xf32, #tpu.memory_space<vmem>>, %arg14: memref<2x1x512xf32, #tpu.memory_space<vmem>>, %arg15: memref<2x512x128xf32, #tpu.memory_space<vmem>>, %arg16: memref<2x1x128xf32, #tpu.memory_space<vmem>>, %arg17: memref<8x128xf32, #tpu.memory_space<vmem>>) attributes {dimension_semantics = [], scalar_prefetch = 0 : i64, scratch_operands = 0 : i64, tpu.core_type = #tpu.core_type<tc>} {
    %c0 = arith.constant 0 : index
    %c0_0 = arith.constant 0 : index
    %0 = vector.load %arg0[%c0, %c0_0] : memref<8x768xf32, #tpu.memory_space<vmem>>, vector<8x768xf32>
    %1 = arith.truncf %0 : vector<8x768xf32> to vector<8x768xbf16>
    %c0_1 = arith.constant 0 : index
    %c0_2 = arith.constant 0 : index
    %2 = vector.load %arg1[%c0_1, %c0_2] : memref<768x128xf32, #tpu.memory_space<vmem>>, vector<768x128xf32>
    %3 = arith.truncf %2 : vector<768x128xf32> to vector<768x128xbf16>
    %cst = arith.constant dense<0.000000e+00> : vector<8x128xf32>
    %4 = tpu.matmul %1, %3, %cst {dimension_numbers = #tpu.dot_dimension_numbers<[1], [0], [0], [1], [0, 0, 1, 1], [], []>} : vector<8x768xbf16>, vector<768x128xbf16>, vector<8x128xf32> -> vector<8x128xf32>
    %c0_3 = arith.constant 0 : index
    %c0_4 = arith.constant 0 : index
    %5 = vector.load %arg2[%c0_3, %c0_4] : memref<1x128xf32, #tpu.memory_space<vmem>>, vector<1x128xf32>
    %6 = vector.broadcast %5 : vector<1x128xf32> to vector<8x128xf32>
    %7 = arith.addf %4, %6 : vector<8x128xf32>
    %c1 = arith.constant 1 : index
    %c0_5 = arith.constant 0 : index
    %8 = vector.load %arg4[%c1, %c0_5] : memref<5x128xf32, #tpu.memory_space<vmem>>, vector<4x128xf32>
    %9 = tpu.concatenate %8, %8 in 0 : vector<4x128xf32>, vector<4x128xf32> -> vector<8x128xf32>
    %c0_6 = arith.constant 0 : index
    %c0_7 = arith.constant 0 : index
    %10 = vector.load %arg3[%c0_6, %c0_7] : memref<1x128xf32, #tpu.memory_space<vmem>>, vector<1x128xf32>
    %c0_8 = arith.constant 0 : index
    %c0_9 = arith.constant 0 : index
    %11 = vector.load %arg4[%c0_8, %c0_9] : memref<5x128xf32, #tpu.memory_space<vmem>>, vector<1x128xf32>
    %12 = arith.addf %10, %11 : vector<1x128xf32>
    %13 = tpu.concatenate %12, %12 in 0 : vector<1x128xf32>, vector<1x128xf32> -> vector<2x128xf32>
    %14 = arith.addf %7, %9 : vector<8x128xf32>
    %cst_10 = arith.constant 0.000000e+00 : f32
    %15 = vector.broadcast %cst_10 : f32 to vector<6x128xf32>
    %16 = tpu.concatenate %14, %13, %15 in 0 : vector<8x128xf32>, vector<2x128xf32>, vector<6x128xf32> -> vector<16x128xf32>
    %17 = tpu.iota {dimensions = array<i32: 0>} : vector<16x16xi32>
    %18 = tpu.iota {dimensions = array<i32: 1>} : vector<16x16xi32>
    %c10_i32 = arith.constant 10 : i32
    %19 = vector.broadcast %c10_i32 : i32 to vector<16x16xi32>
    %20 = arith.cmpi sge, %17, %19 : vector<16x16xi32>
    %c10_i32_11 = arith.constant 10 : i32
    %21 = vector.broadcast %c10_i32_11 : i32 to vector<16x16xi32>
    %22 = arith.cmpi sge, %18, %21 : vector<16x16xi32>
    %23 = arith.andi %20, %22 : vector<16x16xi1>
    %c0_i32 = arith.constant 0 : i32
    %24 = vector.broadcast %c0_i32 : i32 to vector<16x16xi32>
    %25 = arith.cmpi sge, %17, %24 : vector<16x16xi32>
    %c4_i32 = arith.constant 4 : i32
    %26 = vector.broadcast %c4_i32 : i32 to vector<16x16xi32>
    %27 = arith.cmpi slt, %17, %26 : vector<16x16xi32>
    %28 = arith.andi %25, %27 : vector<16x16xi1>
    %c8_i32 = arith.constant 8 : i32
    %29 = vector.broadcast %c8_i32 : i32 to vector<16x16xi32>
    %30 = arith.cmpi eq, %17, %29 : vector<16x16xi32>
    %31 = arith.ori %28, %30 : vector<16x16xi1>
    %c0_i32_12 = arith.constant 0 : i32
    %32 = vector.broadcast %c0_i32_12 : i32 to vector<16x16xi32>
    %33 = arith.cmpi sge, %18, %32 : vector<16x16xi32>
    %c4_i32_13 = arith.constant 4 : i32
    %34 = vector.broadcast %c4_i32_13 : i32 to vector<16x16xi32>
    %35 = arith.cmpi slt, %18, %34 : vector<16x16xi32>
    %36 = arith.andi %33, %35 : vector<16x16xi1>
    %c8_i32_14 = arith.constant 8 : i32
    %37 = vector.broadcast %c8_i32_14 : i32 to vector<16x16xi32>
    %38 = arith.cmpi eq, %18, %37 : vector<16x16xi32>
    %39 = arith.ori %36, %38 : vector<16x16xi1>
    %40 = arith.andi %31, %39 : vector<16x16xi1>
    %41 = arith.ori %23, %40 : vector<16x16xi1>
    %c4_i32_15 = arith.constant 4 : i32
    %42 = vector.broadcast %c4_i32_15 : i32 to vector<16x16xi32>
    %43 = arith.cmpi sge, %17, %42 : vector<16x16xi32>
    %c8_i32_16 = arith.constant 8 : i32
    %44 = vector.broadcast %c8_i32_16 : i32 to vector<16x16xi32>
    %45 = arith.cmpi slt, %17, %44 : vector<16x16xi32>
    %46 = arith.andi %43, %45 : vector<16x16xi1>
    %c9_i32 = arith.constant 9 : i32
    %47 = vector.broadcast %c9_i32 : i32 to vector<16x16xi32>
    %48 = arith.cmpi eq, %17, %47 : vector<16x16xi32>
    %49 = arith.ori %46, %48 : vector<16x16xi1>
    %c4_i32_17 = arith.constant 4 : i32
    %50 = vector.broadcast %c4_i32_17 : i32 to vector<16x16xi32>
    %51 = arith.cmpi sge, %18, %50 : vector<16x16xi32>
    %c8_i32_18 = arith.constant 8 : i32
    %52 = vector.broadcast %c8_i32_18 : i32 to vector<16x16xi32>
    %53 = arith.cmpi slt, %18, %52 : vector<16x16xi32>
    %54 = arith.andi %51, %53 : vector<16x16xi1>
    %c9_i32_19 = arith.constant 9 : i32
    %55 = vector.broadcast %c9_i32_19 : i32 to vector<16x16xi32>
    %56 = arith.cmpi eq, %18, %55 : vector<16x16xi32>
    %57 = arith.ori %54, %56 : vector<16x16xi1>
    %58 = arith.andi %49, %57 : vector<16x16xi1>
    %59 = arith.ori %41, %58 : vector<16x16xi1>
    %cst_20 = arith.constant 0.000000e+00 : f32
    %cst_21 = arith.constant -1.000000e+30 : f32
    %60 = vector.broadcast %cst_20 : f32 to vector<16x16xf32>
    %61 = vector.broadcast %cst_21 : f32 to vector<16x16xf32>
    %62 = arith.select %59, %60, %61 : vector<16x16xi1>, vector<16x16xf32>
    %c0_22 = arith.constant 0 : index
    %c0_23 = arith.constant 0 : index
    %c0_24 = arith.constant 0 : index
    %63 = vector.load %arg5[%c0_22, %c0_23, %c0_24] : memref<2x1x128xf32, #tpu.memory_space<vmem>>, vector<1x1x128xf32>
    %64 = vector.shape_cast %63 : vector<1x1x128xf32> to vector<1x128xf32>
    %c0_25 = arith.constant 0 : index
    %c0_26 = arith.constant 0 : index
    %c0_27 = arith.constant 0 : index
    %65 = vector.load %arg6[%c0_25, %c0_26, %c0_27] : memref<2x1x128xf32, #tpu.memory_space<vmem>>, vector<1x1x128xf32>
    %66 = vector.shape_cast %65 : vector<1x1x128xf32> to vector<1x128xf32>
    %cst_28 = arith.constant dense<0.000000e+00> : vector<16xf32>
    %67 = vector.multi_reduction <add>, %16, %cst_28 [1] : vector<16x128xf32> to vector<16xf32>
    %68 = vector.shape_cast %67 : vector<16xf32> to vector<16x1xf32>
    %cst_29 = arith.constant 1.280000e+02 : f32
    %69 = vector.broadcast %cst_29 : f32 to vector<16x1xf32>
    %70 = arith.divf %68, %69 : vector<16x1xf32>
    %71 = vector.broadcast %70 : vector<16x1xf32> to vector<16x128xf32>
    %72 = arith.subf %16, %71 : vector<16x128xf32>
    %73 = arith.mulf %72, %72 : vector<16x128xf32>
    %cst_30 = arith.constant dense<0.000000e+00> : vector<16xf32>
    %74 = vector.multi_reduction <add>, %73, %cst_30 [1] : vector<16x128xf32> to vector<16xf32>
    %75 = vector.shape_cast %74 : vector<16xf32> to vector<16x1xf32>
    %cst_31 = arith.constant 1.280000e+02 : f32
    %76 = vector.broadcast %cst_31 : f32 to vector<16x1xf32>
    %77 = arith.divf %75, %76 : vector<16x1xf32>
    %cst_32 = arith.constant 9.99999997E-7 : f32
    %78 = vector.broadcast %cst_32 : f32 to vector<16x1xf32>
    %79 = arith.addf %77, %78 : vector<16x1xf32>
    %80 = math.rsqrt %79 : vector<16x1xf32>
    %81 = vector.broadcast %80 : vector<16x1xf32> to vector<16x128xf32>
    %82 = arith.mulf %72, %81 : vector<16x128xf32>
    %83 = vector.broadcast %64 : vector<1x128xf32> to vector<16x128xf32>
    %84 = arith.mulf %82, %83 : vector<16x128xf32>
    %85 = vector.broadcast %66 : vector<1x128xf32> to vector<16x128xf32>
    %86 = arith.addf %84, %85 : vector<16x128xf32>
    %87 = arith.truncf %86 : vector<16x128xf32> to vector<16x128xbf16>
    %c0_33 = arith.constant 0 : index
    %c0_34 = arith.constant 0 : index
    %c0_35 = arith.constant 0 : index
    %88 = vector.load %arg7[%c0_33, %c0_34, %c0_35] : memref<2x128x384xf32, #tpu.memory_space<vmem>>, vector<1x128x384xf32>
    %89 = vector.shape_cast %88 : vector<1x128x384xf32> to vector<128x384xf32>
    %90 = arith.truncf %89 : vector<128x384xf32> to vector<128x384xbf16>
    %cst_36 = arith.constant dense<0.000000e+00> : vector<16x384xf32>
    %91 = tpu.matmul %87, %90, %cst_36 {dimension_numbers = #tpu.dot_dimension_numbers<[1], [0], [0], [1], [0, 0, 1, 1], [], []>} : vector<16x128xbf16>, vector<128x384xbf16>, vector<16x384xf32> -> vector<16x384xf32>
    %c0_37 = arith.constant 0 : index
    %c0_38 = arith.constant 0 : index
    %c0_39 = arith.constant 0 : index
    %92 = vector.load %arg8[%c0_37, %c0_38, %c0_39] : memref<2x1x384xf32, #tpu.memory_space<vmem>>, vector<1x1x384xf32>
    %93 = vector.shape_cast %92 : vector<1x1x384xf32> to vector<1x384xf32>
    %94 = vector.broadcast %93 : vector<1x384xf32> to vector<16x384xf32>
    %95 = arith.addf %91, %94 : vector<16x384xf32>
    %96 = vector.extract_strided_slice %95 {offsets = [0, 0], sizes = [16, 128], strides = [1, 1]} : vector<16x384xf32> to vector<16x128xf32>
    %97 = vector.extract_strided_slice %95 {offsets = [0, 128], sizes = [16, 128], strides = [1, 1]} : vector<16x384xf32> to vector<16x128xf32>
    %98 = vector.extract_strided_slice %95 {offsets = [0, 256], sizes = [16, 128], strides = [1, 1]} : vector<16x384xf32> to vector<16x128xf32>
    %99 = vector.extract_strided_slice %96 {offsets = [0, 0], sizes = [16, 64], strides = [1, 1]} : vector<16x128xf32> to vector<16x64xf32>
    %100 = arith.truncf %99 : vector<16x64xf32> to vector<16x64xbf16>
    %101 = vector.extract_strided_slice %97 {offsets = [0, 0], sizes = [16, 64], strides = [1, 1]} : vector<16x128xf32> to vector<16x64xf32>
    %102 = arith.truncf %101 : vector<16x64xf32> to vector<16x64xbf16>
    %103 = vector.extract_strided_slice %98 {offsets = [0, 0], sizes = [16, 64], strides = [1, 1]} : vector<16x128xf32> to vector<16x64xf32>
    %104 = arith.truncf %103 : vector<16x64xf32> to vector<16x64xbf16>
    %cst_40 = arith.constant dense<0.000000e+00> : vector<16x16xf32>
    %105 = tpu.matmul %100, %102, %cst_40 {dimension_numbers = #tpu.dot_dimension_numbers<[1], [1], [0], [0], [0, 0, 1, 0], [], []>} : vector<16x64xbf16>, vector<16x64xbf16>, vector<16x16xf32> -> vector<16x16xf32>
    %106 = arith.addf %105, %62 : vector<16x16xf32>
    %cst_41 = arith.constant dense<0xFF800000> : vector<16xf32>
    %107 = vector.multi_reduction <maximumf>, %106, %cst_41 [1] : vector<16x16xf32> to vector<16xf32>
    %108 = vector.shape_cast %107 : vector<16xf32> to vector<16x1xf32>
    %109 = vector.broadcast %108 : vector<16x1xf32> to vector<16x16xf32>
    %110 = arith.subf %106, %109 : vector<16x16xf32>
    %111 = math.exp %110 : vector<16x16xf32>
    %cst_42 = arith.constant dense<0.000000e+00> : vector<16xf32>
    %112 = vector.multi_reduction <add>, %111, %cst_42 [1] : vector<16x16xf32> to vector<16xf32>
    %113 = vector.shape_cast %112 : vector<16xf32> to vector<16x1xf32>
    %114 = tpu.reciprocal %113 {approx = true} : vector<16x1xf32> -> vector<16x1xf32>
    %115 = vector.broadcast %114 : vector<16x1xf32> to vector<16x16xf32>
    %116 = arith.mulf %111, %115 : vector<16x16xf32>
    %117 = arith.truncf %116 : vector<16x16xf32> to vector<16x16xbf16>
    %cst_43 = arith.constant dense<0.000000e+00> : vector<16x64xf32>
    %118 = tpu.matmul %117, %104, %cst_43 {dimension_numbers = #tpu.dot_dimension_numbers<[1], [0], [0], [1], [0, 0, 1, 1], [], []>} : vector<16x16xbf16>, vector<16x64xbf16>, vector<16x64xf32> -> vector<16x64xf32>
    %119 = vector.extract_strided_slice %96 {offsets = [0, 64], sizes = [16, 64], strides = [1, 1]} : vector<16x128xf32> to vector<16x64xf32>
    %120 = arith.truncf %119 : vector<16x64xf32> to vector<16x64xbf16>
    %121 = vector.extract_strided_slice %97 {offsets = [0, 64], sizes = [16, 64], strides = [1, 1]} : vector<16x128xf32> to vector<16x64xf32>
    %122 = arith.truncf %121 : vector<16x64xf32> to vector<16x64xbf16>
    %123 = vector.extract_strided_slice %98 {offsets = [0, 64], sizes = [16, 64], strides = [1, 1]} : vector<16x128xf32> to vector<16x64xf32>
    %124 = arith.truncf %123 : vector<16x64xf32> to vector<16x64xbf16>
    %cst_44 = arith.constant dense<0.000000e+00> : vector<16x16xf32>
    %125 = tpu.matmul %120, %122, %cst_44 {dimension_numbers = #tpu.dot_dimension_numbers<[1], [1], [0], [0], [0, 0, 1, 0], [], []>} : vector<16x64xbf16>, vector<16x64xbf16>, vector<16x16xf32> -> vector<16x16xf32>
    %126 = arith.addf %125, %62 : vector<16x16xf32>
    %cst_45 = arith.constant dense<0xFF800000> : vector<16xf32>
    %127 = vector.multi_reduction <maximumf>, %126, %cst_45 [1] : vector<16x16xf32> to vector<16xf32>
    %128 = vector.shape_cast %127 : vector<16xf32> to vector<16x1xf32>
    %129 = vector.broadcast %128 : vector<16x1xf32> to vector<16x16xf32>
    %130 = arith.subf %126, %129 : vector<16x16xf32>
    %131 = math.exp %130 : vector<16x16xf32>
    %cst_46 = arith.constant dense<0.000000e+00> : vector<16xf32>
    %132 = vector.multi_reduction <add>, %131, %cst_46 [1] : vector<16x16xf32> to vector<16xf32>
    %133 = vector.shape_cast %132 : vector<16xf32> to vector<16x1xf32>
    %134 = tpu.reciprocal %133 {approx = true} : vector<16x1xf32> -> vector<16x1xf32>
    %135 = vector.broadcast %134 : vector<16x1xf32> to vector<16x16xf32>
    %136 = arith.mulf %131, %135 : vector<16x16xf32>
    %137 = arith.truncf %136 : vector<16x16xf32> to vector<16x16xbf16>
    %cst_47 = arith.constant dense<0.000000e+00> : vector<16x64xf32>
    %138 = tpu.matmul %137, %124, %cst_47 {dimension_numbers = #tpu.dot_dimension_numbers<[1], [0], [0], [1], [0, 0, 1, 1], [], []>} : vector<16x16xbf16>, vector<16x64xbf16>, vector<16x64xf32> -> vector<16x64xf32>
    %139 = tpu.concatenate %118, %138 in 1 : vector<16x64xf32>, vector<16x64xf32> -> vector<16x128xf32>
    %140 = arith.truncf %139 : vector<16x128xf32> to vector<16x128xbf16>
    %c0_48 = arith.constant 0 : index
    %c0_49 = arith.constant 0 : index
    %c0_50 = arith.constant 0 : index
    %141 = vector.load %arg9[%c0_48, %c0_49, %c0_50] : memref<2x128x128xf32, #tpu.memory_space<vmem>>, vector<1x128x128xf32>
    %142 = vector.shape_cast %141 : vector<1x128x128xf32> to vector<128x128xf32>
    %143 = arith.truncf %142 : vector<128x128xf32> to vector<128x128xbf16>
    %cst_51 = arith.constant dense<0.000000e+00> : vector<16x128xf32>
    %144 = tpu.matmul %140, %143, %cst_51 {dimension_numbers = #tpu.dot_dimension_numbers<[1], [0], [0], [1], [0, 0, 1, 1], [], []>} : vector<16x128xbf16>, vector<128x128xbf16>, vector<16x128xf32> -> vector<16x128xf32>
    %c0_52 = arith.constant 0 : index
    %c0_53 = arith.constant 0 : index
    %c0_54 = arith.constant 0 : index
    %145 = vector.load %arg10[%c0_52, %c0_53, %c0_54] : memref<2x1x128xf32, #tpu.memory_space<vmem>>, vector<1x1x128xf32>
    %146 = vector.shape_cast %145 : vector<1x1x128xf32> to vector<1x128xf32>
    %147 = vector.broadcast %146 : vector<1x128xf32> to vector<16x128xf32>
    %148 = arith.addf %144, %147 : vector<16x128xf32>
    %149 = arith.addf %16, %148 : vector<16x128xf32>
    %c0_55 = arith.constant 0 : index
    %c0_56 = arith.constant 0 : index
    %c0_57 = arith.constant 0 : index
    %150 = vector.load %arg11[%c0_55, %c0_56, %c0_57] : memref<2x1x128xf32, #tpu.memory_space<vmem>>, vector<1x1x128xf32>
    %151 = vector.shape_cast %150 : vector<1x1x128xf32> to vector<1x128xf32>
    %c0_58 = arith.constant 0 : index
    %c0_59 = arith.constant 0 : index
    %c0_60 = arith.constant 0 : index
    %152 = vector.load %arg12[%c0_58, %c0_59, %c0_60] : memref<2x1x128xf32, #tpu.memory_space<vmem>>, vector<1x1x128xf32>
    %153 = vector.shape_cast %152 : vector<1x1x128xf32> to vector<1x128xf32>
    %cst_61 = arith.constant dense<0.000000e+00> : vector<16xf32>
    %154 = vector.multi_reduction <add>, %149, %cst_61 [1] : vector<16x128xf32> to vector<16xf32>
    %155 = vector.shape_cast %154 : vector<16xf32> to vector<16x1xf32>
    %cst_62 = arith.constant 1.280000e+02 : f32
    %156 = vector.broadcast %cst_62 : f32 to vector<16x1xf32>
    %157 = arith.divf %155, %156 : vector<16x1xf32>
    %158 = vector.broadcast %157 : vector<16x1xf32> to vector<16x128xf32>
    %159 = arith.subf %149, %158 : vector<16x128xf32>
    %160 = arith.mulf %159, %159 : vector<16x128xf32>
    %cst_63 = arith.constant dense<0.000000e+00> : vector<16xf32>
    %161 = vector.multi_reduction <add>, %160, %cst_63 [1] : vector<16x128xf32> to vector<16xf32>
    %162 = vector.shape_cast %161 : vector<16xf32> to vector<16x1xf32>
    %cst_64 = arith.constant 1.280000e+02 : f32
    %163 = vector.broadcast %cst_64 : f32 to vector<16x1xf32>
    %164 = arith.divf %162, %163 : vector<16x1xf32>
    %cst_65 = arith.constant 9.99999997E-7 : f32
    %165 = vector.broadcast %cst_65 : f32 to vector<16x1xf32>
    %166 = arith.addf %164, %165 : vector<16x1xf32>
    %167 = math.rsqrt %166 : vector<16x1xf32>
    %168 = vector.broadcast %167 : vector<16x1xf32> to vector<16x128xf32>
    %169 = arith.mulf %159, %168 : vector<16x128xf32>
    %170 = vector.broadcast %151 : vector<1x128xf32> to vector<16x128xf32>
    %171 = arith.mulf %169, %170 : vector<16x128xf32>
    %172 = vector.broadcast %153 : vector<1x128xf32> to vector<16x128xf32>
    %173 = arith.addf %171, %172 : vector<16x128xf32>
    %174 = arith.truncf %173 : vector<16x128xf32> to vector<16x128xbf16>
    %c0_66 = arith.constant 0 : index
    %c0_67 = arith.constant 0 : index
    %c0_68 = arith.constant 0 : index
    %175 = vector.load %arg13[%c0_66, %c0_67, %c0_68] : memref<2x128x512xf32, #tpu.memory_space<vmem>>, vector<1x128x512xf32>
    %176 = vector.shape_cast %175 : vector<1x128x512xf32> to vector<128x512xf32>
    %177 = arith.truncf %176 : vector<128x512xf32> to vector<128x512xbf16>
    %cst_69 = arith.constant dense<0.000000e+00> : vector<16x512xf32>
    %178 = tpu.matmul %174, %177, %cst_69 {dimension_numbers = #tpu.dot_dimension_numbers<[1], [0], [0], [1], [0, 0, 1, 1], [], []>} : vector<16x128xbf16>, vector<128x512xbf16>, vector<16x512xf32> -> vector<16x512xf32>
    %c0_70 = arith.constant 0 : index
    %c0_71 = arith.constant 0 : index
    %c0_72 = arith.constant 0 : index
    %179 = vector.load %arg14[%c0_70, %c0_71, %c0_72] : memref<2x1x512xf32, #tpu.memory_space<vmem>>, vector<1x1x512xf32>
    %180 = vector.shape_cast %179 : vector<1x1x512xf32> to vector<1x512xf32>
    %181 = vector.broadcast %180 : vector<1x512xf32> to vector<16x512xf32>
    %182 = arith.addf %178, %181 : vector<16x512xf32>
    %cst_73 = arith.constant 5.000000e-01 : f32
    %183 = vector.broadcast %cst_73 : f32 to vector<16x512xf32>
    %184 = arith.mulf %183, %182 : vector<16x512xf32>
    %cst_74 = arith.constant 4.471500e-02 : f32
    %185 = vector.broadcast %cst_74 : f32 to vector<16x512xf32>
    %186 = arith.mulf %185, %182 : vector<16x512xf32>
    %187 = arith.mulf %186, %182 : vector<16x512xf32>
    %188 = arith.mulf %187, %182 : vector<16x512xf32>
    %189 = arith.addf %182, %188 : vector<16x512xf32>
    %cst_75 = arith.constant 0.797884583 : f32
    %190 = vector.broadcast %cst_75 : f32 to vector<16x512xf32>
    %191 = arith.mulf %190, %189 : vector<16x512xf32>
    %192 = math.tanh %191 : vector<16x512xf32>
    %cst_76 = arith.constant 1.000000e+00 : f32
    %193 = vector.broadcast %cst_76 : f32 to vector<16x512xf32>
    %194 = arith.addf %193, %192 : vector<16x512xf32>
    %195 = arith.mulf %184, %194 : vector<16x512xf32>
    %196 = arith.truncf %195 : vector<16x512xf32> to vector<16x512xbf16>
    %c0_77 = arith.constant 0 : index
    %c0_78 = arith.constant 0 : index
    %c0_79 = arith.constant 0 : index
    %197 = vector.load %arg15[%c0_77, %c0_78, %c0_79] : memref<2x512x128xf32, #tpu.memory_space<vmem>>, vector<1x512x128xf32>
    %198 = vector.shape_cast %197 : vector<1x512x128xf32> to vector<512x128xf32>
    %199 = arith.truncf %198 : vector<512x128xf32> to vector<512x128xbf16>
    %cst_80 = arith.constant dense<0.000000e+00> : vector<16x128xf32>
    %200 = tpu.matmul %196, %199, %cst_80 {dimension_numbers = #tpu.dot_dimension_numbers<[1], [0], [0], [1], [0, 0, 1, 1], [], []>} : vector<16x512xbf16>, vector<512x128xbf16>, vector<16x128xf32> -> vector<16x128xf32>
    %c0_81 = arith.constant 0 : index
    %c0_82 = arith.constant 0 : index
    %c0_83 = arith.constant 0 : index
    %201 = vector.load %arg16[%c0_81, %c0_82, %c0_83] : memref<2x1x128xf32, #tpu.memory_space<vmem>>, vector<1x1x128xf32>
    %202 = vector.shape_cast %201 : vector<1x1x128xf32> to vector<1x128xf32>
    %203 = vector.broadcast %202 : vector<1x128xf32> to vector<16x128xf32>
    %204 = arith.addf %200, %203 : vector<16x128xf32>
    %205 = arith.addf %149, %204 : vector<16x128xf32>
    %c1_84 = arith.constant 1 : index
    %c0_85 = arith.constant 0 : index
    %c0_86 = arith.constant 0 : index
    %206 = vector.load %arg5[%c1_84, %c0_85, %c0_86] : memref<2x1x128xf32, #tpu.memory_space<vmem>>, vector<1x1x128xf32>
    %207 = vector.shape_cast %206 : vector<1x1x128xf32> to vector<1x128xf32>
    %c1_87 = arith.constant 1 : index
    %c0_88 = arith.constant 0 : index
    %c0_89 = arith.constant 0 : index
    %208 = vector.load %arg6[%c1_87, %c0_88, %c0_89] : memref<2x1x128xf32, #tpu.memory_space<vmem>>, vector<1x1x128xf32>
    %209 = vector.shape_cast %208 : vector<1x1x128xf32> to vector<1x128xf32>
    %cst_90 = arith.constant dense<0.000000e+00> : vector<16xf32>
    %210 = vector.multi_reduction <add>, %205, %cst_90 [1] : vector<16x128xf32> to vector<16xf32>
    %211 = vector.shape_cast %210 : vector<16xf32> to vector<16x1xf32>
    %cst_91 = arith.constant 1.280000e+02 : f32
    %212 = vector.broadcast %cst_91 : f32 to vector<16x1xf32>
    %213 = arith.divf %211, %212 : vector<16x1xf32>
    %214 = vector.broadcast %213 : vector<16x1xf32> to vector<16x128xf32>
    %215 = arith.subf %205, %214 : vector<16x128xf32>
    %216 = arith.mulf %215, %215 : vector<16x128xf32>
    %cst_92 = arith.constant dense<0.000000e+00> : vector<16xf32>
    %217 = vector.multi_reduction <add>, %216, %cst_92 [1] : vector<16x128xf32> to vector<16xf32>
    %218 = vector.shape_cast %217 : vector<16xf32> to vector<16x1xf32>
    %cst_93 = arith.constant 1.280000e+02 : f32
    %219 = vector.broadcast %cst_93 : f32 to vector<16x1xf32>
    %220 = arith.divf %218, %219 : vector<16x1xf32>
    %cst_94 = arith.constant 9.99999997E-7 : f32
    %221 = vector.broadcast %cst_94 : f32 to vector<16x1xf32>
    %222 = arith.addf %220, %221 : vector<16x1xf32>
    %223 = math.rsqrt %222 : vector<16x1xf32>
    %224 = vector.broadcast %223 : vector<16x1xf32> to vector<16x128xf32>
    %225 = arith.mulf %215, %224 : vector<16x128xf32>
    %226 = vector.broadcast %207 : vector<1x128xf32> to vector<16x128xf32>
    %227 = arith.mulf %225, %226 : vector<16x128xf32>
    %228 = vector.broadcast %209 : vector<1x128xf32> to vector<16x128xf32>
    %229 = arith.addf %227, %228 : vector<16x128xf32>
    %230 = arith.truncf %229 : vector<16x128xf32> to vector<16x128xbf16>
    %c1_95 = arith.constant 1 : index
    %c0_96 = arith.constant 0 : index
    %c0_97 = arith.constant 0 : index
    %231 = vector.load %arg7[%c1_95, %c0_96, %c0_97] : memref<2x128x384xf32, #tpu.memory_space<vmem>>, vector<1x128x384xf32>
    %232 = vector.shape_cast %231 : vector<1x128x384xf32> to vector<128x384xf32>
    %233 = arith.truncf %232 : vector<128x384xf32> to vector<128x384xbf16>
    %cst_98 = arith.constant dense<0.000000e+00> : vector<16x384xf32>
    %234 = tpu.matmul %230, %233, %cst_98 {dimension_numbers = #tpu.dot_dimension_numbers<[1], [0], [0], [1], [0, 0, 1, 1], [], []>} : vector<16x128xbf16>, vector<128x384xbf16>, vector<16x384xf32> -> vector<16x384xf32>
    %c1_99 = arith.constant 1 : index
    %c0_100 = arith.constant 0 : index
    %c0_101 = arith.constant 0 : index
    %235 = vector.load %arg8[%c1_99, %c0_100, %c0_101] : memref<2x1x384xf32, #tpu.memory_space<vmem>>, vector<1x1x384xf32>
    %236 = vector.shape_cast %235 : vector<1x1x384xf32> to vector<1x384xf32>
    %237 = vector.broadcast %236 : vector<1x384xf32> to vector<16x384xf32>
    %238 = arith.addf %234, %237 : vector<16x384xf32>
    %239 = vector.extract_strided_slice %238 {offsets = [0, 0], sizes = [16, 128], strides = [1, 1]} : vector<16x384xf32> to vector<16x128xf32>
    %240 = vector.extract_strided_slice %238 {offsets = [0, 128], sizes = [16, 128], strides = [1, 1]} : vector<16x384xf32> to vector<16x128xf32>
    %241 = vector.extract_strided_slice %238 {offsets = [0, 256], sizes = [16, 128], strides = [1, 1]} : vector<16x384xf32> to vector<16x128xf32>
    %242 = vector.extract_strided_slice %239 {offsets = [0, 0], sizes = [16, 64], strides = [1, 1]} : vector<16x128xf32> to vector<16x64xf32>
    %243 = arith.truncf %242 : vector<16x64xf32> to vector<16x64xbf16>
    %244 = vector.extract_strided_slice %240 {offsets = [0, 0], sizes = [16, 64], strides = [1, 1]} : vector<16x128xf32> to vector<16x64xf32>
    %245 = arith.truncf %244 : vector<16x64xf32> to vector<16x64xbf16>
    %246 = vector.extract_strided_slice %241 {offsets = [0, 0], sizes = [16, 64], strides = [1, 1]} : vector<16x128xf32> to vector<16x64xf32>
    %247 = arith.truncf %246 : vector<16x64xf32> to vector<16x64xbf16>
    %cst_102 = arith.constant dense<0.000000e+00> : vector<16x16xf32>
    %248 = tpu.matmul %243, %245, %cst_102 {dimension_numbers = #tpu.dot_dimension_numbers<[1], [1], [0], [0], [0, 0, 1, 0], [], []>} : vector<16x64xbf16>, vector<16x64xbf16>, vector<16x16xf32> -> vector<16x16xf32>
    %249 = arith.addf %248, %62 : vector<16x16xf32>
    %cst_103 = arith.constant dense<0xFF800000> : vector<16xf32>
    %250 = vector.multi_reduction <maximumf>, %249, %cst_103 [1] : vector<16x16xf32> to vector<16xf32>
    %251 = vector.shape_cast %250 : vector<16xf32> to vector<16x1xf32>
    %252 = vector.broadcast %251 : vector<16x1xf32> to vector<16x16xf32>
    %253 = arith.subf %249, %252 : vector<16x16xf32>
    %254 = math.exp %253 : vector<16x16xf32>
    %cst_104 = arith.constant dense<0.000000e+00> : vector<16xf32>
    %255 = vector.multi_reduction <add>, %254, %cst_104 [1] : vector<16x16xf32> to vector<16xf32>
    %256 = vector.shape_cast %255 : vector<16xf32> to vector<16x1xf32>
    %257 = tpu.reciprocal %256 {approx = true} : vector<16x1xf32> -> vector<16x1xf32>
    %258 = vector.broadcast %257 : vector<16x1xf32> to vector<16x16xf32>
    %259 = arith.mulf %254, %258 : vector<16x16xf32>
    %260 = arith.truncf %259 : vector<16x16xf32> to vector<16x16xbf16>
    %cst_105 = arith.constant dense<0.000000e+00> : vector<16x64xf32>
    %261 = tpu.matmul %260, %247, %cst_105 {dimension_numbers = #tpu.dot_dimension_numbers<[1], [0], [0], [1], [0, 0, 1, 1], [], []>} : vector<16x16xbf16>, vector<16x64xbf16>, vector<16x64xf32> -> vector<16x64xf32>
    %262 = vector.extract_strided_slice %239 {offsets = [0, 64], sizes = [16, 64], strides = [1, 1]} : vector<16x128xf32> to vector<16x64xf32>
    %263 = arith.truncf %262 : vector<16x64xf32> to vector<16x64xbf16>
    %264 = vector.extract_strided_slice %240 {offsets = [0, 64], sizes = [16, 64], strides = [1, 1]} : vector<16x128xf32> to vector<16x64xf32>
    %265 = arith.truncf %264 : vector<16x64xf32> to vector<16x64xbf16>
    %266 = vector.extract_strided_slice %241 {offsets = [0, 64], sizes = [16, 64], strides = [1, 1]} : vector<16x128xf32> to vector<16x64xf32>
    %267 = arith.truncf %266 : vector<16x64xf32> to vector<16x64xbf16>
    %cst_106 = arith.constant dense<0.000000e+00> : vector<16x16xf32>
    %268 = tpu.matmul %263, %265, %cst_106 {dimension_numbers = #tpu.dot_dimension_numbers<[1], [1], [0], [0], [0, 0, 1, 0], [], []>} : vector<16x64xbf16>, vector<16x64xbf16>, vector<16x16xf32> -> vector<16x16xf32>
    %269 = arith.addf %268, %62 : vector<16x16xf32>
    %cst_107 = arith.constant dense<0xFF800000> : vector<16xf32>
    %270 = vector.multi_reduction <maximumf>, %269, %cst_107 [1] : vector<16x16xf32> to vector<16xf32>
    %271 = vector.shape_cast %270 : vector<16xf32> to vector<16x1xf32>
    %272 = vector.broadcast %271 : vector<16x1xf32> to vector<16x16xf32>
    %273 = arith.subf %269, %272 : vector<16x16xf32>
    %274 = math.exp %273 : vector<16x16xf32>
    %cst_108 = arith.constant dense<0.000000e+00> : vector<16xf32>
    %275 = vector.multi_reduction <add>, %274, %cst_108 [1] : vector<16x16xf32> to vector<16xf32>
    %276 = vector.shape_cast %275 : vector<16xf32> to vector<16x1xf32>
    %277 = tpu.reciprocal %276 {approx = true} : vector<16x1xf32> -> vector<16x1xf32>
    %278 = vector.broadcast %277 : vector<16x1xf32> to vector<16x16xf32>
    %279 = arith.mulf %274, %278 : vector<16x16xf32>
    %280 = arith.truncf %279 : vector<16x16xf32> to vector<16x16xbf16>
    %cst_109 = arith.constant dense<0.000000e+00> : vector<16x64xf32>
    %281 = tpu.matmul %280, %267, %cst_109 {dimension_numbers = #tpu.dot_dimension_numbers<[1], [0], [0], [1], [0, 0, 1, 1], [], []>} : vector<16x16xbf16>, vector<16x64xbf16>, vector<16x64xf32> -> vector<16x64xf32>
    %282 = tpu.concatenate %261, %281 in 1 : vector<16x64xf32>, vector<16x64xf32> -> vector<16x128xf32>
    %283 = arith.truncf %282 : vector<16x128xf32> to vector<16x128xbf16>
    %c1_110 = arith.constant 1 : index
    %c0_111 = arith.constant 0 : index
    %c0_112 = arith.constant 0 : index
    %284 = vector.load %arg9[%c1_110, %c0_111, %c0_112] : memref<2x128x128xf32, #tpu.memory_space<vmem>>, vector<1x128x128xf32>
    %285 = vector.shape_cast %284 : vector<1x128x128xf32> to vector<128x128xf32>
    %286 = arith.truncf %285 : vector<128x128xf32> to vector<128x128xbf16>
    %cst_113 = arith.constant dense<0.000000e+00> : vector<16x128xf32>
    %287 = tpu.matmul %283, %286, %cst_113 {dimension_numbers = #tpu.dot_dimension_numbers<[1], [0], [0], [1], [0, 0, 1, 1], [], []>} : vector<16x128xbf16>, vector<128x128xbf16>, vector<16x128xf32> -> vector<16x128xf32>
    %c1_114 = arith.constant 1 : index
    %c0_115 = arith.constant 0 : index
    %c0_116 = arith.constant 0 : index
    %288 = vector.load %arg10[%c1_114, %c0_115, %c0_116] : memref<2x1x128xf32, #tpu.memory_space<vmem>>, vector<1x1x128xf32>
    %289 = vector.shape_cast %288 : vector<1x1x128xf32> to vector<1x128xf32>
    %290 = vector.broadcast %289 : vector<1x128xf32> to vector<16x128xf32>
    %291 = arith.addf %287, %290 : vector<16x128xf32>
    %292 = arith.addf %205, %291 : vector<16x128xf32>
    %c1_117 = arith.constant 1 : index
    %c0_118 = arith.constant 0 : index
    %c0_119 = arith.constant 0 : index
    %293 = vector.load %arg11[%c1_117, %c0_118, %c0_119] : memref<2x1x128xf32, #tpu.memory_space<vmem>>, vector<1x1x128xf32>
    %294 = vector.shape_cast %293 : vector<1x1x128xf32> to vector<1x128xf32>
    %c1_120 = arith.constant 1 : index
    %c0_121 = arith.constant 0 : index
    %c0_122 = arith.constant 0 : index
    %295 = vector.load %arg12[%c1_120, %c0_121, %c0_122] : memref<2x1x128xf32, #tpu.memory_space<vmem>>, vector<1x1x128xf32>
    %296 = vector.shape_cast %295 : vector<1x1x128xf32> to vector<1x128xf32>
    %cst_123 = arith.constant dense<0.000000e+00> : vector<16xf32>
    %297 = vector.multi_reduction <add>, %292, %cst_123 [1] : vector<16x128xf32> to vector<16xf32>
    %298 = vector.shape_cast %297 : vector<16xf32> to vector<16x1xf32>
    %cst_124 = arith.constant 1.280000e+02 : f32
    %299 = vector.broadcast %cst_124 : f32 to vector<16x1xf32>
    %300 = arith.divf %298, %299 : vector<16x1xf32>
    %301 = vector.broadcast %300 : vector<16x1xf32> to vector<16x128xf32>
    %302 = arith.subf %292, %301 : vector<16x128xf32>
    %303 = arith.mulf %302, %302 : vector<16x128xf32>
    %cst_125 = arith.constant dense<0.000000e+00> : vector<16xf32>
    %304 = vector.multi_reduction <add>, %303, %cst_125 [1] : vector<16x128xf32> to vector<16xf32>
    %305 = vector.shape_cast %304 : vector<16xf32> to vector<16x1xf32>
    %cst_126 = arith.constant 1.280000e+02 : f32
    %306 = vector.broadcast %cst_126 : f32 to vector<16x1xf32>
    %307 = arith.divf %305, %306 : vector<16x1xf32>
    %cst_127 = arith.constant 9.99999997E-7 : f32
    %308 = vector.broadcast %cst_127 : f32 to vector<16x1xf32>
    %309 = arith.addf %307, %308 : vector<16x1xf32>
    %310 = math.rsqrt %309 : vector<16x1xf32>
    %311 = vector.broadcast %310 : vector<16x1xf32> to vector<16x128xf32>
    %312 = arith.mulf %302, %311 : vector<16x128xf32>
    %313 = vector.broadcast %294 : vector<1x128xf32> to vector<16x128xf32>
    %314 = arith.mulf %312, %313 : vector<16x128xf32>
    %315 = vector.broadcast %296 : vector<1x128xf32> to vector<16x128xf32>
    %316 = arith.addf %314, %315 : vector<16x128xf32>
    %317 = arith.truncf %316 : vector<16x128xf32> to vector<16x128xbf16>
    %c1_128 = arith.constant 1 : index
    %c0_129 = arith.constant 0 : index
    %c0_130 = arith.constant 0 : index
    %318 = vector.load %arg13[%c1_128, %c0_129, %c0_130] : memref<2x128x512xf32, #tpu.memory_space<vmem>>, vector<1x128x512xf32>
    %319 = vector.shape_cast %318 : vector<1x128x512xf32> to vector<128x512xf32>
    %320 = arith.truncf %319 : vector<128x512xf32> to vector<128x512xbf16>
    %cst_131 = arith.constant dense<0.000000e+00> : vector<16x512xf32>
    %321 = tpu.matmul %317, %320, %cst_131 {dimension_numbers = #tpu.dot_dimension_numbers<[1], [0], [0], [1], [0, 0, 1, 1], [], []>} : vector<16x128xbf16>, vector<128x512xbf16>, vector<16x512xf32> -> vector<16x512xf32>
    %c1_132 = arith.constant 1 : index
    %c0_133 = arith.constant 0 : index
    %c0_134 = arith.constant 0 : index
    %322 = vector.load %arg14[%c1_132, %c0_133, %c0_134] : memref<2x1x512xf32, #tpu.memory_space<vmem>>, vector<1x1x512xf32>
    %323 = vector.shape_cast %322 : vector<1x1x512xf32> to vector<1x512xf32>
    %324 = vector.broadcast %323 : vector<1x512xf32> to vector<16x512xf32>
    %325 = arith.addf %321, %324 : vector<16x512xf32>
    %cst_135 = arith.constant 5.000000e-01 : f32
    %326 = vector.broadcast %cst_135 : f32 to vector<16x512xf32>
    %327 = arith.mulf %326, %325 : vector<16x512xf32>
    %cst_136 = arith.constant 4.471500e-02 : f32
    %328 = vector.broadcast %cst_136 : f32 to vector<16x512xf32>
    %329 = arith.mulf %328, %325 : vector<16x512xf32>
    %330 = arith.mulf %329, %325 : vector<16x512xf32>
    %331 = arith.mulf %330, %325 : vector<16x512xf32>
    %332 = arith.addf %325, %331 : vector<16x512xf32>
    %cst_137 = arith.constant 0.797884583 : f32
    %333 = vector.broadcast %cst_137 : f32 to vector<16x512xf32>
    %334 = arith.mulf %333, %332 : vector<16x512xf32>
    %335 = math.tanh %334 : vector<16x512xf32>
    %cst_138 = arith.constant 1.000000e+00 : f32
    %336 = vector.broadcast %cst_138 : f32 to vector<16x512xf32>
    %337 = arith.addf %336, %335 : vector<16x512xf32>
    %338 = arith.mulf %327, %337 : vector<16x512xf32>
    %339 = arith.truncf %338 : vector<16x512xf32> to vector<16x512xbf16>
    %c1_139 = arith.constant 1 : index
    %c0_140 = arith.constant 0 : index
    %c0_141 = arith.constant 0 : index
    %340 = vector.load %arg15[%c1_139, %c0_140, %c0_141] : memref<2x512x128xf32, #tpu.memory_space<vmem>>, vector<1x512x128xf32>
    %341 = vector.shape_cast %340 : vector<1x512x128xf32> to vector<512x128xf32>
    %342 = arith.truncf %341 : vector<512x128xf32> to vector<512x128xbf16>
    %cst_142 = arith.constant dense<0.000000e+00> : vector<16x128xf32>
    %343 = tpu.matmul %339, %342, %cst_142 {dimension_numbers = #tpu.dot_dimension_numbers<[1], [0], [0], [1], [0, 0, 1, 1], [], []>} : vector<16x512xbf16>, vector<512x128xbf16>, vector<16x128xf32> -> vector<16x128xf32>
    %c1_143 = arith.constant 1 : index
    %c0_144 = arith.constant 0 : index
    %c0_145 = arith.constant 0 : index
    %344 = vector.load %arg16[%c1_143, %c0_144, %c0_145] : memref<2x1x128xf32, #tpu.memory_space<vmem>>, vector<1x1x128xf32>
    %345 = vector.shape_cast %344 : vector<1x1x128xf32> to vector<1x128xf32>
    %346 = vector.broadcast %345 : vector<1x128xf32> to vector<16x128xf32>
    %347 = arith.addf %343, %346 : vector<16x128xf32>
    %348 = arith.addf %292, %347 : vector<16x128xf32>
    %349 = vector.extract_strided_slice %348 {offsets = [0, 0], sizes = [8, 128], strides = [1, 1]} : vector<16x128xf32> to vector<8x128xf32>
    %c0_146 = arith.constant 0 : index
    %c0_147 = arith.constant 0 : index
    %350 = vector.load %arg17[%c0_146, %c0_147] : memref<8x128xf32, #tpu.memory_space<vmem>>, vector<8x128xf32>
    tpu.vector_store %arg17[%c0_146, %c0_147], %349 {strides = array<i32>} : memref<8x128xf32, #tpu.memory_space<vmem>>, vector<8x128xf32>,
    return
  }
}

</mosaic_0001>

<bundles_post_ra>
// kernel: vit_encoder_forward.1
= control target key start
LH: loop header
LB: loop body
LE: loop exit
PB: predicated region body
PF: predicated region fallthrough
CT: control target
= control target key end

     0   :  { %s3285_s0 = inlined_call_operand.vmem [shape: f32[8,768], index: 0, kind: input, shape index: {}]   ;;  %s3286_s1 = inlined_call_operand.hbm [shape: f32[768,128], index: 1, kind: input, shape index: {}]   ;;  %s3287_s2 = inlined_call_operand.vmem [shape: f32[1,128], index: 2, kind: input, shape index: {}]   ;;  %s3288_s3 = inlined_call_operand.vmem [shape: f32[1,128], index: 3, kind: input, shape index: {}]   ;;  %s3289_s4 = inlined_call_operand.vmem [shape: f32[5,128], index: 4, kind: input, shape index: {}]   ;;  %s3290_s5 = inlined_call_operand.vmem [shape: f32[2,1,128], index: 5, kind: input, shape index: {}]   ;;  %s3291_s6 = inlined_call_operand.vmem [shape: f32[2,1,128], index: 6, kind: input, shape index: {}]   ;;  %s3292_s7 = inlined_call_operand.hbm [shape: f32[2,128,384], index: 7, kind: input, shape index: {}]   ;;  %s3293_s8 = inlined_call_operand.vmem [shape: f32[2,1,384], index: 8, kind: input, shape index: {}]   ;;  %s3294_s9 = inlined_call_operand.vmem [shape: f32[2,128,128], index: 9, kind: input, shape index: {}]   ;;  %s3295_s10 = inlined_call_operand.vmem [shape: f32[2,1,128], index: 10, kind: input, shape index: {}]   ;;  %s3296_s11 = inlined_call_operand.vmem [shape: f32[2,1,128], index: 11, kind: input, shape index: {}]   ;;  %s3297_s12 = inlined_call_operand.vmem [shape: f32[2,1,128], index: 12, kind: input, shape index: {}]   ;;  %s3298_s13 = inlined_call_operand.vmem [shape: f32[2,128,512], index: 13, kind: input, shape index: {}]   ;;  %s3299_s14 = inlined_call_operand.vmem [shape: f32[2,1,512], index: 14, kind: input, shape index: {}]   ;;  %s3300_s15 = inlined_call_operand.hbm [shape: f32[2,512,128], index: 15, kind: input, shape index: {}]   ;;  %s3301_s16 = inlined_call_operand.vmem [shape: f32[2,1,128], index: 16, kind: input, shape index: {}]   ;;  %s3302_s17 = inlined_call_operand.hbm [shape: f32[8,128], index: 17, kind: output, shape index: {}]  }
   0x1   :  { %3305 = sst [smem:[#allocation12_spill]] %s3285_s0 }
   0x2   :  { %3306 = sst [smem:[#allocation13_spill]] %s3286_s1 }
   0x3   :  { %3307 = sst [smem:[#allocation14_spill]] %s3302_s17 }
   0x4   :  { %22 = vsyncpa [#allocation3], 0 }
   0x5   :  { %23 = vsyncpa [#allocation6], 0  ;;  %s54_s26 = sshll.u32 %s3292_s7, 4  ;;  %s55_s26 = int_to_ptr.hbm [resolvable:$true] %s54_s26 }
   0x6   :  { %24 = vsyncpa [#allocation4], 0  ;;  %s2383_s27 = smov [#allocation5]   ;;  %s3308_s30 = sld [smem:[#allocation13_spill]] }
   0x7   :  { %s56_s28 = sshll.u32 %s2383_s27, 4  ;;  %s2384_s19 = smov 384   ;;  %s57_s28 = int_to_ptr.vmem [resolvable:$true] %s56_s28 }
   0x8   :  { %s2385_s1 = smov 24   ;;  %s2386_s20 = smov [#allocation2]  }
   0x9   :  { %62 = dma.hbm_to_vmem [thread:$0]  %s55_s26, 12288, %s57_s28, [#allocation6], %s2384_s19, %s2384_s19, %s2385_s1  }
   0xa   :  { %s33_s21 = sshll.u32 %s2386_s20, 4  ;;  %s2387_s22 = smov 128   ;;  %s34_s21 = int_to_ptr.vmem [resolvable:$true] %s33_s21 }
   0xb   :  { %s2388_s23 = smov 8   ;;  %s81_s25 = sshll.u32 %s3300_s15, 4  ;;  %s82_s25 = int_to_ptr.hbm [resolvable:$true] %s81_s25 }
   0xc   :  { %s31_s18 = sshll.u32 %s3308_s30, 4  ;;  %s2389_s27 = smov [#allocation7]   ;;  %s32_s18 = int_to_ptr.hbm [resolvable:$true] %s31_s18 }
   0xd   :  { %39 = dma.hbm_to_vmem [thread:$0]  %s32_s18, 12288, %s34_s21, [#allocation3], %s2387_s22, %s2387_s22, %s2388_s23  }
   0xe   :  { %s83_s17 = sshll.u32 %s2389_s27, 4  ;;  %s84_s17 = int_to_ptr.vmem [resolvable:$true] %s83_s17 }
   0xf   :  { %89 = dma.hbm_to_vmem [thread:$0]  %s82_s25, 16384, %s84_s17, [#allocation6], %s2387_s22, %s2387_s22, %s2388_s23  }
  0x10   :  { %2377 = dma.done.wait [#allocation3], 12288  }
  0x11   :  { %2378 = vsyncadd [#allocation3], 4294955008 }
  0x12   :  { %2379 = dma.done.wait [#allocation6], 28672  }
  0x13   :  { %2380 = vsyncadd [#allocation6], 4294938624  ;;  %v131_v0 = vld [vmem:[#allocation2 + $0x70] sm:$0xff]  ;;  %v132_v1 = vld [vmem:[#allocation2 + $0x78] sm:$0xff]  ;;  %s3309_s26 = sld [smem:[#allocation12_spill]]  ;;  %vm347_vm0 = vcmask 1043456  }
  0x14   :  { %v147_v2 = vld [vmem:[#allocation2 + $0xf0] sm:$0xff]  ;;  %v220_v3 = vpack.c.bf16 %v132_v1, %v131_v0  ;;  %v148_v4 = vld [vmem:[#allocation2 + $0xf8] sm:$0xff]  ;;  %v129_v5 = vld [vmem:[#allocation2 + $0x60] sm:$0xff]  ;;  %vm355_vm1 = vcmask 1040384   ;;  %vm358_vm2 = vcmask 1041408   ;;  %vm3304_vm10 = vcmask 523264  }
  0x15   :  { %v130_v6 = vld [vmem:[#allocation2 + $0x68] sm:$0xff]  ;;  %v228_v7 = vpack.c.bf16 %v148_v4, %v147_v2  ;;  %v145_v8 = vld [vmem:[#allocation2 + $0xe0] sm:$0xff]  ;;  %v127_v11 = vld [vmem:[#allocation2 + $0x50] sm:$0xff]  ;;  %s2392_s30 = smov 64   ;;  %s2393_s1 = smov [#allocation8]  }
  0x16   :  { %v146_v9 = vld [vmem:[#allocation2 + $0xe8] sm:$0xff]  ;;  %265 = vmatpush.bf16.msra.mxu0 %v220_v3  ;;  %v219_v10 = vpack.c.bf16 %v130_v6, %v129_v5  ;;  %v128_v13 = vld [vmem:[#allocation2 + $0x58] sm:$0xff]  ;;  %v163_v14 = vld [vmem:[#allocation2 + $0x170] sm:$0xff]  ;;  %s2056_s20 = sshll.u32 %s2393_s1, 4  ;;  %s3321_s23 = sld [smem:[#allocation14_spill]]  ;;  %s2057_s20 = int_to_ptr.vmem [resolvable:$true] %s2056_s20 }
  0x17   :  { %278 = vmatpush.bf16.msra.mxu1 %v228_v7  ;;  %v227_v12 = vpack.c.bf16 %v146_v9, %v145_v8  ;;  %v164_v15 = vld [vmem:[#allocation2 + $0x178] sm:$0xff]  ;;  %v143_v16 = vld [vmem:[#allocation2 + $0xd0] sm:$0xff]  ;;  %v161_v21 = vld [vmem:[#allocation2 + $0x160] sm:$0xff]  ;;  %v218_v22 = vpack.c.bf16 %v128_v13, %v127_v11 }
  0x18   :  { %v144_v17 = vld [vmem:[#allocation2 + $0xd8] sm:$0xff]  ;;  %v236_v18 = vpack.c.bf16 %v164_v15, %v163_v14  ;;  %v179_v19 = vld [vmem:[#allocation2 + $0x1f0] sm:$0xff]  ;;  %v125_v23 = vld [vmem:[#allocation2 + $0x40] sm:$0xff] }
  0x19   :  { %v180_v20 = vld [vmem:[#allocation2 + $0x1f8] sm:$0xff]  ;;  %v126_v24 = vld [vmem:[#allocation2 + $0x48] sm:$0xff]  ;;  %v226_v27 = vpack.c.bf16 %v144_v17, %v143_v16  ;;  %v141_v28 = vld [vmem:[#allocation2 + $0xc0] sm:$0xff] }
  0x1a   :  { %266 = vmatpush.bf16.msra.mxu0 %v219_v10  ;;  %291 = vmatpush.bf16.msra.mxu2 %v236_v18  ;;  %v244_v25 = vpack.c.bf16 %v180_v20, %v179_v19  ;;  %v162_v26 = vld [vmem:[#allocation2 + $0x168] sm:$0xff]  ;;  %v177_v31 = vld [vmem:[#allocation2 + $0x1e0] sm:$0xff]  ;;  %v159_v33 = vld [vmem:[#allocation2 + $0x150] sm:$0xff]  ;;  %v217_v36 = vpack.c.bf16 %v126_v24, %v125_v23 }
  0x1b   :  { %279 = vmatpush.bf16.msra.mxu1 %v227_v12  ;;  %v142_v29 = vld [vmem:[#allocation2 + $0xc8] sm:$0xff]  ;;  %v235_v30 = vpack.c.bf16 %v162_v26, %v161_v21  ;;  %v160_v34 = vld [vmem:[#allocation2 + $0x158] sm:$0xff]  ;;  %v123_v37 = vld [vmem:[#allocation2 + $0x30] sm:$0xff] }
  0x1c   :  { %304 = vmatpush.bf16.msra.mxu3 %v244_v25  ;;  %v178_v32 = vld [vmem:[#allocation2 + $0x1e8] sm:$0xff]  ;;  %v234_v38 = vpack.c.bf16 %v160_v34, %v159_v33  ;;  %v175_v39 = vld [vmem:[#allocation2 + $0x1d0] sm:$0xff]  ;;  %v176_v40 = vld [vmem:[#allocation2 + $0x1d8] sm:$0xff]  ;;  %v225_v41 = vpack.c.bf16 %v142_v29, %v141_v28  ;;  %s2058_s7 = sshll.u32 %s3321_s23, 4  ;;  %s2059_s7 = int_to_ptr.hbm [resolvable:$true] %s2058_s7 }
  0x1d   :  { %v243_v35 = vpack.c.bf16 %v178_v32, %v177_v31  ;;  %v124_v42 = vld [vmem:[#allocation2 + $0x38] sm:$0xff]  ;;  %v157_v43 = vld [vmem:[#allocation2 + $0x140] sm:$0xff]  ;;  %v158_v44 = vld [vmem:[#allocation2 + $0x148] sm:$0xff]  ;;  %v242_v47 = vpack.c.bf16 %v176_v40, %v175_v39 }
  0x1e   :  { %267 = vmatpush.bf16.msra.mxu0 %v218_v22  ;;  %292 = vmatpush.bf16.msra.mxu2 %v235_v30  ;;  %v139_v45 = vld [vmem:[#allocation2 + $0xb0] sm:$0xff]  ;;  %v140_v46 = vld [vmem:[#allocation2 + $0xb8] sm:$0xff]  ;;  %v173_v48 = vld [vmem:[#allocation2 + $0x1c0] sm:$0xff]  ;;  %v216_v50 = vpack.c.bf16 %v124_v42, %v123_v37  ;;  %v233_v52 = vpack.c.bf16 %v158_v44, %v157_v43 }
  0x1f   :  { %280 = vmatpush.bf16.msra.mxu1 %v226_v27  ;;  %v174_v49 = vld [vmem:[#allocation2 + $0x1c8] sm:$0xff]  ;;  %v121_v51 = vld [vmem:[#allocation2 + $0x20] sm:$0xff]  ;;  %v224_v53 = vpack.c.bf16 %v140_v46, %v139_v45  ;;  %v155_v55 = vld [vmem:[#allocation2 + $0x130] sm:$0xff] }
  0x20   :  { %305 = vmatpush.bf16.msra.mxu3 %v243_v35  ;;  %v122_v54 = vld [vmem:[#allocation2 + $0x28] sm:$0xff]  ;;  %v156_v56 = vld [vmem:[#allocation2 + $0x138] sm:$0xff]  ;;  %v137_v57 = vld [vmem:[#allocation2 + $0xa0] sm:$0xff]  ;;  %v241_v59 = vpack.c.bf16 %v174_v49, %v173_v48 }
  0x21   :  { %v138_v58 = vld [vmem:[#allocation2 + $0xa8] sm:$0xff]  ;;  %v171_v60 = vld [vmem:[#allocation2 + $0x1b0] sm:$0xff]  ;;  %v172_v61 = vld [vmem:[#allocation2 + $0x1b8] sm:$0xff]  ;;  %v215_v62 = vpack.c.bf16 %v122_v54, %v121_v51  ;;  %v232_v0 = vpack.c.bf16 %v156_v56, %v155_v55 }
  0x22   :  { %268 = vmatpush.bf16.msra.mxu0 %v217_v36  ;;  %293 = vmatpush.bf16.msra.mxu2 %v234_v38  ;;  %v119_v63 = vld [vmem:[#allocation2 + $0x10] sm:$0xff]  ;;  %v223_v1 = vpack.c.bf16 %v138_v58, %v137_v57  ;;  %v120_v2 = vld [vmem:[#allocation2 + $0x18] sm:$0xff]  ;;  %v153_v3 = vld [vmem:[#allocation2 + $0x120] sm:$0xff]  ;;  %v240_v7 = vpack.c.bf16 %v172_v61, %v171_v60 }
  0x23   :  { %281 = vmatpush.bf16.msra.mxu1 %v225_v41  ;;  %v154_v4 = vld [vmem:[#allocation2 + $0x128] sm:$0xff]  ;;  %v135_v5 = vld [vmem:[#allocation2 + $0x90] sm:$0xff]  ;;  %v136_v6 = vld [vmem:[#allocation2 + $0x98] sm:$0xff]  ;;  %v214_v10 = vpack.c.bf16 %v120_v2, %v119_v63 }
  0x24   :  { %306 = vmatpush.bf16.msra.mxu3 %v242_v47  ;;  %v169_v8 = vld [vmem:[#allocation2 + $0x1a0] sm:$0xff]  ;;  %v170_v9 = vld [vmem:[#allocation2 + $0x1a8] sm:$0xff]  ;;  %v231_v14 = vpack.c.bf16 %v154_v4, %v153_v3  ;;  %v222_v15 = vpack.c.bf16 %v136_v6, %v135_v5  ;;  %v151_v17 = vld [vmem:[#allocation2 + $0x110] sm:$0xff] }
  0x25   :  { %v117_v11 = vld [vmem:[#allocation2] sm:$0xff]  ;;  %v118_v12 = vld [vmem:[#allocation2 + $0x8] sm:$0xff]  ;;  %v152_v18 = vld [vmem:[#allocation2 + $0x118] sm:$0xff]  ;;  %v239_v22 = vpack.c.bf16 %v170_v9, %v169_v8 }
  0x26   :  { %269 = vmatpush.bf16.msra.mxu0 %v216_v50  ;;  %294 = vmatpush.bf16.msra.mxu2 %v233_v52  ;;  %v133_v13 = vld [vmem:[#allocation2 + $0x80] sm:$0xff]  ;;  %v134_v16 = vld [vmem:[#allocation2 + $0x88] sm:$0xff]  ;;  %v195_v19 = vld [vmem:[#allocation2 + $0x270] sm:$0xff]  ;;  %v213_v26 = vpack.c.bf16 %v118_v12, %v117_v11  ;;  %v230_v27 = vpack.c.bf16 %v152_v18, %v151_v17 }
  0x27   :  { %282 = vmatpush.bf16.msra.mxu1 %v224_v53  ;;  %v196_v20 = vld [vmem:[#allocation2 + $0x278] sm:$0xff]  ;;  %v211_v21 = vld [vmem:[#allocation2 + $0x2f0] sm:$0xff]  ;;  %v105_v28 = vld [vmem:[%s3309_s26] sm:$0xff]  ;;  %v221_v29 = vpack.c.bf16 %v134_v16, %v133_v13 }
  0x28   :  { %307 = vmatpush.bf16.msra.mxu3 %v241_v59  ;;  %v212_v23 = vld [vmem:[#allocation2 + $0x2f8] sm:$0xff]  ;;  %v167_v24 = vld [vmem:[#allocation2 + $0x190] sm:$0xff]  ;;  %v252_v30 = vpack.c.bf16 %v196_v20, %v195_v19  ;;  %v106_v31 = vld [vmem:[%s3309_s26 + $0x8] sm:$0xff]  ;;  %v111_v40 = vpack.c.bf16 %v105_v28, %v105_v28 }
  0x29   :  { %v168_v25 = vld [vmem:[#allocation2 + $0x198] sm:$0xff]  ;;  %v149_v32 = vld [vmem:[#allocation2 + $0x100] sm:$0xff]  ;;  %v150_v33 = vld [vmem:[#allocation2 + $0x108] sm:$0xff]  ;;  %v260_v34 = vpack.c.bf16 %v212_v23, %v211_v21  ;;  %v112_v43 = vpack.c.bf16 %v106_v31, %v106_v31 }
  0x2a   :  { %270 = vmatpush.bf16.msra.mxu0 %v215_v62  ;;  %295 = vmatpush.bf16.msra.mxu2 %v232_v0  ;;  %v193_v35 = vld [vmem:[#allocation2 + $0x260] sm:$0xff]  ;;  %v194_v36 = vld [vmem:[#allocation2 + $0x268] sm:$0xff]  ;;  %v238_v38 = vpack.c.bf16 %v168_v25, %v167_v24  ;;  %v229_v44 = vpack.c.bf16 %v150_v33, %v149_v32  ;;  %v107_v45 = vld [vmem:[%s3309_s26 + $0x10] sm:$0xff] }
  0x2b   :  { %283 = vmatpush.bf16.msra.mxu1 %v223_v1  ;;  %v209_v37 = vld [vmem:[#allocation2 + $0x2e0] sm:$0xff]  ;;  %v210_v39 = vld [vmem:[#allocation2 + $0x2e8] sm:$0xff]  ;;  %v251_v46 = vpack.c.bf16 %v194_v36, %v193_v35  ;;  %v191_v47 = vld [vmem:[#allocation2 + $0x250] sm:$0xff]  ;;  %v113_v54 = vpack.c.bf16 %v107_v45, %v107_v45 }
  0x2c   :  { %308 = vmatpush.bf16.msra.mxu3 %v240_v7  ;;  %v165_v41 = vld [vmem:[#allocation2 + $0x180] sm:$0xff]  ;;  %v166_v42 = vld [vmem:[#allocation2 + $0x188] sm:$0xff]  ;;  %v259_v48 = vpack.c.bf16 %v210_v39, %v209_v37  ;;  %v192_v49 = vld [vmem:[#allocation2 + $0x258] sm:$0xff] }
  0x2d   :  { %v207_v50 = vld [vmem:[#allocation2 + $0x2d0] sm:$0xff]  ;;  %v237_v51 = vpack.c.bf16 %v166_v42, %v165_v41  ;;  %v108_v52 = vld [vmem:[%s3309_s26 + $0x18] sm:$0xff]  ;;  %v189_v55 = vld [vmem:[#allocation2 + $0x240] sm:$0xff]  ;;  %v250_v57 = vpack.c.bf16 %v192_v49, %v191_v47 }
  0x2e   :  { %271 = vmatpush.bf16.msra.mxu0 %v214_v10  ;;  %296 = vmatpush.bf16.msra.mxu2 %v231_v14  ;;  %v208_v53 = vld [vmem:[#allocation2 + $0x2d8] sm:$0xff]  ;;  %v190_v56 = vld [vmem:[#allocation2 + $0x248] sm:$0xff]  ;;  %v205_v58 = vld [vmem:[#allocation2 + $0x2c0] sm:$0xff]  ;;  %v114_v59 = vpack.c.bf16 %v108_v52, %v108_v52 }
  0x2f   :  { %284 = vmatpush.bf16.msra.mxu1 %v222_v15  ;;  %v258_v60 = vpack.c.bf16 %v208_v53, %v207_v50  ;;  %v206_v61 = vld [vmem:[#allocation2 + $0x2c8] sm:$0xff]  ;;  %v249_v62 = vpack.c.bf16 %v190_v56, %v189_v55  ;;  %v187_v0 = vld [vmem:[#allocation2 + $0x230] sm:$0xff]  ;;  %v188_v1 = vld [vmem:[#allocation2 + $0x238] sm:$0xff] }
  0x30   :  { %309 = vmatpush.bf16.msra.mxu3 %v239_v22  ;;  %v257_v63 = vpack.c.bf16 %v206_v61, %v205_v58  ;;  %v203_v2 = vld [vmem:[#allocation2 + $0x2b0] sm:$0xff]  ;;  %v204_v3 = vld [vmem:[#allocation2 + $0x2b8] sm:$0xff]  ;;  %v248_v4 = vpack.c.bf16 %v188_v1, %v187_v0  ;;  %v185_v6 = vld [vmem:[#allocation2 + $0x220] sm:$0xff] }
  0x31   :  { %v256_v5 = vpack.c.bf16 %v204_v3, %v203_v2  ;;  %v186_v7 = vld [vmem:[#allocation2 + $0x228] sm:$0xff]  ;;  %v201_v8 = vld [vmem:[#allocation2 + $0x2a0] sm:$0xff]  ;;  %v183_v12 = vld [vmem:[#allocation2 + $0x210] sm:$0xff] }
  0x32   :  { %272 = vmatpush.bf16.msra.mxu0 %v213_v26  ;;  %297 = vmatpush.bf16.msra.mxu2 %v230_v27  ;;  %v202_v9 = vld [vmem:[#allocation2 + $0x2a8] sm:$0xff]  ;;  %v247_v10 = vpack.c.bf16 %v186_v7, %v185_v6  ;;  %v184_v13 = vld [vmem:[#allocation2 + $0x218] sm:$0xff]  ;;  %v199_v14 = vld [vmem:[#allocation2 + $0x290] sm:$0xff] }
  0x33   :  { %285 = vmatpush.bf16.msra.mxu1 %v221_v29  ;;  %v255_v11 = vpack.c.bf16 %v202_v9, %v201_v8  ;;  %v200_v15 = vld [vmem:[#allocation2 + $0x298] sm:$0xff]  ;;  %v246_v16 = vpack.c.bf16 %v184_v13, %v183_v12  ;;  %v181_v18 = vld [vmem:[#allocation2 + $0x200] sm:$0xff]  ;;  %v182_v19 = vld [vmem:[#allocation2 + $0x208] sm:$0xff] }
  0x34   :  { %310 = vmatpush.bf16.msra.mxu3 %v238_v38  ;;  %v254_v17 = vpack.c.bf16 %v200_v15, %v199_v14  ;;  %v197_v20 = vld [vmem:[#allocation2 + $0x280] sm:$0xff]  ;;  %v198_v21 = vld [vmem:[#allocation2 + $0x288] sm:$0xff]  ;;  %v245_v22 = vpack.c.bf16 %v182_v19, %v181_v18  ;;  %v512_v8 = vld [vmem:[#allocation5 + $0x150] sm:$0xff] }
  0x35   :  { %273 = vmatmul.bf16.vlgmr.msra.gmra.mxu0 %v111_v40  ;;  %v109_v23 = vld [vmem:[%s3309_s26 + $0x20] sm:$0xff]  ;;  %v253_v24 = vpack.c.bf16 %v198_v21, %v197_v20  ;;  %v110_v25 = vld [vmem:[%s3309_s26 + $0x28] sm:$0xff]  ;;  %v516_v12 = vld [vmem:[#allocation5 + $0x170] sm:$0xff] }
  0x36   :  { %317 = vmatpush.bf16.msrb.mxu0 %v252_v30  ;;  %286 = vmatmul.bf16.vlgmr.msra.gmra.mxu1 %v112_v43  ;;  %v115_v26 = vpack.c.bf16 %v109_v23, %v109_v23  ;;  %v116_v27 = vpack.c.bf16 %v110_v25, %v110_v25  ;;  %v2186_v33 = vld [vmem:[%s3287_s2] ss:$0 sm:$0xff]  ;;  %v343_v40 = vld [vmem:[%s3289_s4 + $0x1] sm:$0xf]  ;;  %v515_v9 = vld [vmem:[#allocation5 + $0x168] sm:$0xff] }
  0x37   :  { %330 = vmatpush.bf16.msrb.mxu1 %v260_v34  ;;  %298 = vmatpush.bf16.msra.mxu2 %v229_v44  ;;  %v345_v41 = vrot.slane %v343_v40, 4  ;;  %v349_v42 = vld [vmem:[%s3288_s3] sm:$0x1]  ;;  %v517_v14 = vld [vmem:[#allocation5 + $0x178] sm:$0xff]  ;;  %v507_v19 = vld [vmem:[#allocation5 + $0x128] sm:$0xff] }
  0x38   :  { %311 = vmatpush.bf16.msra.mxu3 %v237_v51  ;;  %v350_v43 = vld [vmem:[%s3289_s4] sm:$0x1]  ;;  %v509_v18 = vld [vmem:[#allocation5 + $0x138] sm:$0xff]  ;;  %v511_v23 = vld [vmem:[#allocation5 + $0x148] sm:$0xff] }
  0x39   :  { %v348_v49 = vsel %vm347_vm0, %v343_v40, %v345_v41  ;;  %v514_v13 = vld [vmem:[#allocation5 + $0x160] sm:$0xff]  ;;  %v496_v40 = vld [vmem:[#allocation5 + $0xd0] sm:$0xff]  ;;  %v499_v41 = vld [vmem:[#allocation5 + $0xe8] sm:$0xff] }
  0x3a   :  { %318 = vmatpush.bf16.msrb.mxu0 %v251_v46  ;;  %299 = vmatmul.bf16.vlgmr.msra.gmra.mxu2 %v113_v54  ;;  %v510_v21 = vld [vmem:[#allocation5 + $0x140] sm:$0xff] }
  0x3b   :  { %331 = vmatpush.bf16.msrb.mxu1 %v259_v48  ;;  %312 = vmatmul.bf16.vlgmr.msra.gmra.mxu3 %v114_v59  ;;  %v351_v48 = vadd.f32 %v350_v43, %v349_v42  ;;  %v532_v43 = vpack.c.bf16 %v499_v41, %v496_v40  ;;  %v2187_v40 = vld [vmem:[%s3290_s5] ss:$0 sm:$0xff] }
  0x3d   :  { %v353_v52 = vperm.slane %v351_v48, 0 }
  0x3e   :  { %319 = vmatpush.bf16.msrb.mxu0 %v250_v57  ;;  %v2390_v57 = vmov 128.0  }
  0x3f   :  { %332 = vmatpush.bf16.msrb.mxu1 %v258_v60  ;;  %v356_v55 = vsel %vm355_vm1, %v351_v48, %v353_v52  ;;  %2199 = vrcp.f32 %v2390_v57  ;;  %v492_v48 = vld [vmem:[#allocation5 + $0xb0] sm:$0xff]  ;;  %v483_v57 = vld [vmem:[#allocation5 + $0x68] sm:$0xff] }
  0x40   :  { %v2526_v56 = vsel %vm358_vm2, %v356_v55, 0.0  ;;  %v485_v55 = vld [vmem:[#allocation5 + $0x78] sm:$0xff] }
  0x42   :  { %320 = vmatpush.bf16.msrb.mxu0 %v249_v62 }
  0x43   :  { %333 = vmatpush.bf16.msrb.mxu1 %v257_v63 }
  0x45   :  { %v2200_v58 = vpop.eup %2199 }
  0x46   :  { %321 = vmatpush.bf16.msrb.mxu0 %v248_v4  ;;  %v417_v59 = vmul.f32 128.0, %v2200_v58  ;;  %vm421_vm3 = vweird.f32 %v2200_v58 }
  0x47   :  { %334 = vmatpush.bf16.msrb.mxu1 %v256_v5 }
  0x48   :  { %v418_v60 = vsub.f32 1.0, %v417_v59  ;;  %v486_v59 = vld [vmem:[#allocation5 + $0x80] sm:$0xff] }
  0x4a   :  { %322 = vmatpush.bf16.msrb.mxu0 %v247_v10  ;;  %v419_v61 = vmul.f32 %v2200_v58, %v418_v60  ;;  %v513_v10 = vld [vmem:[#allocation5 + $0x158] sm:$0xff]  ;;  %v484_v60 = vld [vmem:[#allocation5 + $0x70] sm:$0xff] }
  0x4b   :  { %335 = vmatpush.bf16.msrb.mxu1 %v255_v11  ;;  %v539_v11 = vpack.c.bf16 %v515_v9, %v512_v8  ;;  %v540_v15 = vpack.c.bf16 %v516_v12, %v513_v10  ;;  %v478_v8 = vld [vmem:[#allocation5 + $0x40] sm:$0xff]  ;;  %v481_v9 = vld [vmem:[#allocation5 + $0x58] sm:$0xff] }
  0x4c   :  { %v420_v62 = vadd.f32 %v2200_v58, %v419_v61  ;;  %v487_v61 = vld [vmem:[#allocation5 + $0x88] sm:$0xff]  ;;  %v523_v12 = vpack.c.bf16 %v481_v9, %v478_v8  ;;  %v360_v9 = vlaneseq }
  0x4d   :  { %550 = vmatpush.bf16.msrb.mxu2 %v539_v11  ;;  %564 = vmatpush.bf16.msrb.mxu3 %v540_v15  ;;  %v471_v15 = vld [vmem:[#allocation5 + $0x8] sm:$0xff] }
  0x4e   :  { %323 = vmatpush.bf16.msrb.mxu0 %v246_v16  ;;  %v2529_v63 = vsel %vm421_vm3, %v2200_v58, %v420_v62  ;;  %v541_v16 = vpack.c.bf16 %v517_v14, %v514_v13  ;;  %v525_v62 = vpack.c.bf16 %v486_v59, %v483_v57  ;;  %v470_v13 = vld [vmem:[#allocation5] sm:$0xff]  ;;  %v473_v14 = vld [vmem:[#allocation5 + $0x18] sm:$0xff] }
  0x4f   :  { %336 = vmatpush.bf16.msrb.mxu1 %v254_v17  ;;  %v506_v17 = vld [vmem:[#allocation5 + $0x120] sm:$0xff] }
  0x50   :  { %v536_v20 = vpack.c.bf16 %v509_v18, %v506_v17  ;;  %v518_v17 = vpack.c.bf16 %v473_v14, %v470_v13  ;;  %v474_v18 = vld [vmem:[#allocation5 + $0x20] sm:$0xff]  ;;  %v2391_v14 = vmov -1e+30  }
  0x52   :  { %324 = vmatpush.bf16.msrb.mxu0 %v245_v22  ;;  %v508_v22 = vld [vmem:[#allocation5 + $0x130] sm:$0xff]  ;;  %551 = vmatpush.bf16.msrb.mxu2 %v536_v20  ;;  %v475_v20 = vld [vmem:[#allocation5 + $0x28] sm:$0xff] }
  0x53   :  { %337 = vmatpush.bf16.msrb.mxu1 %v253_v24  ;;  %v537_v24 = vpack.c.bf16 %v510_v21, %v507_v19  ;;  %v538_v25 = vpack.c.bf16 %v511_v23, %v508_v22  ;;  %v472_v19 = vld [vmem:[#allocation5 + $0x10] sm:$0xff]  ;;  %v519_v21 = vpack.c.bf16 %v474_v18, %v471_v15 }
  0x54   :  { %v520_v22 = vpack.c.bf16 %v475_v20, %v472_v19 }
  0x55   :  { %325 = vmatmul.bf16.vlgmr.msrb.gmra.mxu0 %v115_v26  ;;  %565 = vmatpush.bf16.msrb.mxu3 %v537_v24  ;;  %v500_v26 = vld [vmem:[#allocation5 + $0xf0] sm:$0xff] }
  0x56   :  { %338 = vmatmul.bf16.vlgmr.msrb.gmra.mxu1 %v116_v27  ;;  %578 = vmatpush.bf16.msra.mxu0 %v541_v16  ;;  %v503_v27 = vld [vmem:[#allocation5 + $0x108] sm:$0xff] }
  0x5a   :  { %579 = vmatpush.bf16.msra.mxu0 %v538_v25 }
  0xb2   :  { %v274_v28 = vpop.f32.mrf.mxu0 }
  0xb3   :  { %v287_v29 = vpop.f32.mrf.mxu1  ;;  %v275_v35 = vadd.f32 %v2186_v33, %v274_v28  ;;  %v501_v28 = vld [vmem:[#allocation5 + $0xf8] sm:$0xff] }
  0xb5   :  { %v288_v37 = vadd.f32 %v287_v29, %v275_v35  ;;  %v533_v29 = vpack.c.bf16 %v503_v27, %v500_v26  ;;  %v494_v35 = vld [vmem:[#allocation5 + $0xc0] sm:$0xff] }
  0xb7   :  { %552 = vmatpush.bf16.msrb.mxu2 %v533_v29 }
  0xba   :  { %v276_v30 = vpop.f32.mrf.mxu0 }
  0xbb   :  { %v289_v31 = vpop.f32.mrf.mxu1  ;;  %v504_v30 = vld [vmem:[#allocation5 + $0x110] sm:$0xff] }
  0xbc   :  { %v502_v31 = vld [vmem:[#allocation5 + $0x100] sm:$0xff]  ;;  %v534_v33 = vpack.c.bf16 %v504_v30, %v501_v28 }
  0xbd   :  { %v300_v32 = vpop.f32.mrf.mxu2 }
  0xbe   :  { %v313_v34 = vpop.f32.mrf.mxu3  ;;  %v301_v39 = vadd.f32 %v300_v32, %v288_v37  ;;  %v505_v32 = vld [vmem:[#allocation5 + $0x118] sm:$0xff]  ;;  %566 = vmatpush.bf16.msrb.mxu3 %v534_v33  ;;  %v495_v37 = vld [vmem:[#allocation5 + $0xc8] sm:$0xff] }
  0xc0   :  { %v314_v44 = vadd.f32 %v313_v34, %v301_v39  ;;  %v535_v34 = vpack.c.bf16 %v505_v32, %v502_v31  ;;  %v498_v39 = vld [vmem:[#allocation5 + $0xe0] sm:$0xff] }
  0xc1   :  { %v531_v42 = vpack.c.bf16 %v498_v39, %v495_v37 }
  0xc2   :  { %580 = vmatpush.bf16.msra.mxu0 %v535_v34 }
  0xc3   :  { %567 = vmatpush.bf16.msrb.mxu3 %v531_v42 }
  0xc5   :  { %v302_v36 = vpop.f32.mrf.mxu2 }
  0xc6   :  { %v315_v38 = vpop.f32.mrf.mxu3  ;;  %v497_v36 = vld [vmem:[#allocation5 + $0xd8] sm:$0xff]  ;;  %581 = vmatpush.bf16.msra.mxu0 %v532_v43 }
  0xc7   :  { %v530_v38 = vpack.c.bf16 %v497_v36, %v494_v35 }
  0xc9   :  { %553 = vmatpush.bf16.msrb.mxu2 %v530_v38 }
  0xd2   :  { %v326_v45 = vpop.f32.mrf.mxu0 }
  0xd3   :  { %v327_v46 = vadd.f32 %v326_v45, %v314_v44  ;;  %v339_v47 = vpop.f32.mrf.mxu1  ;;  %v488_v44 = vld [vmem:[#allocation5 + $0x90] sm:$0xff]  ;;  %v491_v45 = vld [vmem:[#allocation5 + $0xa8] sm:$0xff] }
  0xd5   :  { %v340_v50 = vadd.f32 %v339_v47, %v327_v46  ;;  %v489_v46 = vld [vmem:[#allocation5 + $0x98] sm:$0xff]  ;;  %v527_v47 = vpack.c.bf16 %v491_v45, %v488_v44  ;;  %v2188_v45 = vld [vmem:[%s3291_s6] ss:$0 sm:$0xff] }
  0xd6   :  { %v528_v52 = vpack.c.bf16 %v492_v48, %v489_v46 }
  0xd7   :  { %v2523_v51 = vadd.f32 %v348_v49, %v340_v50  ;;  %v490_v49 = vld [vmem:[#allocation5 + $0xa0] sm:$0xff]  ;;  %v493_v50 = vld [vmem:[#allocation5 + $0xb8] sm:$0xff]  ;;  %554 = vmatpush.bf16.msrb.mxu2 %v527_v47 }
  0xd8   :  { %568 = vmatpush.bf16.msrb.mxu3 %v528_v52 }
  0xd9   :  { %412 = vadd.xlane.f32.xlu0 %v2523_v51 }
  0xda   :  { %v328_v53 = vpop.f32.mrf.mxu0 }
  0xdb   :  { %v341_v54 = vpop.f32.mrf.mxu1  ;;  %v529_v53 = vpack.c.bf16 %v493_v50, %v490_v49  ;;  %v542_v50 = vld [vmem:[%s3293_s8] sm:$0x7] }
  0xdc   :  { %v482_v54 = vld [vmem:[#allocation5 + $0x60] sm:$0xff]  ;;  %569 = vmatpush.bf16.msrb.mxu3 %v525_v62  ;;  %v546_v52 = vperm.slane %v542_v50, 2 }
  0xdd   :  { %582 = vmatpush.bf16.msra.mxu0 %v529_v53  ;;  %v524_v58 = vpack.c.bf16 %v485_v55, %v482_v54 }
  0xdf   :  { %555 = vmatpush.bf16.msrb.mxu2 %v524_v58  ;;  %v545_v58 = vperm.slane %v542_v50, 1 }
  0xe1   :  { %414 = vadd.xlane.f32.xlu0 %v2526_v56 }
 0x14c   :  { %v413_v0 = vpop.xlane.xlu0 %412 }
 0x14d   :  { %v423_v1 = vmul.f32 %v2529_v63, %v413_v0  ;;  %v526_v0 = vpack.c.bf16 %v487_v61, %v484_v60 }
 0x14f   :  { %v2533_v2 = vsub.f32 %v2523_v51, %v423_v1  ;;  %583 = vmatpush.bf16.msra.mxu0 %v526_v0  ;;  %v476_v1 = vld [vmem:[#allocation5 + $0x30] sm:$0xff] }
 0x151   :  { %v427_v3 = vmul.f32 %v2533_v2, %v2533_v2 }
 0x153   :  { %429 = vadd.xlane.f32.xlu1 %v427_v3  ;;  %v479_v3 = vld [vmem:[#allocation5 + $0x48] sm:$0xff]  ;;  %584 = vmatpush.bf16.msra.mxu0 %v523_v12 }
 0x154   :  { %v415_v4 = vpop.xlane.xlu0 %414  ;;  %v751_v12 = vld [vmem:[%s3294_s9 + $0x68] sm:$0xff] }
 0x155   :  { %v424_v5 = vmul.f32 %v2529_v63, %v415_v4  ;;  %v477_v4 = vld [vmem:[#allocation5 + $0x38] sm:$0xff] }
 0x157   :  { %v2539_v6 = vsub.f32 %v2526_v56, %v424_v5  ;;  %v521_v5 = vpack.c.bf16 %v479_v3, %v476_v1  ;;  %585 = vmatpush.bf16.msra.mxu0 %v520_v22  ;;  %v544_v3 = vperm.slane %v542_v50, 0 }
 0x159   :  { %v428_v7 = vmul.f32 %v2539_v6, %v2539_v6  ;;  %556 = vmatpush.bf16.msrb.mxu2 %v521_v5 }
 0x15b   :  { %431 = vadd.xlane.f32.xlu1 %v428_v7  ;;  %v480_v7 = vld [vmem:[#allocation5 + $0x50] sm:$0xff] }
 0x15c   :  { %v522_v11 = vpack.c.bf16 %v480_v7, %v477_v4 }
 0x15d   :  { %557 = vmatpush.bf16.msrb.mxu2 %v518_v17 }
 0x15e   :  { %570 = vmatpush.bf16.msrb.mxu3 %v522_v11  ;;  %v361_v11 = vshrl.u32 %v360_v9, 7 }
 0x160   :  { %vm372_vm1 = vcmp.lt.s32.totalorder %v361_v11, 4  ;;  %vm389_vm3 = vcmp.ge.s32.totalorder %v361_v11, 4  ;;  %v362_v13 = vadd.s32 8, %v361_v11 }
 0x162   :  { %571 = vmatpush.bf16.msrb.mxu3 %v519_v21 }
 0x1c6   :  { %v430_v10 = vpop.xlane.xlu1 %429 }
 0x1c7   :  { %v433_v16 = vmul.f32 %v430_v10, %v2529_v63  ;;  %v364_v10 = vand.u32 127, %v360_v9  ;;  %v753_v9 = vld [vmem:[%s3294_s9 + $0x78] sm:$0xff] }
 0x1c9   :  { %v435_v23 = vadd.f32 1e-06, %v433_v16  ;;  %vm399_vm11 = vcmp.ge.s32.totalorder %v364_v10, 4  ;;  %vm400_vm12 = vcmp.lt.s32.totalorder %v364_v10, 8  ;;  %vm381_vm13 = vcmp.lt.s32.totalorder %v364_v10, 4 }
 0x1ca   :  { %vm383_vm14 = vcmp.eq.s32.totalorder %v364_v10, 8  ;;  %vm401_vm15 = vmand %vm399_vm11, %vm400_vm12  ;;  %vm402_vm0 = vcmp.eq.s32.totalorder %v364_v10, 9 }
 0x1cb   :  { %2201 = vrsqrt.f32 %v435_v23  ;;  %vm443_vm5 = vweird.f32 %v435_v23  ;;  %vm384_vm2 = vmor %vm381_vm13, %vm383_vm14  ;;  %vm396_vm13 = vcmp.eq.s32.totalorder %v362_v13, 9 }
 0x1ce   :  { %v432_v24 = vpop.xlane.xlu1 %431 }
 0x1cf   :  { %v434_v25 = vmul.f32 %v432_v24, %v2529_v63 }
 0x1d1   :  { %v2202_v26 = vpop.eup %2201  ;;  %v436_v27 = vadd.f32 1e-06, %v434_v25 }
 0x1d2   :  { %v438_v28 = vmul.f32 %v2202_v26, %v435_v23  ;;  %vm444_vm4 = vweird.f32 %v2202_v26 }
 0x1d3   :  { %2203 = vrsqrt.f32 %v436_v27  ;;  %vm445_vm6 = vmor %vm443_vm5, %vm444_vm4  ;;  %vm453_vm8 = vweird.f32 %v436_v27 }
 0x1d4   :  { %v439_v29 = vmul.f32 %v2202_v26, %v438_v28  ;;  %vm2561_vm4 = vmor %vm401_vm15, %vm402_vm0  ;;  %vm616_vm15 = vcmask 130048  }
 0x1d5   :  { %vm385_vm5 = vmand %vm372_vm1, %vm384_vm2 }
 0x1d6   :  { %v440_v30 = vmul.f32 0.5, %v439_v29  ;;  %vm405_vm0 = vmand %vm396_vm13, %vm2561_vm4 }
 0x1d8   :  { %v441_v31 = vsub.f32 1.5, %v440_v30 }
 0x1d9   :  { %v2204_v32 = vpop.eup %2203 }
 0x1da   :  { %v442_v33 = vmul.f32 %v2202_v26, %v441_v31  ;;  %v448_v34 = vmul.f32 %v2204_v32, %v436_v27  ;;  %vm454_vm7 = vweird.f32 %v2204_v32 }
 0x1db   :  { %vm455_vm9 = vmor %vm453_vm8, %vm454_vm7  ;;  %vm366_vm7 = vcmp.ge.s32.totalorder %v362_v13, 10  ;;  %vm367_vm8 = vcmp.ge.s32.totalorder %v364_v10, 10  ;;  %v750_v10 = vld [vmem:[%s3294_s9 + $0x60] sm:$0xff] }
 0x1dc   :  { %v449_v35 = vmul.f32 %v2204_v32, %v448_v34  ;;  %v446_v36 = vsel %vm445_vm6, %v2202_v26, %v442_v33  ;;  %vm404_vm6 = vmand %vm389_vm3, %vm2561_vm4 }
 0x1dd   :  { %v457_v39 = vmul.f32 %v446_v36, %v2533_v2  ;;  %vm369_vm11 = vmand %vm366_vm7, %vm367_vm8 }
 0x1de   :  { %v450_v37 = vmul.f32 0.5, %v449_v35 }
 0x1df   :  { %v462_v44 = vmul.f32 %v2187_v40, %v457_v39 }
 0x1e0   :  { %v451_v38 = vsub.f32 1.5, %v450_v37 }
 0x1e1   :  { %v467_v47 = vadd.f32 %v2188_v45, %v462_v44 }
 0x1e2   :  { %v452_v41 = vmul.f32 %v2204_v32, %v451_v38 }
 0x1e4   :  { %v456_v42 = vsel %vm455_vm9, %v2204_v32, %v452_v41  ;;  %vm377_vm9 = vcmp.eq.s32.totalorder %v362_v13, 8  ;;  %v760_v13 = vpack.c.bf16 %v751_v12, %v750_v10  ;;  %v885_v12 = vld [vmem:[%s3298_s13 + $0x190] sm:$0xff] }
 0x1e5   :  { %v458_v43 = vmul.f32 %v456_v42, %v2539_v6  ;;  %vm386_vm12 = vmand %vm377_vm9, %vm384_vm2 }
 0x1e6   :  { %vm388_vm14 = vmor %vm369_vm11, %vm386_vm12 }
 0x1e7   :  { %v463_v46 = vmul.f32 %v2187_v40, %v458_v43  ;;  %vm407_vm1 = vmor %vm388_vm14, %vm405_vm0 }
 0x1e8   :  { %v2573_v19 = vsel %vm407_vm1, 0.0, %v2391_v14 }
 0x1e9   :  { %v468_v48 = vadd.f32 %v2188_v45, %v463_v46 }
 0x1eb   :  { %v469_v49 = vpack.c.bf16 %v468_v48, %v467_v47 }
 0x1ed   :  { %558 = vmatmul.bf16.vlgmr.msrb.gmra.mxu2 %v469_v49  ;;  %572 = vmatmul.bf16.vlgmr.msrb.gmra.mxu3 %v469_v49 }
 0x1ee   :  { %586 = vmatmul.bf16.vlgmr.msra.gmra.mxu0 %v469_v49 }
 0x26b   :  { %v587_v2 = vpop.f32.mrf.mxu0 }
 0x26c   :  { %v588_v55 = vadd.f32 %v587_v2, %v546_v52 }
 0x270   :  { %v573_v53 = vpop.f32.mrf.mxu3  ;;  %v559_v6 = vpop.f32.mrf.mxu2 }
 0x271   :  { %v574_v61 = vadd.f32 %v573_v53, %v545_v58  ;;  %v560_v7 = vadd.f32 %v559_v6, %v544_v3 }
 0x273   :  { %v589_v54 = vpop.f32.mrf.mxu0 }
 0x274   :  { %v590_v57 = vadd.f32 %v589_v54, %v546_v52 }
 0x276   :  { %v2556_v59 = vpack.c.bf16 %v590_v57, %v588_v55 }
 0x278   :  { %650 = vmatpush.bf16.msra.mxu3 %v2556_v59  ;;  %v575_v60 = vpop.f32.mrf.mxu3  ;;  %v561_v1 = vpop.f32.mrf.mxu2 }
 0x279   :  { %v576_v62 = vadd.f32 %v575_v60, %v545_v58  ;;  %v562_v5 = vadd.f32 %v561_v1, %v544_v3 }
 0x27b   :  { %v593_v0 = vpack.c.bf16 %v576_v62, %v574_v61  ;;  %v592_v8 = vpack.c.bf16 %v562_v5, %v560_v7 }
 0x27d   :  { %v600_v4 = vsel %vm3304_vm10, %v593_v0, 0 }
 0x27e   :  { %609 = vmatpush.bf16.xpose.msra.mxu1 %v600_v4 }
 0x285   :  { %2069 = vmatmul.msk.bf16.vlgmr.msra.gmra.mxu1 %vm3304_vm10, %v592_v8  ;;  %vm406_vm10 = vmor %vm385_vm5, %vm404_vm6 }
 0x286   :  { %v2567_v15 = vsel %vm406_vm10, 0.0, %v2391_v14  ;;  %vm3312_vm10 = vcmask 523264   ;;  %v748_v14 = vld [vmem:[%s3294_s9 + $0x50] sm:$0xff] }
 0x287   :  { %vm3313_vm2 = vmmov %vm3312_vm10 }
 0x288   :  { %vm3314_vm3 = vmmov %vm3313_vm2 }
 0x289   :  { %vm3315_vm4 = vmmov %vm3313_vm2 }
 0x302   :  { %v611_v16 = vpop.f32.mrf.mxu1 }
 0x303   :  { %v612_v17 = vadd.f32 %v611_v16, %v2567_v15  ;;  %v749_v16 = vld [vmem:[%s3294_s9 + $0x58] sm:$0xff] }
 0x305   :  { %v617_v18 = vsel %vm616_vm15, %v612_v17, -inf }
 0x306   :  { %618 = vmax.xlane.f32.xlu2 %v617_v18  ;;  %v746_v18 = vld [vmem:[%s3294_s9 + $0x40] sm:$0xff] }
 0x30a   :  { %v613_v20 = vpop.f32.mrf.mxu1 }
 0x30b   :  { %v614_v21 = vadd.f32 %v613_v20, %v2573_v19  ;;  %v747_v20 = vld [vmem:[%s3294_s9 + $0x48] sm:$0xff] }
 0x30d   :  { %v620_v22 = vsel %vm616_vm15, %v614_v21, -inf }
 0x30e   :  { %621 = vmax.xlane.f32.xlu2 %v620_v22  ;;  %v744_v22 = vld [vmem:[%s3294_s9 + $0x30] sm:$0xff] }
 0x326   :  { %661 = vrot.lane.b32.xlu2 %v593_v0, %s2392_s30 }
 0x379   :  { %v619_v23 = vpop.xlane.xlu2 %618 }
 0x37a   :  { %v623_v24 = vsub.f32 %v612_v17, %v619_v23  ;;  %v759_v17 = vpack.c.bf16 %v749_v16, %v748_v14  ;;  %v745_v23 = vld [vmem:[%s3294_s9 + $0x38] sm:$0xff] }
 0x37c   :  { %v625_v25 = vmul.f32 1.442695, %v623_v24  ;;  %v757_v24 = vpack.c.bf16 %v745_v23, %v744_v22  ;;  %v879_v22 = vld [vmem:[%s3298_s13 + $0x160] sm:$0xff]  ;;  %v876_v23 = vld [vmem:[%s3298_s13 + $0x148] sm:$0xff] }
 0x37e   :  { %2205 = vpow2.f32 %v625_v25  ;;  %v742_v25 = vld [vmem:[%s3294_s9 + $0x20] sm:$0xff] }
 0x381   :  { %v622_v26 = vpop.xlane.xlu2 %621 }
 0x382   :  { %v624_v27 = vsub.f32 %v614_v21, %v622_v26  ;;  %v758_v21 = vpack.c.bf16 %v747_v20, %v746_v18  ;;  %v743_v26 = vld [vmem:[%s3294_s9 + $0x28] sm:$0xff]  ;;  %v890_v18 = vld [vmem:[%s3298_s13 + $0x1b8] sm:$0xff] }
 0x384   :  { %v2206_v28 = vpop.eup %2205  ;;  %v627_v29 = vmul.f32 1.442695, %v624_v27  ;;  %v756_v27 = vpack.c.bf16 %v743_v26, %v742_v25  ;;  %v880_v25 = vld [vmem:[%s3298_s13 + $0x168] sm:$0xff]  ;;  %v877_v26 = vld [vmem:[%s3298_s13 + $0x150] sm:$0xff] }
 0x385   :  { %v629_v30 = vsel %vm616_vm15, %v2206_v28, 0.0 }
 0x386   :  { %2207 = vpow2.f32 %v627_v29  ;;  %630 = vadd.xlane.f32.xlu0 %v629_v30  ;;  %v741_v29 = vld [vmem:[%s3294_s9 + $0x18] sm:$0xff] }
 0x389   :  { %v662_v31 = vpop.permute.xlu2 %661 }
 0x38a   :  { %v667_v32 = vsel %vm3312_vm10, %v662_v31, 0 }
 0x38b   :  { %676 = vmatpush.bf16.xpose.msrb.mxu3 %v667_v32 }
 0x38c   :  { %v2208_v33 = vpop.eup %2207 }
 0x38d   :  { %v632_v34 = vsel %vm616_vm15, %v2208_v33, 0.0 }
 0x38e   :  { %633 = vadd.xlane.f32.xlu1 %v632_v34  ;;  %v738_v34 = vld [vmem:[%s3294_s9] sm:$0xff] }
 0x39a   :  { %658 = vrot.lane.b32.xlu0 %v592_v8, %s2392_s30  ;;  %v752_v8 = vld [vmem:[%s3294_s9 + $0x70] sm:$0xff] }
 0x39b   :  { %v761_v11 = vpack.c.bf16 %v753_v9, %v752_v8  ;;  %v887_v8 = vld [vmem:[%s3298_s13 + $0x1a0] sm:$0xff]  ;;  %v884_v9 = vld [vmem:[%s3298_s13 + $0x188] sm:$0xff] }
 0x39d   :  { %766 = vmatpush.bf16.msra.mxu2 %v761_v11  ;;  %v888_v11 = vld [vmem:[%s3298_s13 + $0x1a8] sm:$0xff] }
 0x39e   :  { %v924_v14 = vpack.c.bf16 %v888_v11, %v884_v9  ;;  %v847_v11 = vld [vmem:[%s3298_s13 + $0x60] sm:$0xff] }
 0x3a1   :  { %767 = vmatpush.bf16.msra.mxu2 %v760_v13  ;;  %v889_v13 = vld [vmem:[%s3298_s13 + $0x1b0] sm:$0xff] }
 0x3a2   :  { %707 = vrot.lane.b32.xlu0 %v2556_v59, %s2392_s30  ;;  %v925_v16 = vpack.c.bf16 %v889_v13, %v885_v12  ;;  %v844_v12 = vld [vmem:[%s3298_s13 + $0x48] sm:$0xff] }
 0x3a5   :  { %768 = vmatpush.bf16.msra.mxu2 %v759_v17  ;;  %v886_v17 = vld [vmem:[%s3298_s13 + $0x198] sm:$0xff] }
 0x3a6   :  { %v926_v20 = vpack.c.bf16 %v890_v18, %v886_v17  ;;  %v849_v17 = vld [vmem:[%s3298_s13 + $0x70] sm:$0xff] }
 0x3a9   :  { %769 = vmatpush.bf16.msra.mxu2 %v758_v21  ;;  %v875_v21 = vld [vmem:[%s3298_s13 + $0x140] sm:$0xff] }
 0x3ad   :  { %770 = vmatpush.bf16.msra.mxu2 %v757_v24  ;;  %v919_v24 = vpack.c.bf16 %v879_v22, %v875_v21  ;;  %v846_v22 = vld [vmem:[%s3298_s13 + $0x58] sm:$0xff] }
 0x3b1   :  { %771 = vmatpush.bf16.msra.mxu2 %v756_v27  ;;  %v881_v27 = vld [vmem:[%s3298_s13 + $0x170] sm:$0xff] }
 0x3f9   :  { %v631_v35 = vpop.xlane.xlu0 %630 }
 0x3fa   :  { %2209 = vrcp.f32 %v631_v35  ;;  %v739_v35 = vld [vmem:[%s3294_s9 + $0x8] sm:$0xff] }
 0x400   :  { %v2210_v37 = vpop.eup %2209 }
 0x401   :  { %v634_v36 = vpop.xlane.xlu1 %633  ;;  %v637_v39 = vmul.f32 %v2210_v37, %v2206_v28  ;;  %v740_v28 = vld [vmem:[%s3294_s9 + $0x10] sm:$0xff] }
 0x402   :  { %2211 = vrcp.f32 %v634_v36  ;;  %v755_v31 = vpack.c.bf16 %v741_v29, %v740_v28  ;;  %v754_v36 = vpack.c.bf16 %v739_v35, %v738_v34  ;;  %v920_v28 = vpack.c.bf16 %v880_v25, %v876_v23  ;;  %v871_v34 = vld [vmem:[%s3298_s13 + $0x120] sm:$0xff]  ;;  %v868_v35 = vld [vmem:[%s3298_s13 + $0x108] sm:$0xff]  ;;  %v850_v23 = vld [vmem:[%s3298_s13 + $0x78] sm:$0xff] }
 0x403   :  { %v921_v29 = vpack.c.bf16 %v881_v27, %v877_v26  ;;  %v906_v26 = vpack.c.bf16 %v850_v23, %v846_v22  ;;  %v839_v27 = vld [vmem:[%s3298_s13 + $0x20] sm:$0xff]  ;;  %v1136_v22 = vld [vmem:[#allocation7 + $0x1f8] sm:$0xff] }
 0x404   :  { %772 = vmatpush.bf16.msra.mxu2 %v755_v31  ;;  %v882_v31 = vld [vmem:[%s3298_s13 + $0x178] sm:$0xff] }
 0x408   :  { %v2212_v38 = vpop.eup %2211  ;;  %773 = vmatpush.bf16.msra.mxu2 %v754_v36 }
 0x409   :  { %v638_v40 = vmul.f32 %v2212_v38, %v2208_v33 }
 0x40b   :  { %v639_v41 = vpack.c.bf16 %v638_v40, %v637_v39 }
 0x40c   :  { %v659_v42 = vpop.permute.xlu0 %658 }
 0x40d   :  { %2070 = vmatmul.msk.bf16.vlgmr.msra.gmra.mxu3 %vm616_vm15, %v639_v41 }
 0x414   :  { %v708_v43 = vpop.permute.xlu0 %707 }
 0x415   :  { %720 = vmatpush.bf16.msrb.mxu1 %v708_v43  ;;  %v2189_v43 = vld [vmem:[%s3295_s10] ss:$0 sm:$0xff] }
 0x41d   :  { %2071 = vmatmul.msk.bf16.vlgmr.msrb.gmra.mxu3 %vm3313_vm2, %v659_v42 }
 0x490   :  { %v2586_v44 = vpop.f32.mrf.mxu3 }
 0x498   :  { %v2588_v45 = vpop.f32.mrf.mxu3 }
 0x4a0   :  { %v678_v46 = vpop.f32.mrf.mxu3 }
 0x4a1   :  { %v679_v47 = vadd.f32 %v678_v46, %v2567_v15 }
 0x4a3   :  { %v683_v48 = vsel %vm616_vm15, %v679_v47, -inf }
 0x4a4   :  { %684 = vmax.xlane.f32.xlu1 %v683_v48 }
 0x4a8   :  { %v680_v49 = vpop.f32.mrf.mxu3 }
 0x4a9   :  { %v681_v2 = vadd.f32 %v680_v49, %v2573_v19 }
 0x4ab   :  { %v686_v50 = vsel %vm616_vm15, %v681_v2, -inf }
 0x4ac   :  { %687 = vmax.xlane.f32.xlu1 %v686_v50 }
 0x517   :  { %v685_v52 = vpop.xlane.xlu1 %684 }
 0x518   :  { %v689_v53 = vsub.f32 %v679_v47, %v685_v52 }
 0x51a   :  { %v691_v6 = vmul.f32 1.442695, %v689_v53 }
 0x51c   :  { %2213 = vpow2.f32 %v691_v6 }
 0x51f   :  { %v688_v54 = vpop.xlane.xlu1 %687 }
 0x520   :  { %v690_v55 = vsub.f32 %v681_v2, %v688_v54 }
 0x522   :  { %v2214_v57 = vpop.eup %2213  ;;  %v693_v58 = vmul.f32 1.442695, %v690_v55  ;;  %v891_v55 = vld [vmem:[%s3298_s13 + $0x1c0] sm:$0xff] }
 0x523   :  { %v695_v59 = vsel %vm616_vm15, %v2214_v57, 0.0 }
 0x524   :  { %2215 = vpow2.f32 %v693_v58  ;;  %696 = vadd.xlane.f32.xlu1 %v695_v59  ;;  %v892_v58 = vld [vmem:[%s3298_s13 + $0x1c8] sm:$0xff] }
 0x52a   :  { %v2216_v60 = vpop.eup %2215 }
 0x52b   :  { %v698_v61 = vsel %vm616_vm15, %v2216_v60, 0.0 }
 0x52c   :  { %699 = vadd.xlane.f32.xlu2 %v698_v61  ;;  %v893_v61 = vld [vmem:[%s3298_s13 + $0x1d0] sm:$0xff] }
 0x597   :  { %v697_v62 = vpop.xlane.xlu1 %696 }
 0x598   :  { %2217 = vrcp.f32 %v697_v62  ;;  %v897_v62 = vld [vmem:[%s3298_s13 + $0x1f0] sm:$0xff] }
 0x59e   :  { %v2218_v1 = vpop.eup %2217 }
 0x59f   :  { %v700_v0 = vpop.xlane.xlu2 %699  ;;  %v703_v4 = vmul.f32 %v2218_v1, %v2214_v57  ;;  %v895_v57 = vld [vmem:[%s3298_s13 + $0x1e0] sm:$0xff]  ;;  %v929_v1 = vpack.c.bf16 %v897_v62, %v893_v61  ;;  %v852_v61 = vld [vmem:[%s3298_s13 + $0x88] sm:$0xff] }
 0x5a0   :  { %2219 = vrcp.f32 %v700_v0  ;;  %v927_v59 = vpack.c.bf16 %v895_v57, %v891_v55  ;;  %v862_v55 = vld [vmem:[%s3298_s13 + $0xd8] sm:$0xff] }
 0x5a1   :  { %969 = vmatpush.bf16.msra.mxu1 %v929_v1  ;;  %v866_v57 = vld [vmem:[%s3298_s13 + $0xf8] sm:$0xff]  ;;  %v853_v1 = vld [vmem:[%s3298_s13 + $0x90] sm:$0xff] }
 0x5a2   :  { %941 = vmatpush.bf16.msra.mxu3 %v927_v59  ;;  %v851_v59 = vld [vmem:[%s3298_s13 + $0x80] sm:$0xff] }
 0x5a5   :  { %970 = vmatpush.bf16.msra.mxu1 %v925_v16  ;;  %v845_v16 = vld [vmem:[%s3298_s13 + $0x50] sm:$0xff] }
 0x5a6   :  { %v2220_v3 = vpop.eup %2219  ;;  %v905_v21 = vpack.c.bf16 %v849_v17, %v845_v16  ;;  %v1087_v17 = vld [vmem:[#allocation7 + $0x70] sm:$0xff] }
 0x5a7   :  { %v704_v5 = vmul.f32 %v2220_v3, %v2216_v60  ;;  %v896_v60 = vld [vmem:[%s3298_s13 + $0x1e8] sm:$0xff]  ;;  %v894_v3 = vld [vmem:[%s3298_s13 + $0x1d8] sm:$0xff] }
 0x5a8   :  { %v928_v0 = vpack.c.bf16 %v896_v60, %v892_v58  ;;  %v914_v58 = vpack.c.bf16 %v866_v57, %v862_v55  ;;  %v855_v60 = vld [vmem:[%s3298_s13 + $0xa0] sm:$0xff] }
 0x5a9   :  { %v705_v7 = vpack.c.bf16 %v704_v5, %v703_v4  ;;  %v898_v4 = vld [vmem:[%s3298_s13 + $0x1f8] sm:$0xff]  ;;  %971 = vmatpush.bf16.msra.mxu1 %v921_v29  ;;  %v907_v62 = vpack.c.bf16 %v855_v60, %v851_v59  ;;  %v840_v29 = vld [vmem:[%s3298_s13 + $0x28] sm:$0xff]  ;;  %v2190_v57 = vld [vmem:[%s3296_s11] ss:$0 sm:$0xff] }
 0x5aa   :  { %v930_v5 = vpack.c.bf16 %v898_v4, %v894_v3  ;;  %955 = vmatpush.bf16.msrb.mxu0 %v928_v0  ;;  %v856_v0 = vld [vmem:[%s3298_s13 + $0xa8] sm:$0xff]  ;;  %v857_v3 = vld [vmem:[%s3298_s13 + $0xb0] sm:$0xff] }
 0x5ab   :  { %2072 = vmatmul.msk.bf16.vlgmr.msrb.gmra.mxu1 %vm616_vm15, %v705_v7  ;;  %v883_v7 = vld [vmem:[%s3298_s13 + $0x180] sm:$0xff]  ;;  %v908_v4 = vpack.c.bf16 %v856_v0, %v852_v61 }
 0x5ac   :  { %983 = vmatpush.bf16.msrb.mxu2 %v930_v5  ;;  %v923_v10 = vpack.c.bf16 %v887_v8, %v883_v7  ;;  %v909_v5 = vpack.c.bf16 %v857_v3, %v853_v1  ;;  %v854_v7 = vld [vmem:[%s3298_s13 + $0x98] sm:$0xff] }
 0x5ad   :  { %v858_v8 = vld [vmem:[%s3298_s13 + $0xb8] sm:$0xff] }
 0x5ae   :  { %942 = vmatpush.bf16.msra.mxu3 %v923_v10  ;;  %956 = vmatpush.bf16.msrb.mxu0 %v924_v14  ;;  %v910_v9 = vpack.c.bf16 %v858_v8, %v854_v7  ;;  %v843_v10 = vld [vmem:[%s3298_s13 + $0x40] sm:$0xff]  ;;  %v848_v14 = vld [vmem:[%s3298_s13 + $0x68] sm:$0xff]  ;;  %v1119_v7 = vld [vmem:[#allocation7 + $0x170] sm:$0xff] }
 0x5af   :  { %v903_v13 = vpack.c.bf16 %v847_v11, %v843_v10  ;;  %v1102_v11 = vld [vmem:[#allocation7 + $0xe8] sm:$0xff] }
 0x5b0   :  { %984 = vmatpush.bf16.msrb.mxu2 %v926_v20  ;;  %v904_v20 = vpack.c.bf16 %v848_v14, %v844_v12  ;;  %v1117_v12 = vld [vmem:[#allocation7 + $0x160] sm:$0xff]  ;;  %v1118_v14 = vld [vmem:[#allocation7 + $0x168] sm:$0xff] }
 0x5b1   :  { %v1159_v16 = vpack.c.bf16 %v1118_v14, %v1117_v12  ;;  %v1091_v12 = vld [vmem:[#allocation7 + $0x90] sm:$0xff] }
 0x5b2   :  { %943 = vmatpush.bf16.msra.mxu3 %v919_v24  ;;  %957 = vmatpush.bf16.msrb.mxu0 %v920_v28  ;;  %v835_v24 = vld [vmem:[%s3298_s13] sm:$0xff]  ;;  %v836_v28 = vld [vmem:[%s3298_s13 + $0x8] sm:$0xff]  ;;  %v1107_v14 = vld [vmem:[#allocation7 + $0x110] sm:$0xff] }
 0x628   :  { %v722_v30 = vpop.f32.mrf.mxu1 }
 0x630   :  { %v724_v32 = vpop.f32.mrf.mxu1 }
 0x631   :  { %v2176_v33 = vpack.i.bf16 %v724_v32, %v722_v30  ;;  %v878_v30 = vld [vmem:[%s3298_s13 + $0x158] sm:$0xff] }
 0x632   :  { %v922_v32 = vpack.c.bf16 %v882_v31, %v878_v30  ;;  %v899_v30 = vpack.c.bf16 %v839_v27, %v835_v24  ;;  %v900_v31 = vpack.c.bf16 %v840_v29, %v836_v28  ;;  %v1099_v24 = vld [vmem:[#allocation7 + $0xd0] sm:$0xff]  ;;  %v1116_v28 = vld [vmem:[#allocation7 + $0x158] sm:$0xff] }
 0x633   :  { %2177 = vrot.lane.b32.xlu1 %v2176_v33, %s2392_s30  ;;  %v867_v33 = vld [vmem:[%s3298_s13 + $0x100] sm:$0xff] }
 0x634   :  { %985 = vmatpush.bf16.msrb.mxu2 %v922_v32  ;;  %v915_v36 = vpack.c.bf16 %v871_v34, %v867_v33  ;;  %v837_v32 = vld [vmem:[%s3298_s13 + $0x10] sm:$0xff]  ;;  %v838_v34 = vld [vmem:[%s3298_s13 + $0x18] sm:$0xff] }
 0x635   :  { %v841_v33 = vld [vmem:[%s3298_s13 + $0x30] sm:$0xff] }
 0x636   :  { %944 = vmatpush.bf16.msra.mxu3 %v915_v36  ;;  %v901_v36 = vpack.c.bf16 %v841_v33, %v837_v32  ;;  %v1133_v32 = vld [vmem:[#allocation7 + $0x1e0] sm:$0xff] }
 0x6a5   :  { %v2178_v37 = vpop.permute.xlu1 %2177 }
 0x6a6   :  { %v2180_v38 = vunpack.i.h.bf16 %v2178_v37  ;;  %v2179_v39 = vunpack.i.l.bf16 %v2178_v37  ;;  %v872_v37 = vld [vmem:[%s3298_s13 + $0x128] sm:$0xff] }
 0x6a8   :  { %v736_v40 = vsel %vm3314_vm3, %v2588_v45, %v2180_v38  ;;  %v735_v41 = vsel %vm3315_vm4, %v2586_v44, %v2179_v39  ;;  %v869_v38 = vld [vmem:[%s3298_s13 + $0x110] sm:$0xff]  ;;  %vm3316_vm3 = vmmov %vm3313_vm2 }
 0x6a9   :  { %v737_v42 = vpack.c.bf16 %v736_v40, %v735_v41  ;;  %v873_v39 = vld [vmem:[%s3298_s13 + $0x130] sm:$0xff]  ;;  %v916_v40 = vpack.c.bf16 %v872_v37, %v868_v35  ;;  %v842_v37 = vld [vmem:[%s3298_s13 + $0x38] sm:$0xff]  ;;  %vm3317_vm4 = vmmov %vm3313_vm2 }
 0x6aa   :  { %v917_v41 = vpack.c.bf16 %v873_v39, %v869_v38  ;;  %v902_v38 = vpack.c.bf16 %v842_v37, %v838_v34  ;;  %v1134_v34 = vld [vmem:[#allocation7 + $0x1e8] sm:$0xff] }
 0x6ab   :  { %774 = vmatmul.bf16.vlgmr.msra.gmra.mxu2 %v737_v42  ;;  %v870_v42 = vld [vmem:[%s3298_s13 + $0x118] sm:$0xff]  ;;  %958 = vmatpush.bf16.msrb.mxu0 %v916_v40  ;;  %v1098_v37 = vld [vmem:[#allocation7 + $0xc8] sm:$0xff] }
 0x6ac   :  { %972 = vmatpush.bf16.msra.mxu1 %v917_v41 }
 0x72e   :  { %v775_v46 = vpop.f32.mrf.mxu2 }
 0x72f   :  { %v776_v47 = vadd.f32 %v2189_v43, %v775_v46 }
 0x731   :  { %v2654_v48 = vadd.f32 %v776_v47, %v2523_v51  ;;  %v859_v47 = vld [vmem:[%s3298_s13 + $0xc0] sm:$0xff] }
 0x733   :  { %784 = vadd.xlane.f32.xlu0 %v2654_v48 }
 0x736   :  { %v777_v49 = vpop.f32.mrf.mxu2 }
 0x737   :  { %v778_v2 = vadd.f32 %v2189_v43, %v777_v49  ;;  %v874_v43 = vld [vmem:[%s3298_s13 + $0x138] sm:$0xff]  ;;  %v863_v49 = vld [vmem:[%s3298_s13 + $0xe0] sm:$0xff] }
 0x738   :  { %v918_v46 = vpack.c.bf16 %v874_v43, %v870_v42 }
 0x739   :  { %v2658_v45 = vadd.f32 %v778_v2, %v2526_v56  ;;  %v860_v2 = vld [vmem:[%s3298_s13 + $0xc8] sm:$0xff] }
 0x73a   :  { %986 = vmatpush.bf16.msrb.mxu2 %v918_v46 }
 0x73b   :  { %786 = vadd.xlane.f32.xlu1 %v2658_v45 }
 0x73e   :  { %987 = vmatpush.bf16.msrb.mxu2 %v914_v58 }
 0x742   :  { %988 = vmatpush.bf16.msrb.mxu2 %v910_v9  ;;  %v1120_v9 = vld [vmem:[#allocation7 + $0x178] sm:$0xff] }
 0x743   :  { %v1160_v10 = vpack.c.bf16 %v1120_v9, %v1119_v7  ;;  %v1080_v7 = vld [vmem:[#allocation7 + $0x38] sm:$0xff]  ;;  %v2878_v9 = vld [vmem:[%s3299_s14] sm:$0xf] }
 0x746   :  { %989 = vmatpush.bf16.msrb.mxu2 %v906_v26  ;;  %v1115_v26 = vld [vmem:[#allocation7 + $0x150] sm:$0xff] }
 0x747   :  { %v1158_v29 = vpack.c.bf16 %v1116_v28, %v1115_v26  ;;  %v1105_v28 = vld [vmem:[#allocation7 + $0x100] sm:$0xff] }
 0x74a   :  { %990 = vmatpush.bf16.msrb.mxu2 %v902_v38  ;;  %v1113_v38 = vld [vmem:[#allocation7 + $0x140] sm:$0xff] }
 0x7a6   :  { %v785_v44 = vpop.xlane.xlu0 %784 }
 0x7a7   :  { %v788_v50 = vmul.f32 %v785_v44, %v2529_v63  ;;  %v911_v44 = vpack.c.bf16 %v863_v49, %v859_v47 }
 0x7a9   :  { %v2663_v52 = vsub.f32 %v2654_v48, %v788_v50  ;;  %v864_v50 = vld [vmem:[%s3298_s13 + $0xe8] sm:$0xff]  ;;  %945 = vmatpush.bf16.msra.mxu3 %v911_v44 }
 0x7ab   :  { %v792_v53 = vmul.f32 %v2663_v52, %v2663_v52 }
 0x7ad   :  { %794 = vadd.xlane.f32.xlu2 %v792_v53  ;;  %v861_v53 = vld [vmem:[%s3298_s13 + $0xd0] sm:$0xff]  ;;  %946 = vmatpush.bf16.msra.mxu3 %v907_v62  ;;  %v2191_v62 = vld [vmem:[%s3297_s12] ss:$0 sm:$0xff] }
 0x7ae   :  { %v787_v51 = vpop.xlane.xlu1 %786 }
 0x7af   :  { %v789_v6 = vmul.f32 %v787_v51, %v2529_v63  ;;  %v865_v51 = vld [vmem:[%s3298_s13 + $0xf0] sm:$0xff] }
 0x7b1   :  { %v2669_v54 = vsub.f32 %v2658_v45, %v789_v6  ;;  %v912_v6 = vpack.c.bf16 %v864_v50, %v860_v2  ;;  %947 = vmatpush.bf16.msra.mxu3 %v903_v13 }
 0x7b3   :  { %v793_v56 = vmul.f32 %v2669_v54, %v2669_v54  ;;  %959 = vmatpush.bf16.msrb.mxu0 %v912_v6 }
 0x7b5   :  { %796 = vadd.xlane.f32.xlu2 %v793_v56  ;;  %v913_v56 = vpack.c.bf16 %v865_v51, %v861_v53  ;;  %948 = vmatpush.bf16.msra.mxu3 %v899_v30  ;;  %v1085_v30 = vld [vmem:[#allocation7 + $0x60] sm:$0xff] }
 0x7b7   :  { %973 = vmatpush.bf16.msra.mxu1 %v913_v56  ;;  %960 = vmatpush.bf16.msrb.mxu0 %v908_v4 }
 0x7bb   :  { %974 = vmatpush.bf16.msra.mxu1 %v909_v5  ;;  %961 = vmatpush.bf16.msrb.mxu0 %v904_v20  ;;  %v1104_v5 = vld [vmem:[#allocation7 + $0xf8] sm:$0xff]  ;;  %v1135_v20 = vld [vmem:[#allocation7 + $0x1f0] sm:$0xff] }
 0x7bc   :  { %v1168_v23 = vpack.c.bf16 %v1136_v22, %v1135_v20  ;;  %v1078_v20 = vld [vmem:[#allocation7 + $0x28] sm:$0xff] }
 0x7be   :  { %1215 = vmatpush.bf16.msra.mxu2 %v1168_v23  ;;  %v1125_v23 = vld [vmem:[#allocation7 + $0x1a0] sm:$0xff] }
 0x7bf   :  { %975 = vmatpush.bf16.msra.mxu1 %v905_v21  ;;  %962 = vmatpush.bf16.msrb.mxu0 %v900_v31  ;;  %v1086_v31 = vld [vmem:[#allocation7 + $0x68] sm:$0xff] }
 0x7c0   :  { %v1143_v33 = vpack.c.bf16 %v1086_v31, %v1085_v30  ;;  %v934_v30 = vperm.slane %v2878_v9, 1 }
 0x7c3   :  { %976 = vmatpush.bf16.msra.mxu1 %v901_v36  ;;  %v1097_v36 = vld [vmem:[#allocation7 + $0xc0] sm:$0xff] }
 0x7c7   :  { %1201 = vmatpush.bf16.msrb.mxu1 %v1160_v10 }
 0x7cb   :  { %1202 = vmatpush.bf16.msrb.mxu1 %v1159_v16 }
 0x7cf   :  { %1203 = vmatpush.bf16.msrb.mxu1 %v1158_v29  ;;  %v1106_v29 = vld [vmem:[#allocation7 + $0x108] sm:$0xff] }
 0x820   :  { %v795_v18 = vpop.xlane.xlu2 %794 }
 0x821   :  { %v798_v25 = vmul.f32 %v795_v18, %v2529_v63  ;;  %v1088_v18 = vld [vmem:[#allocation7 + $0x78] sm:$0xff] }
 0x822   :  { %v1144_v21 = vpack.c.bf16 %v1088_v18, %v1087_v17  ;;  %v1108_v17 = vld [vmem:[#allocation7 + $0x118] sm:$0xff]  ;;  %v1077_v18 = vld [vmem:[#allocation7 + $0x20] sm:$0xff] }
 0x823   :  { %v800_v35 = vadd.f32 1e-06, %v798_v25  ;;  %v1100_v25 = vld [vmem:[#allocation7 + $0xd8] sm:$0xff]  ;;  %v1139_v22 = vpack.c.bf16 %v1078_v20, %v1077_v18 }
 0x824   :  { %1173 = vmatpush.bf16.msrb.mxu3 %v1144_v21  ;;  %v1150_v27 = vpack.c.bf16 %v1100_v25, %v1099_v24  ;;  %v1154_v21 = vpack.c.bf16 %v1108_v17, %v1107_v14  ;;  %v1126_v24 = vld [vmem:[#allocation7 + $0x1a8] sm:$0xff]  ;;  %v1089_v25 = vld [vmem:[#allocation7 + $0x80] sm:$0xff] }
 0x825   :  { %2221 = vrsqrt.f32 %v800_v35  ;;  %vm808_vm6 = vweird.f32 %v800_v35  ;;  %v1163_v26 = vpack.c.bf16 %v1126_v24, %v1125_v23 }
 0x828   :  { %v797_v39 = vpop.xlane.xlu2 %796  ;;  %1174 = vmatpush.bf16.msrb.mxu3 %v1143_v33  ;;  %v1075_v33 = vld [vmem:[#allocation7 + $0x10] sm:$0xff] }
 0x829   :  { %v799_v40 = vmul.f32 %v797_v39, %v2529_v63  ;;  %v1149_v39 = vpack.c.bf16 %v1098_v37, %v1097_v36  ;;  %v935_v36 = vperm.slane %v2878_v9, 2 }
 0x82b   :  { %v2222_v41 = vpop.eup %2221  ;;  %v801_v42 = vadd.f32 1e-06, %v799_v40  ;;  %v1114_v40 = vld [vmem:[#allocation7 + $0x148] sm:$0xff] }
 0x82c   :  { %v803_v43 = vmul.f32 %v2222_v41, %v800_v35  ;;  %vm809_vm5 = vweird.f32 %v2222_v41  ;;  %v1167_v35 = vpack.c.bf16 %v1134_v34, %v1133_v32  ;;  %v1153_v32 = vpack.c.bf16 %v1106_v29, %v1105_v28  ;;  %v1076_v34 = vld [vmem:[#allocation7 + $0x18] sm:$0xff] }
 0x82d   :  { %2223 = vrsqrt.f32 %v801_v42  ;;  %vm810_vm7 = vmor %vm808_vm6, %vm809_vm5  ;;  %vm818_vm9 = vweird.f32 %v801_v42  ;;  %v1138_v37 = vpack.c.bf16 %v1076_v34, %v1075_v33 }
 0x82e   :  { %v804_v46 = vmul.f32 %v2222_v41, %v803_v43  ;;  %1216 = vmatpush.bf16.msra.mxu2 %v1167_v35  ;;  %v1084_v43 = vld [vmem:[#allocation7 + $0x58] sm:$0xff]  ;;  %v1123_v35 = vld [vmem:[#allocation7 + $0x190] sm:$0xff]  ;;  %vm3318_vm5 = vmmov %vm3313_vm2 }
 0x82f   :  { %vm3320_vm6 = vmmov %vm3313_vm2 }
 0x830   :  { %v805_v47 = vmul.f32 0.5, %v804_v46  ;;  %v1131_v46 = vld [vmem:[#allocation7 + $0x1d0] sm:$0xff] }
 0x832   :  { %v806_v49 = vsub.f32 1.5, %v805_v47 }
 0x833   :  { %v2224_v2 = vpop.eup %2223 }
 0x834   :  { %v807_v44 = vmul.f32 %v2222_v41, %v806_v49  ;;  %v813_v50 = vmul.f32 %v2224_v2, %v801_v42  ;;  %vm819_vm8 = vweird.f32 %v2224_v2  ;;  %v1083_v42 = vld [vmem:[#allocation7 + $0x50] sm:$0xff]  ;;  %v1132_v49 = vld [vmem:[#allocation7 + $0x1d8] sm:$0xff] }
 0x835   :  { %vm820_vm11 = vmor %vm818_vm9, %vm819_vm8  ;;  %v1142_v47 = vpack.c.bf16 %v1084_v43, %v1083_v42 }
 0x836   :  { %v814_v53 = vmul.f32 %v2224_v2, %v813_v50  ;;  %v811_v51 = vsel %vm810_vm7, %v2222_v41, %v807_v44  ;;  %v1157_v41 = vpack.c.bf16 %v1114_v40, %v1113_v38  ;;  %v1095_v44 = vld [vmem:[#allocation7 + $0xb0] sm:$0xff]  ;;  %v1096_v50 = vld [vmem:[#allocation7 + $0xb8] sm:$0xff] }
 0x837   :  { %v822_v55 = vmul.f32 %v811_v51, %v2663_v52  ;;  %v1103_v52 = vld [vmem:[#allocation7 + $0xf0] sm:$0xff]  ;;  %1175 = vmatpush.bf16.msrb.mxu3 %v1142_v47  ;;  %v1148_v51 = vpack.c.bf16 %v1096_v50, %v1095_v44  ;;  %v1124_v38 = vld [vmem:[#allocation7 + $0x198] sm:$0xff]  ;;  %v933_v47 = vperm.slane %v2878_v9, 0  ;;  %v1121_v44 = vld [vmem:[#allocation7 + $0x180] sm:$0xff] }
 0x838   :  { %v815_v6 = vmul.f32 0.5, %v814_v53  ;;  %v1152_v8 = vpack.c.bf16 %v1104_v5, %v1103_v52  ;;  %1204 = vmatpush.bf16.msrb.mxu1 %v1157_v41  ;;  %v1111_v53 = vld [vmem:[#allocation7 + $0x130] sm:$0xff] }
 0x839   :  { %v827_v61 = vmul.f32 %v2190_v57, %v822_v55  ;;  %v1081_v55 = vld [vmem:[#allocation7 + $0x40] sm:$0xff]  ;;  %v1079_v5 = vld [vmem:[#allocation7 + $0x30] sm:$0xff] }
 0x83a   :  { %v816_v56 = vsub.f32 1.5, %v815_v6  ;;  %1187 = vmatpush.bf16.msra.mxu0 %v1152_v8  ;;  %v1112_v6 = vld [vmem:[#allocation7 + $0x138] sm:$0xff]  ;;  %v1127_v8 = vld [vmem:[#allocation7 + $0x1b0] sm:$0xff]  ;;  %v1140_v10 = vpack.c.bf16 %v1080_v7, %v1079_v5 }
 0x83b   :  { %v832_v1 = vadd.f32 %v2191_v62, %v827_v61 }
 0x83c   :  { %v817_v58 = vmul.f32 %v2224_v2, %v816_v56  ;;  %v1156_v56 = vpack.c.bf16 %v1112_v6, %v1111_v53  ;;  %v936_v53 = vperm.slane %v2878_v9, 3  ;;  %v1122_v6 = vld [vmem:[#allocation7 + $0x188] sm:$0xff] }
 0x83e   :  { %v821_v59 = vsel %vm820_vm11, %v2224_v2, %v817_v58  ;;  %v1166_v2 = vpack.c.bf16 %v1132_v49, %v1131_v46  ;;  %v1129_v58 = vld [vmem:[#allocation7 + $0x1c0] sm:$0xff]  ;;  %1205 = vmatpush.bf16.msrb.mxu1 %v1156_v56 }
 0x83f   :  { %v823_v60 = vmul.f32 %v821_v59, %v2669_v54  ;;  %v1101_v54 = vld [vmem:[#allocation7 + $0xe0] sm:$0xff] }
 0x840   :  { %v1151_v13 = vpack.c.bf16 %v1102_v11, %v1101_v54  ;;  %1217 = vmatpush.bf16.msra.mxu2 %v1166_v2  ;;  %v1128_v54 = vld [vmem:[#allocation7 + $0x1b8] sm:$0xff]  ;;  %v1073_v49 = vld [vmem:[#allocation7] sm:$0xff]  ;;  %v1074_v2 = vld [vmem:[#allocation7 + $0x8] sm:$0xff] }
 0x841   :  { %v828_v0 = vmul.f32 %v2190_v57, %v823_v60  ;;  %v1082_v57 = vld [vmem:[#allocation7 + $0x48] sm:$0xff]  ;;  %v1164_v11 = vpack.c.bf16 %v1128_v54, %v1127_v8 }
 0x842   :  { %1188 = vmatpush.bf16.msra.mxu0 %v1151_v13  ;;  %v1141_v59 = vpack.c.bf16 %v1082_v57, %v1081_v55  ;;  %v1130_v60 = vld [vmem:[#allocation7 + $0x1c8] sm:$0xff]  ;;  %v1092_v13 = vld [vmem:[#allocation7 + $0x98] sm:$0xff]  ;;  %v1161_v55 = vpack.c.bf16 %v1122_v6, %v1121_v44 }
 0x843   :  { %v833_v3 = vadd.f32 %v2191_v62, %v828_v0  ;;  %v1165_v61 = vpack.c.bf16 %v1130_v60, %v1129_v58  ;;  %v1093_v62 = vld [vmem:[#allocation7 + $0xa0] sm:$0xff]  ;;  %v1094_v0 = vld [vmem:[#allocation7 + $0xa8] sm:$0xff]  ;;  %v1146_v16 = vpack.c.bf16 %v1092_v13, %v1091_v12 }
 0x844   :  { %1176 = vmatpush.bf16.msrb.mxu3 %v1141_v59 }
 0x845   :  { %v834_v4 = vpack.c.bf16 %v833_v3, %v832_v1  ;;  %v1109_v1 = vld [vmem:[#allocation7 + $0x120] sm:$0xff]  ;;  %v1147_v3 = vpack.c.bf16 %v1094_v0, %v1093_v62  ;;  %1218 = vmatpush.bf16.msra.mxu2 %v1165_v61 }
 0x846   :  { %1189 = vmatpush.bf16.msra.mxu0 %v1150_v27  ;;  %v1090_v27 = vld [vmem:[#allocation7 + $0x88] sm:$0xff] }
 0x847   :  { %949 = vmatmul.bf16.vlgmr.msra.gmra.mxu3 %v834_v4  ;;  %963 = vmatmul.bf16.vlgmr.msrb.gmra.mxu0 %v834_v4  ;;  %v1145_v31 = vpack.c.bf16 %v1090_v27, %v1089_v25 }
 0x848   :  { %977 = vmatmul.bf16.vlgmr.msra.gmra.mxu1 %v834_v4  ;;  %991 = vmatmul.bf16.vlgmr.msrb.gmra.mxu2 %v834_v4  ;;  %v1110_v4 = vld [vmem:[#allocation7 + $0x128] sm:$0xff] }
 0x849   :  { %v1155_v52 = vpack.c.bf16 %v1110_v4, %v1109_v1  ;;  %1177 = vmatpush.bf16.msrb.mxu3 %v1140_v10  ;;  %1219 = vmatpush.bf16.msra.mxu2 %v1164_v11 }
 0x84a   :  { %1190 = vmatpush.bf16.msra.mxu0 %v1149_v39  ;;  %v1162_v39 = vpack.c.bf16 %v1124_v38, %v1123_v35 }
 0x84b   :  { %1206 = vmatpush.bf16.msrb.mxu1 %v1155_v52 }
 0x84d   :  { %1178 = vmatpush.bf16.msrb.mxu3 %v1139_v22  ;;  %1220 = vmatpush.bf16.msra.mxu2 %v1163_v26 }
 0x84e   :  { %1191 = vmatpush.bf16.msra.mxu0 %v1148_v51  ;;  %v1137_v51 = vpack.c.bf16 %v1074_v2, %v1073_v49 }
 0x84f   :  { %1207 = vmatpush.bf16.msrb.mxu1 %v1154_v21 }
 0x851   :  { %1179 = vmatpush.bf16.msrb.mxu3 %v1138_v37  ;;  %1221 = vmatpush.bf16.msra.mxu2 %v1162_v39 }
 0x852   :  { %1192 = vmatpush.bf16.msra.mxu0 %v1147_v3 }
 0x853   :  { %1208 = vmatpush.bf16.msrb.mxu1 %v1153_v32 }
 0x855   :  { %1180 = vmatpush.bf16.msrb.mxu3 %v1137_v51  ;;  %1222 = vmatpush.bf16.msra.mxu2 %v1161_v55 }
 0x856   :  { %1193 = vmatpush.bf16.msra.mxu0 %v1146_v16 }
 0x85a   :  { %1194 = vmatpush.bf16.msra.mxu0 %v1145_v31 }
 0x8c4   :  { %v964_v40 = vpop.f32.mrf.mxu0 }
 0x8c5   :  { %v2882_v41 = vadd.f32 %v964_v40, %v934_v30  ;;  %v978_v42 = vpop.f32.mrf.mxu1 }
 0x8c6   :  { %v2884_v43 = vadd.f32 %v978_v42, %v935_v36 }
 0x8c7   :  { %v1006_v46 = vmul.f32 0.044715, %v2882_v41 }
 0x8c8   :  { %v1007_v50 = vmul.f32 0.044715, %v2884_v43 }
 0x8c9   :  { %v1014_v56 = vmul.f32 %v1006_v46, %v2882_v41 }
 0x8ca   :  { %v1015_v57 = vmul.f32 %v1007_v50, %v2884_v43  ;;  %v950_v58 = vpop.f32.mrf.mxu3 }
 0x8cb   :  { %v1022_v59 = vmul.f32 %v1014_v56, %v2882_v41  ;;  %v2893_v60 = vadd.f32 %v950_v58, %v933_v47  ;;  %v992_v61 = vpop.f32.mrf.mxu2  ;;  %v998_v56 = vmul.f32 0.5, %v2882_v41 }
 0x8cc   :  { %v1023_v62 = vmul.f32 %v1015_v57, %v2884_v43  ;;  %v2896_v0 = vadd.f32 %v992_v61, %v936_v53  ;;  %v966_v1 = vpop.f32.mrf.mxu0 }
 0x8cd   :  { %v1030_v3 = vadd.f32 %v1022_v59, %v2882_v41  ;;  %v1005_v4 = vmul.f32 0.044715, %v2893_v60  ;;  %v967_v52 = vadd.f32 %v966_v1, %v934_v30  ;;  %v980_v5 = vpop.f32.mrf.mxu1  ;;  %v999_v59 = vmul.f32 0.5, %v2884_v43 }
 0x8ce   :  { %v1031_v7 = vadd.f32 %v1023_v62, %v2884_v43  ;;  %v1008_v8 = vmul.f32 0.044715, %v2896_v0  ;;  %v981_v9 = vadd.f32 %v980_v5, %v935_v36  ;;  %v997_v41 = vmul.f32 0.5, %v2893_v60 }
 0x8cf   :  { %v1013_v10 = vmul.f32 %v1005_v4, %v2893_v60  ;;  %v1010_v54 = vmul.f32 0.044715, %v967_v52  ;;  %v1038_v13 = vmul.f32 0.7978846, %v1030_v3  ;;  %v1002_v55 = vmul.f32 0.5, %v967_v52 }
 0x8d0   :  { %v1016_v11 = vmul.f32 %v1008_v8, %v2896_v0  ;;  %v1011_v12 = vmul.f32 0.044715, %v981_v9  ;;  %v1039_v17 = vmul.f32 0.7978846, %v1031_v7  ;;  %v1003_v61 = vmul.f32 0.5, %v981_v9 }
 0x8d1   :  { %v1021_v14 = vmul.f32 %v1013_v10, %v2893_v60  ;;  %v1018_v16 = vmul.f32 %v1010_v54, %v967_v52  ;;  %2225 = vtanh.f32 %v1038_v13  ;;  %v1000_v43 = vmul.f32 0.5, %v2896_v0 }
 0x8d2   :  { %v1024_v18 = vmul.f32 %v1016_v11, %v2896_v0  ;;  %v1019_v20 = vmul.f32 %v1011_v12, %v981_v9  ;;  %v952_v21 = vpop.f32.mrf.mxu3  ;;  %2227 = vtanh.f32 %v1039_v17 }
 0x8d3   :  { %v1029_v22 = vadd.f32 %v1021_v14, %v2893_v60  ;;  %v1026_v23 = vmul.f32 %v1018_v16, %v967_v52  ;;  %v953_v24 = vadd.f32 %v952_v21, %v933_v47  ;;  %v994_v25 = vpop.f32.mrf.mxu2 }
 0x8d4   :  { %v1032_v26 = vadd.f32 %v1024_v18, %v2896_v0  ;;  %v1027_v27 = vmul.f32 %v1019_v20, %v981_v9  ;;  %v995_v28 = vadd.f32 %v994_v25, %v936_v53  ;;  %v2192_v25 = vld [vmem:[%s3301_s16] ss:$0 sm:$0xff] }
 0x8d5   :  { %v1034_v29 = vadd.f32 %v1026_v23, %v967_v52  ;;  %v1009_v30 = vmul.f32 0.044715, %v953_v24  ;;  %v1037_v33 = vmul.f32 0.7978846, %v1029_v22  ;;  %v1001_v52 = vmul.f32 0.5, %v953_v24 }
 0x8d6   :  { %v1035_v31 = vadd.f32 %v1027_v27, %v981_v9  ;;  %v1012_v32 = vmul.f32 0.044715, %v995_v28  ;;  %v1040_v36 = vmul.f32 0.7978846, %v1032_v26  ;;  %v1004_v9 = vmul.f32 0.5, %v995_v28 }
 0x8d7   :  { %v1042_v34 = vmul.f32 0.7978846, %v1034_v29  ;;  %v1017_v35 = vmul.f32 %v1009_v30, %v953_v24  ;;  %v2226_v42 = vpop.eup %2225 }
 0x8d8   :  { %v1043_v37 = vmul.f32 0.7978846, %v1035_v31  ;;  %v1020_v38 = vmul.f32 %v1012_v32, %v995_v28  ;;  %v2228_v47 = vpop.eup %2227  ;;  %v1054_v50 = vadd.f32 1.0, %v2226_v42 }
 0x8d9   :  { %v1025_v39 = vmul.f32 %v1017_v35, %v953_v24  ;;  %2229 = vtanh.f32 %v1042_v34  ;;  %v1055_v51 = vadd.f32 1.0, %v2228_v47 }
 0x8da   :  { %v1028_v40 = vmul.f32 %v1020_v38, %v995_v28  ;;  %2231 = vtanh.f32 %v1043_v37  ;;  %v1062_v3 = vmul.f32 %v1054_v50, %v998_v56  ;;  %v1329_v50 = vld [vmem:[#allocation5 + $0x2d0] sm:$0xff] }
 0x8db   :  { %v1033_v46 = vadd.f32 %v1025_v39, %v953_v24  ;;  %2233 = vtanh.f32 %v1037_v33  ;;  %v1063_v5 = vmul.f32 %v1055_v51, %v999_v59  ;;  %v1330_v51 = vld [vmem:[#allocation5 + $0x2d8] sm:$0xff]  ;;  %v1333_v56 = vld [vmem:[#allocation5 + $0x2f0] sm:$0xff] }
 0x8dc   :  { %v1036_v49 = vadd.f32 %v1028_v40, %v995_v28  ;;  %2235 = vtanh.f32 %v1040_v36 }
 0x8dd   :  { %v1041_v2 = vmul.f32 0.7978846, %v1033_v46 }
 0x8de   :  { %v1044_v44 = vmul.f32 0.7978846, %v1036_v49 }
 0x8df   :  { %v2230_v53 = vpop.eup %2229  ;;  %2237 = vtanh.f32 %v1041_v2 }
 0x8e0   :  { %v2232_v6 = vpop.eup %2231  ;;  %v1058_v57 = vadd.f32 1.0, %v2230_v53  ;;  %2239 = vtanh.f32 %v1044_v44  ;;  %v1332_v53 = vld [vmem:[#allocation5 + $0x2e8] sm:$0xff] }
 0x8e1   :  { %v2234_v58 = vpop.eup %2233  ;;  %v1059_v62 = vadd.f32 1.0, %v2232_v6  ;;  %v1356_v6 = vpack.c.bf16 %v1332_v53, %v1329_v50  ;;  %v1297_v53 = vld [vmem:[#allocation5 + $0x1d0] sm:$0xff] }
 0x8e2   :  { %v2236_v1 = vpop.eup %2235  ;;  %v1066_v4 = vmul.f32 %v1058_v57, %v1002_v55  ;;  %v1053_v10 = vadd.f32 1.0, %v2234_v58  ;;  %v1331_v55 = vld [vmem:[#allocation5 + $0x2e0] sm:$0xff]  ;;  %v1334_v57 = vld [vmem:[#allocation5 + $0x2f8] sm:$0xff]  ;;  %v1357_v58 = vpack.c.bf16 %v1333_v56, %v1330_v51 }
 0x8e3   :  { %v1067_v7 = vmul.f32 %v1059_v62, %v1003_v61  ;;  %v1056_v12 = vadd.f32 1.0, %v2236_v1  ;;  %v1358_v59 = vpack.c.bf16 %v1334_v57, %v1331_v55  ;;  %1368 = vmatpush.bf16.msra.mxu3 %v1356_v6  ;;  %v1323_v61 = vld [vmem:[#allocation5 + $0x2a0] sm:$0xff]  ;;  %v1326_v62 = vld [vmem:[#allocation5 + $0x2b8] sm:$0xff]  ;;  %v1324_v1 = vld [vmem:[#allocation5 + $0x2a8] sm:$0xff] }
 0x8e4   :  { %v1070_v8 = vpack.c.bf16 %v1066_v4, %v1062_v3  ;;  %v1061_v17 = vmul.f32 %v1053_v10, %v997_v41  ;;  %1382 = vmatpush.bf16.msrb.mxu0 %v1357_v58  ;;  %v1353_v3 = vpack.c.bf16 %v1326_v62, %v1323_v61  ;;  %v1327_v4 = vld [vmem:[#allocation5 + $0x2c0] sm:$0xff]  ;;  %v1321_v41 = vld [vmem:[#allocation5 + $0x290] sm:$0xff]  ;;  %v1298_v6 = vld [vmem:[#allocation5 + $0x1d8] sm:$0xff] }
 0x8e5   :  { %v2238_v54 = vpop.eup %2237  ;;  %v1071_v11 = vpack.c.bf16 %v1067_v7, %v1063_v5  ;;  %v1064_v20 = vmul.f32 %v1056_v12, %v1000_v43  ;;  %1396 = vmatpush.bf16.msra.mxu1 %v1358_v59  ;;  %v1325_v5 = vld [vmem:[#allocation5 + $0x2b0] sm:$0xff]  ;;  %v1328_v7 = vld [vmem:[#allocation5 + $0x2c8] sm:$0xff]  ;;  %v1318_v12 = vld [vmem:[#allocation5 + $0x278] sm:$0xff] }
 0x8e6   :  { %v2240_v13 = vpop.eup %2239  ;;  %1195 = vmatmul.bf16.vlgmr.msra.gmra.mxu0 %v1070_v8  ;;  %v1057_v14 = vadd.f32 1.0, %v2238_v54  ;;  %v1354_v8 = vpack.c.bf16 %v1327_v4, %v1324_v1  ;;  %v1355_v10 = vpack.c.bf16 %v1328_v7, %v1325_v5  ;;  %v1317_v54 = vld [vmem:[#allocation5 + $0x270] sm:$0xff]  ;;  %v1351_v43 = vpack.c.bf16 %v1321_v41, %v1318_v12  ;;  %v1295_v51 = vld [vmem:[#allocation5 + $0x1c0] sm:$0xff]  ;;  %v1290_v59 = vld [vmem:[#allocation5 + $0x198] sm:$0xff] }
 0x8e7   :  { %1209 = vmatmul.bf16.vlgmr.msrb.gmra.mxu1 %v1071_v11  ;;  %v1060_v16 = vadd.f32 1.0, %v2240_v13  ;;  %1369 = vmatpush.bf16.msra.mxu3 %v1353_v3  ;;  %v1320_v11 = vld [vmem:[#allocation5 + $0x288] sm:$0xff]  ;;  %v1340_v57 = vpack.c.bf16 %v1298_v6, %v1295_v51  ;;  %v1287_v58 = vld [vmem:[#allocation5 + $0x180] sm:$0xff]  ;;  %v1289_v4 = vld [vmem:[#allocation5 + $0x190] sm:$0xff] }
 0x8e8   :  { %v1065_v18 = vmul.f32 %v1057_v14, %v1001_v52  ;;  %1383 = vmatpush.bf16.msrb.mxu0 %v1354_v8  ;;  %v1350_v13 = vpack.c.bf16 %v1320_v11, %v1317_v54  ;;  %v1319_v52 = vld [vmem:[#allocation5 + $0x280] sm:$0xff]  ;;  %v1322_v14 = vld [vmem:[#allocation5 + $0x298] sm:$0xff]  ;;  %v1288_v61 = vld [vmem:[#allocation5 + $0x188] sm:$0xff]  ;;  %v1335_v1 = vpack.c.bf16 %v1290_v59, %v1287_v58 }
 0x8e9   :  { %v1068_v21 = vmul.f32 %v1060_v16, %v1004_v9  ;;  %1397 = vmatpush.bf16.msra.mxu1 %v1355_v10  ;;  %v1352_v9 = vpack.c.bf16 %v1322_v14, %v1319_v52  ;;  %v1311_v16 = vld [vmem:[#allocation5 + $0x240] sm:$0xff]  ;;  %v1292_v5 = vld [vmem:[#allocation5 + $0x1a8] sm:$0xff] }
 0x8ea   :  { %v1069_v22 = vpack.c.bf16 %v1065_v18, %v1061_v17  ;;  %v1314_v17 = vld [vmem:[#allocation5 + $0x258] sm:$0xff]  ;;  %v1312_v18 = vld [vmem:[#allocation5 + $0x248] sm:$0xff]  ;;  %v1291_v3 = vld [vmem:[#allocation5 + $0x1a0] sm:$0xff]  ;;  %v1337_v8 = vpack.c.bf16 %v1292_v5, %v1289_v4 }
 0x8eb   :  { %v1072_v23 = vpack.c.bf16 %v1068_v21, %v1064_v20  ;;  %1370 = vmatpush.bf16.msra.mxu3 %v1350_v13  ;;  %v1347_v20 = vpack.c.bf16 %v1314_v17, %v1311_v16  ;;  %v1315_v21 = vld [vmem:[#allocation5 + $0x260] sm:$0xff]  ;;  %v1336_v7 = vpack.c.bf16 %v1291_v3, %v1288_v61 }
 0x8ec   :  { %1181 = vmatmul.bf16.vlgmr.msrb.gmra.mxu3 %v1069_v22  ;;  %1384 = vmatpush.bf16.msrb.mxu0 %v1351_v43  ;;  %v1313_v22 = vld [vmem:[#allocation5 + $0x250] sm:$0xff] }
 0x8ed   :  { %1223 = vmatmul.bf16.vlgmr.msra.gmra.mxu2 %v1072_v23  ;;  %1398 = vmatpush.bf16.msra.mxu1 %v1352_v9  ;;  %v1316_v23 = vld [vmem:[#allocation5 + $0x268] sm:$0xff] }
 0x8ef   :  { %1371 = vmatpush.bf16.msra.mxu3 %v1347_v20 }
 0x963   :  { %v1196_v60 = vpop.f32.mrf.mxu0 }
 0x964   :  { %v1210_v27 = vpop.f32.mrf.mxu1 }
 0x96b   :  { %v1198_v34 = vpop.f32.mrf.mxu0 }
 0x96c   :  { %v1212_v36 = vpop.f32.mrf.mxu1 }
 0x96f   :  { %v1182_v24 = vpop.f32.mrf.mxu3 }
 0x970   :  { %v1183_v26 = vadd.f32 %v2192_v25, %v1182_v24  ;;  %v1224_v0 = vpop.f32.mrf.mxu2  ;;  %v1305_v24 = vld [vmem:[#allocation5 + $0x210] sm:$0xff] }
 0x972   :  { %v1197_v29 = vadd.f32 %v1196_v60, %v1183_v26  ;;  %v1349_v60 = vpack.c.bf16 %v1316_v23, %v1313_v22  ;;  %v1308_v26 = vld [vmem:[#allocation5 + $0x228] sm:$0xff] }
 0x974   :  { %v1211_v28 = vadd.f32 %v1210_v27, %v1197_v29  ;;  %1399 = vmatpush.bf16.msra.mxu1 %v1349_v60  ;;  %v1306_v27 = vld [vmem:[#allocation5 + $0x218] sm:$0xff]  ;;  %v1344_v29 = vpack.c.bf16 %v1308_v26, %v1305_v24 }
 0x976   :  { %v1225_v30 = vadd.f32 %v1224_v0, %v1211_v28  ;;  %v1309_v0 = vld [vmem:[#allocation5 + $0x230] sm:$0xff]  ;;  %v1307_v28 = vld [vmem:[#allocation5 + $0x220] sm:$0xff]  ;;  %1372 = vmatpush.bf16.msra.mxu3 %v1344_v29 }
 0x977   :  { %v1184_v31 = vpop.f32.mrf.mxu3  ;;  %v2194_v29 = vld [vmem:[%s3291_s6 + $0x1] ss:$0 sm:$0xff] }
 0x978   :  { %v2916_v32 = vadd.f32 %v1225_v30, %v2654_v48  ;;  %v1185_v33 = vadd.f32 %v2192_v25, %v1184_v31  ;;  %v1226_v38 = vpop.f32.mrf.mxu2  ;;  %v1348_v25 = vpack.c.bf16 %v1315_v21, %v1312_v18  ;;  %v1310_v30 = vld [vmem:[#allocation5 + $0x238] sm:$0xff]  ;;  %v1345_v31 = vpack.c.bf16 %v1309_v0, %v1306_v27 }
 0x97a   :  { %v1199_v35 = vadd.f32 %v1198_v34, %v1185_v33  ;;  %1235 = vadd.xlane.f32.xlu0 %v2916_v32  ;;  %1385 = vmatpush.bf16.msrb.mxu0 %v1348_v25  ;;  %v1346_v33 = vpack.c.bf16 %v1310_v30, %v1307_v28  ;;  %v1299_v34 = vld [vmem:[#allocation5 + $0x1e0] sm:$0xff] }
 0x97b   :  { %v2193_v25 = vld [vmem:[%s3290_s5 + $0x1] ss:$0 sm:$0xff] }
 0x97c   :  { %v1213_v37 = vadd.f32 %v1212_v36, %v1199_v35  ;;  %1400 = vmatpush.bf16.msra.mxu1 %v1346_v33  ;;  %v1302_v35 = vld [vmem:[#allocation5 + $0x1f8] sm:$0xff]  ;;  %v1300_v36 = vld [vmem:[#allocation5 + $0x1e8] sm:$0xff] }
 0x97e   :  { %v1227_v39 = vadd.f32 %v1226_v38, %v1213_v37  ;;  %1386 = vmatpush.bf16.msrb.mxu0 %v1345_v31  ;;  %v1341_v37 = vpack.c.bf16 %v1302_v35, %v1299_v34  ;;  %v1303_v38 = vld [vmem:[#allocation5 + $0x200] sm:$0xff] }
 0x97f   :  { %v2075_v34 = vld [vmem:[%s3293_s8 + $0x3] sm:$0x7] }
 0x980   :  { %v2920_v40 = vadd.f32 %v1227_v39, %v2658_v45  ;;  %v1301_v39 = vld [vmem:[#allocation5 + $0x1f0] sm:$0xff]  ;;  %1373 = vmatpush.bf16.msra.mxu3 %v1341_v37  ;;  %v1363_v35 = vperm.slane %v2075_v34, 1 }
 0x982   :  { %1237 = vadd.xlane.f32.xlu2 %v2920_v40 }
 0x9ed   :  { %v1236_v42 = vpop.xlane.xlu0 %1235 }
 0x9ee   :  { %v1239_v46 = vmul.f32 %v1236_v42, %v2529_v63  ;;  %v1304_v42 = vld [vmem:[#allocation5 + $0x208] sm:$0xff] }
 0x9f0   :  { %v2925_v48 = vsub.f32 %v2916_v32, %v1239_v46  ;;  %v1342_v46 = vpack.c.bf16 %v1303_v38, %v1300_v36 }
 0x9f2   :  { %v1243_v47 = vmul.f32 %v2925_v48, %v2925_v48  ;;  %1387 = vmatpush.bf16.msrb.mxu0 %v1342_v46 }
 0x9f4   :  { %1245 = vadd.xlane.f32.xlu0 %v1243_v47  ;;  %v1343_v47 = vpack.c.bf16 %v1304_v42, %v1301_v39 }
 0x9f5   :  { %v1238_v49 = vpop.xlane.xlu2 %1237 }
 0x9f6   :  { %v1240_v2 = vmul.f32 %v1238_v49, %v2529_v63  ;;  %1401 = vmatpush.bf16.msra.mxu1 %v1343_v47  ;;  %v1293_v49 = vld [vmem:[#allocation5 + $0x1b0] sm:$0xff] }
 0x9f8   :  { %v2931_v44 = vsub.f32 %v2920_v40, %v1240_v2  ;;  %v1296_v2 = vld [vmem:[#allocation5 + $0x1c8] sm:$0xff] }
 0x9f9   :  { %v1338_v50 = vpack.c.bf16 %v1296_v2, %v1293_v49  ;;  %v1362_v49 = vperm.slane %v2075_v34, 0 }
 0x9fa   :  { %v1244_v45 = vmul.f32 %v2931_v44, %v2931_v44  ;;  %1402 = vmatpush.bf16.msra.mxu1 %v1340_v57 }
 0x9fb   :  { %1374 = vmatpush.bf16.msra.mxu3 %v1338_v50 }
 0x9fc   :  { %1247 = vadd.xlane.f32.xlu2 %v1244_v45  ;;  %v1294_v45 = vld [vmem:[#allocation5 + $0x1b8] sm:$0xff] }
 0x9fd   :  { %v1339_v55 = vpack.c.bf16 %v1297_v53, %v1294_v45 }
 0x9fe   :  { %1403 = vmatpush.bf16.msra.mxu1 %v1337_v8 }
 0x9ff   :  { %1388 = vmatpush.bf16.msrb.mxu0 %v1339_v55  ;;  %1375 = vmatpush.bf16.msra.mxu3 %v1335_v1 }
 0xa03   :  { %1389 = vmatpush.bf16.msrb.mxu0 %v1336_v7 }
 0xa67   :  { %v1246_v56 = vpop.xlane.xlu0 %1245 }
 0xa68   :  { %v1249_v62 = vmul.f32 %v1246_v56, %v2529_v63 }
 0xa6a   :  { %v1251_v10 = vadd.f32 1e-06, %v1249_v62 }
 0xa6c   :  { %2241 = vrsqrt.f32 %v1251_v10  ;;  %vm1259_vm13 = vweird.f32 %v1251_v10 }
 0xa6f   :  { %v1248_v54 = vpop.xlane.xlu2 %1247 }
 0xa70   :  { %v1250_v11 = vmul.f32 %v1248_v54, %v2529_v63 }
 0xa72   :  { %v2242_v12 = vpop.eup %2241  ;;  %v1252_v13 = vadd.f32 1e-06, %v1250_v11 }
 0xa73   :  { %v1254_v41 = vmul.f32 %v2242_v12, %v1251_v10  ;;  %vm1260_vm12 = vweird.f32 %v2242_v12 }
 0xa74   :  { %2243 = vrsqrt.f32 %v1252_v13  ;;  %vm1261_vm14 = vmor %vm1259_vm13, %vm1260_vm12  ;;  %vm1269_vm1 = vweird.f32 %v1252_v13 }
 0xa75   :  { %v1255_v52 = vmul.f32 %v2242_v12, %v1254_v41 }
 0xa77   :  { %v1256_v14 = vmul.f32 0.5, %v1255_v52 }
 0xa79   :  { %v1257_v43 = vsub.f32 1.5, %v1256_v14 }
 0xa7a   :  { %v2244_v9 = vpop.eup %2243 }
 0xa7b   :  { %v1258_v16 = vmul.f32 %v2242_v12, %v1257_v43  ;;  %v1264_v17 = vmul.f32 %v2244_v9, %v1252_v13  ;;  %vm1270_vm0 = vweird.f32 %v2244_v9 }
 0xa7c   :  { %vm1271_vm10 = vmor %vm1269_vm1, %vm1270_vm0 }
 0xa7d   :  { %v1265_v18 = vmul.f32 %v2244_v9, %v1264_v17  ;;  %v1262_v20 = vsel %vm1261_vm14, %v2242_v12, %v1258_v16 }
 0xa7e   :  { %v1273_v23 = vmul.f32 %v1262_v20, %v2925_v48 }
 0xa7f   :  { %v1266_v21 = vmul.f32 0.5, %v1265_v18 }
 0xa80   :  { %v1278_v27 = vmul.f32 %v2193_v25, %v1273_v23 }
 0xa81   :  { %v1267_v22 = vsub.f32 1.5, %v1266_v21 }
 0xa82   :  { %v1283_v28 = vadd.f32 %v2194_v29, %v1278_v27 }
 0xa83   :  { %v1268_v60 = vmul.f32 %v2244_v9, %v1267_v22 }
 0xa85   :  { %v1272_v24 = vsel %vm1271_vm10, %v2244_v9, %v1268_v60 }
 0xa86   :  { %v1274_v26 = vmul.f32 %v1272_v24, %v2931_v44  ;;  %v1364_v44 = vperm.slane %v2075_v34, 2 }
 0xa88   :  { %v1279_v0 = vmul.f32 %v2193_v25, %v1274_v26 }
 0xa8a   :  { %v1284_v30 = vadd.f32 %v2194_v29, %v1279_v0 }
 0xa8c   :  { %v1285_v31 = vpack.c.bf16 %v1284_v30, %v1283_v28 }
 0xa8e   :  { %1376 = vmatmul.bf16.vlgmr.msra.gmra.mxu3 %v1285_v31  ;;  %1390 = vmatmul.bf16.vlgmr.msrb.gmra.mxu0 %v1285_v31 }
 0xa8f   :  { %1404 = vmatmul.bf16.vlgmr.msra.gmra.mxu1 %v1285_v31 }
 0xb0b   :  { %v1391_v48 = vpop.f32.mrf.mxu0 }
 0xb0c   :  { %v1405_v33 = vpop.f32.mrf.mxu1  ;;  %v1392_v38 = vadd.f32 %v1391_v48, %v1363_v35 }
 0xb0d   :  { %v1406_v46 = vadd.f32 %v1405_v33, %v1364_v44 }
 0xb11   :  { %v1377_v36 = vpop.f32.mrf.mxu3 }
 0xb12   :  { %v1378_v51 = vadd.f32 %v1377_v36, %v1362_v49 }
 0xb13   :  { %v1393_v37 = vpop.f32.mrf.mxu0 }
 0xb14   :  { %v1394_v39 = vadd.f32 %v1393_v37, %v1363_v35  ;;  %v1407_v42 = vpop.f32.mrf.mxu1 }
 0xb15   :  { %v1408_v47 = vadd.f32 %v1407_v42, %v1364_v44 }
 0xb16   :  { %v1411_v2 = vpack.c.bf16 %v1394_v39, %v1392_v38 }
 0xb17   :  { %v1412_v45 = vpack.c.bf16 %v1408_v47, %v1406_v46 }
 0xb18   :  { %1477 = vrot.lane.b32.xlu0 %v1411_v2, %s2392_s30  ;;  %v1417_v50 = vsel %vm3313_vm2, %v1411_v2, 0  ;;  %v2095_v2 = vld [vmem:[%s3294_s9 + $0xf8] sm:$0xff] }
 0xb19   :  { %1466 = vmatpush.bf16.msrb.mxu3 %v1412_v45  ;;  %v1379_v53 = vpop.f32.mrf.mxu3  ;;  %1426 = vmatpush.bf16.xpose.msrb.mxu2 %v1417_v50 }
 0xb1a   :  { %v1380_v6 = vadd.f32 %v1379_v53, %v1362_v49  ;;  %v2094_v49 = vld [vmem:[%s3294_s9 + $0xf0] sm:$0xff]  ;;  %v2093_v53 = vld [vmem:[%s3294_s9 + $0xe8] sm:$0xff] }
 0xb1b   :  { %v1578_v50 = vpack.c.bf16 %v2095_v2, %v2094_v49  ;;  %v2152_v49 = vld [vmem:[%s3298_s13 + $0x3a8] sm:$0xff]  ;;  %v2149_v2 = vld [vmem:[%s3298_s13 + $0x390] sm:$0xff] }
 0xb1c   :  { %v1410_v56 = vpack.c.bf16 %v1380_v6, %v1378_v51  ;;  %v2090_v6 = vld [vmem:[%s3294_s9 + $0xd0] sm:$0xff] }
 0xb1e   :  { %1474 = vrot.lane.b32.xlu2 %v1410_v56, %s2392_s30 }
 0xb20   :  { %2076 = vmatmul.msk.bf16.vlgmr.msrb.gmra.mxu2 %vm3316_vm3, %v1410_v56  ;;  %v2091_v56 = vld [vmem:[%s3294_s9 + $0xd8] sm:$0xff] }
 0xb21   :  { %1584 = vmatpush.bf16.msra.mxu2 %v1578_v50 }
 0xb78   :  { %v1475_v58 = vpop.permute.xlu2 %1474 }
 0xb8a   :  { %v1478_v55 = vpop.permute.xlu0 %1477 }
 0xb8b   :  { %v1483_v57 = vsel %vm3317_vm4, %v1478_v55, 0  ;;  %v1576_v55 = vpack.c.bf16 %v2091_v56, %v2090_v6  ;;  %v2154_v6 = vld [vmem:[%s3298_s13 + $0x3b8] sm:$0xff] }
 0xb8c   :  { %1492 = vmatpush.bf16.xpose.msra.mxu0 %v1483_v57  ;;  %v2088_v57 = vld [vmem:[%s3294_s9 + $0xc0] sm:$0xff] }
 0xb93   :  { %2078 = vmatmul.msk.bf16.vlgmr.msra.gmra.mxu0 %vm3318_vm5, %v1475_v58  ;;  %v2089_v58 = vld [vmem:[%s3294_s9 + $0xc8] sm:$0xff] }
 0xba3   :  { %v1428_v59 = vpop.f32.mrf.mxu2 }
 0xba4   :  { %v1429_v61 = vadd.f32 %v1428_v59, %v2567_v15  ;;  %v1575_v59 = vpack.c.bf16 %v2089_v58, %v2088_v57  ;;  %v2143_v57 = vld [vmem:[%s3298_s13 + $0x360] sm:$0xff]  ;;  %v2140_v58 = vld [vmem:[%s3298_s13 + $0x348] sm:$0xff] }
 0xba6   :  { %v1433_v62 = vsel %vm616_vm15, %v1429_v61, -inf }
 0xba7   :  { %1434 = vmax.xlane.f32.xlu0 %v1433_v62  ;;  %v2087_v62 = vld [vmem:[%s3294_s9 + $0xb8] sm:$0xff] }
 0xbab   :  { %v1430_v11 = vpop.f32.mrf.mxu2 }
 0xbac   :  { %v1431_v13 = vadd.f32 %v1430_v11, %v2573_v19  ;;  %v2081_v11 = vld [vmem:[%s3294_s9 + $0x88] sm:$0xff] }
 0xbae   :  { %v1436_v41 = vsel %vm616_vm15, %v1431_v13, -inf }
 0xc10   :  { %v1494_v1 = vpop.f32.mrf.mxu0 }
 0xc11   :  { %v1495_v3 = vadd.f32 %v1494_v1, %v2567_v15 }
 0xc13   :  { %v1499_v4 = vsel %vm616_vm15, %v1495_v3, -inf }
 0xc14   :  { %1500 = vmax.xlane.f32.xlu1 %v1499_v4  ;;  %v2085_v4 = vld [vmem:[%s3294_s9 + $0xa8] sm:$0xff] }
 0xc18   :  { %v1496_v5 = vpop.f32.mrf.mxu0 }
 0xc19   :  { %v1497_v7 = vadd.f32 %v1496_v5, %v2573_v19 }
 0xc1a   :  { %v1435_v8 = vpop.xlane.xlu0 %1434 }
 0xc1b   :  { %v1439_v10 = vsub.f32 %v1429_v61, %v1435_v8  ;;  %v1502_v54 = vsel %vm616_vm15, %v1497_v7, -inf  ;;  %v2086_v61 = vld [vmem:[%s3294_s9 + $0xb0] sm:$0xff]  ;;  %v2083_v8 = vld [vmem:[%s3294_s9 + $0x98] sm:$0xff] }
 0xc1c   :  { %1503 = vmax.xlane.f32.xlu1 %v1502_v54  ;;  %v1574_v1 = vpack.c.bf16 %v2087_v62, %v2086_v61  ;;  %v2080_v54 = vld [vmem:[%s3294_s9 + $0x80] sm:$0xff]  ;;  %v2144_v61 = vld [vmem:[%s3298_s13 + $0x368] sm:$0xff]  ;;  %v2141_v62 = vld [vmem:[%s3298_s13 + $0x350] sm:$0xff] }
 0xc1d   :  { %v1441_v12 = vmul.f32 1.442695, %v1439_v10 }
 0xc1f   :  { %2245 = vpow2.f32 %v1441_v12  ;;  %v1571_v12 = vpack.c.bf16 %v2081_v11, %v2080_v54  ;;  %v2135_v54 = vld [vmem:[%s3298_s13 + $0x320] sm:$0xff]  ;;  %v2132_v11 = vld [vmem:[%s3298_s13 + $0x308] sm:$0xff] }
 0xc24   :  { %1437 = vmax.xlane.f32.xlu1 %v1436_v41 }
 0xc25   :  { %v2246_v15 = vpop.eup %2245 }
 0xc26   :  { %v1445_v52 = vsel %vm616_vm15, %v2246_v15, 0.0 }
 0xc27   :  { %1446 = vadd.xlane.f32.xlu0 %v1445_v52 }
 0xc87   :  { %v1501_v14 = vpop.xlane.xlu1 %1500 }
 0xc88   :  { %v1505_v43 = vsub.f32 %v1495_v3, %v1501_v14  ;;  %v2084_v3 = vld [vmem:[%s3294_s9 + $0xa0] sm:$0xff] }
 0xc89   :  { %v1573_v5 = vpack.c.bf16 %v2085_v4, %v2084_v3  ;;  %v1741_v3 = vpack.c.bf16 %v2144_v61, %v2140_v58  ;;  %v2100_v61 = vld [vmem:[%s3298_s13 + $0x208] sm:$0xff] }
 0xc8a   :  { %v1507_v9 = vmul.f32 1.442695, %v1505_v43 }
 0xc8c   :  { %2247 = vpow2.f32 %v1507_v9 }
 0xc8f   :  { %v1504_v16 = vpop.xlane.xlu1 %1503 }
 0xc90   :  { %v1506_v17 = vsub.f32 %v1497_v7, %v1504_v16  ;;  %v2082_v7 = vld [vmem:[%s3294_s9 + $0x90] sm:$0xff] }
 0xc91   :  { %v1572_v10 = vpack.c.bf16 %v2083_v8, %v2082_v7  ;;  %v2146_v7 = vld [vmem:[%s3298_s13 + $0x378] sm:$0xff] }
 0xc92   :  { %v2248_v18 = vpop.eup %2247  ;;  %v1509_v20 = vmul.f32 1.442695, %v1506_v17  ;;  %v2195_v17 = vld [vmem:[%s3295_s10 + $0x1] ss:$0 sm:$0xff] }
 0xc93   :  { %v1511_v21 = vsel %vm616_vm15, %v2248_v18, 0.0 }
 0xc94   :  { %2249 = vpow2.f32 %v1509_v20  ;;  %1512 = vadd.xlane.f32.xlu2 %v1511_v21 }
 0xc97   :  { %v1438_v23 = vpop.xlane.xlu1 %1437 }
 0xc98   :  { %v1440_v25 = vsub.f32 %v1431_v13, %v1438_v23 }
 0xc9a   :  { %v2250_v19 = vpop.eup %2249  ;;  %v1443_v60 = vmul.f32 1.442695, %v1440_v25  ;;  %v1447_v34 = vpop.xlane.xlu0 %1446 }
 0xc9b   :  { %v1514_v22 = vsel %vm616_vm15, %v2250_v19, 0.0 }
 0xc9c   :  { %1515 = vadd.xlane.f32.xlu1 %v1514_v22  ;;  %2251 = vpow2.f32 %v1443_v60 }
 0xca2   :  { %v2252_v24 = vpop.eup %2251 }
 0xca3   :  { %v1448_v26 = vsel %vm616_vm15, %v2252_v24, 0.0 }
 0xcb5   :  { %1523 = vrot.lane.b32.xlu1 %v1412_v45, %s2392_s30  ;;  %v2092_v45 = vld [vmem:[%s3294_s9 + $0xe0] sm:$0xff] }
 0xcb6   :  { %v1577_v51 = vpack.c.bf16 %v2093_v53, %v2092_v45  ;;  %v2153_v45 = vld [vmem:[%s3298_s13 + $0x3b0] sm:$0xff] }
 0xcb7   :  { %v1746_v53 = vpack.c.bf16 %v2153_v45, %v2149_v2  ;;  %v2109_v2 = vld [vmem:[%s3298_s13 + $0x250] sm:$0xff] }
 0xcb8   :  { %1585 = vmatpush.bf16.msra.mxu2 %v1577_v51  ;;  %v2150_v51 = vld [vmem:[%s3298_s13 + $0x398] sm:$0xff]  ;;  %v2113_v45 = vld [vmem:[%s3298_s13 + $0x270] sm:$0xff] }
 0xcb9   :  { %v1747_v56 = vpack.c.bf16 %v2154_v6, %v2150_v51  ;;  %v1726_v51 = vpack.c.bf16 %v2113_v45, %v2109_v2  ;;  %v2110_v6 = vld [vmem:[%s3298_s13 + $0x258] sm:$0xff] }
 0xcba   :  { %v1959_v45 = vld [vmem:[#allocation7 + $0x3f8] sm:$0xff] }
 0xcbc   :  { %1586 = vmatpush.bf16.msra.mxu2 %v1576_v55  ;;  %v2139_v55 = vld [vmem:[%s3298_s13 + $0x340] sm:$0xff] }
 0xcc0   :  { %1587 = vmatpush.bf16.msra.mxu2 %v1575_v59  ;;  %v1740_v59 = vpack.c.bf16 %v2143_v57, %v2139_v55  ;;  %v2099_v55 = vld [vmem:[%s3298_s13 + $0x200] sm:$0xff] }
 0xcc4   :  { %1588 = vmatpush.bf16.msra.mxu2 %v1574_v1  ;;  %v2145_v1 = vld [vmem:[%s3298_s13 + $0x370] sm:$0xff] }
 0xcc5   :  { %v1742_v4 = vpack.c.bf16 %v2145_v1, %v2141_v62  ;;  %v2104_v62 = vld [vmem:[%s3298_s13 + $0x228] sm:$0xff] }
 0xcc8   :  { %1589 = vmatpush.bf16.msra.mxu2 %v1573_v5  ;;  %v2142_v5 = vld [vmem:[%s3298_s13 + $0x358] sm:$0xff] }
 0xcc9   :  { %v1743_v8 = vpack.c.bf16 %v2146_v7, %v2142_v5  ;;  %v2105_v5 = vld [vmem:[%s3298_s13 + $0x230] sm:$0xff]  ;;  %v2102_v7 = vld [vmem:[%s3298_s13 + $0x218] sm:$0xff] }
 0xccc   :  { %1590 = vmatpush.bf16.msra.mxu2 %v1572_v10  ;;  %v2131_v10 = vld [vmem:[%s3298_s13 + $0x300] sm:$0xff] }
 0xcd0   :  { %1591 = vmatpush.bf16.msra.mxu2 %v1571_v12  ;;  %v1736_v12 = vpack.c.bf16 %v2135_v54, %v2131_v10  ;;  %v2106_v54 = vld [vmem:[%s3298_s13 + $0x238] sm:$0xff] }
 0xcdf   :  { %1449 = vadd.xlane.f32.xlu1 %v1448_v26 }
 0xd07   :  { %v1513_v29 = vpop.xlane.xlu2 %1512 }
 0xd0f   :  { %v1516_v27 = vpop.xlane.xlu1 %1515 }
 0xd10   :  { %2253 = vrcp.f32 %v1516_v27 }
 0xd11   :  { %2255 = vrcp.f32 %v1513_v29 }
 0xd12   :  { %2257 = vrcp.f32 %v1447_v34  ;;  %v2161_v34 = vld [vmem:[%s3298_s13 + $0x3f0] sm:$0xff] }
 0xd16   :  { %v2254_v0 = vpop.eup %2253 }
 0xd17   :  { %v2256_v28 = vpop.eup %2255  ;;  %v1520_v30 = vmul.f32 %v2254_v0, %v2250_v19 }
 0xd18   :  { %v1519_v31 = vmul.f32 %v2256_v28, %v2248_v18  ;;  %v2258_v44 = vpop.eup %2257  ;;  %v2159_v28 = vld [vmem:[%s3298_s13 + $0x3e0] sm:$0xff] }
 0xd19   :  { %v1453_v37 = vmul.f32 %v2258_v44, %v2246_v15 }
 0xd1a   :  { %v1521_v33 = vpack.c.bf16 %v1520_v30, %v1519_v31  ;;  %v2156_v30 = vld [vmem:[%s3298_s13 + $0x3c8] sm:$0xff] }
 0xd27   :  { %v1524_v48 = vpop.permute.xlu1 %1523 }
 0xd28   :  { %1536 = vmatpush.bf16.msrb.mxu1 %v1524_v48  ;;  %v2160_v48 = vld [vmem:[%s3298_s13 + $0x3e8] sm:$0xff] }
 0xd2b   :  { %2079 = vmatmul.msk.bf16.vlgmr.msrb.gmra.mxu1 %vm616_vm15, %v1521_v33  ;;  %v2157_v33 = vld [vmem:[%s3298_s13 + $0x3d0] sm:$0xff] }
 0xd2c   :  { %v1750_v44 = vpack.c.bf16 %v2161_v34, %v2157_v33  ;;  %v2117_v33 = vld [vmem:[%s3298_s13 + $0x290] sm:$0xff] }
 0xd2d   :  { %v2121_v34 = vld [vmem:[%s3298_s13 + $0x2b0] sm:$0xff] }
 0xd2e   :  { %1791 = vmatpush.bf16.msra.mxu1 %v1750_v44  ;;  %v1730_v44 = vpack.c.bf16 %v2121_v34, %v2117_v33  ;;  %v1942_v33 = vld [vmem:[#allocation7 + $0x370] sm:$0xff] }
 0xd32   :  { %1792 = vmatpush.bf16.msra.mxu1 %v1746_v53 }
 0xd36   :  { %1793 = vmatpush.bf16.msra.mxu1 %v1742_v4  ;;  %v2101_v4 = vld [vmem:[%s3298_s13 + $0x210] sm:$0xff] }
 0xd37   :  { %v1722_v10 = vpack.c.bf16 %v2105_v5, %v2101_v4  ;;  %v1920_v4 = vld [vmem:[#allocation7 + $0x2c0] sm:$0xff]  ;;  %v1921_v5 = vld [vmem:[#allocation7 + $0x2c8] sm:$0xff] }
 0xd52   :  { %v1450_v35 = vpop.xlane.xlu1 %1449 }
 0xd53   :  { %2259 = vrcp.f32 %v1450_v35  ;;  %v1749_v35 = vpack.c.bf16 %v2160_v48, %v2156_v30  ;;  %v2116_v30 = vld [vmem:[%s3298_s13 + $0x288] sm:$0xff] }
 0xd54   :  { %v2120_v48 = vld [vmem:[%s3298_s13 + $0x2a8] sm:$0xff] }
 0xd55   :  { %1777 = vmatpush.bf16.msrb.mxu0 %v1749_v35  ;;  %v1729_v35 = vpack.c.bf16 %v2120_v48, %v2116_v30  ;;  %v1927_v48 = vld [vmem:[#allocation7 + $0x2f8] sm:$0xff] }
 0xd59   :  { %v2260_v36 = vpop.eup %2259 }
 0xd5a   :  { %v1454_v38 = vmul.f32 %v2260_v36, %v2252_v24  ;;  %v2158_v36 = vld [vmem:[%s3298_s13 + $0x3d8] sm:$0xff] }
 0xd5c   :  { %v1455_v39 = vpack.c.bf16 %v1454_v38, %v1453_v37  ;;  %v2162_v37 = vld [vmem:[%s3298_s13 + $0x3f8] sm:$0xff] }
 0xd5d   :  { %v1751_v38 = vpack.c.bf16 %v2162_v37, %v2158_v36  ;;  %v2118_v36 = vld [vmem:[%s3298_s13 + $0x298] sm:$0xff] }
 0xd5e   :  { %2077 = vmatmul.msk.bf16.vlgmr.msrb.gmra.mxu3 %vm616_vm15, %v1455_v39  ;;  %vm3319_vm15 = vmmov %vm3313_vm2  ;;  %v2147_v39 = vld [vmem:[%s3298_s13 + $0x380] sm:$0xff]  ;;  %v2122_v37 = vld [vmem:[%s3298_s13 + $0x2b8] sm:$0xff] }
 0xd5f   :  { %1805 = vmatpush.bf16.msrb.mxu2 %v1751_v38  ;;  %v1731_v38 = vpack.c.bf16 %v2122_v37, %v2118_v36  ;;  %v1925_v36 = vld [vmem:[#allocation7 + $0x2e8] sm:$0xff]  ;;  %v1940_v37 = vld [vmem:[#allocation7 + $0x360] sm:$0xff] }
 0xd63   :  { %1806 = vmatpush.bf16.msrb.mxu2 %v1747_v56  ;;  %v2114_v56 = vld [vmem:[%s3298_s13 + $0x278] sm:$0xff] }
 0xd64   :  { %v1727_v58 = vpack.c.bf16 %v2114_v56, %v2110_v6  ;;  %v1938_v6 = vld [vmem:[#allocation7 + $0x350] sm:$0xff] }
 0xd67   :  { %1807 = vmatpush.bf16.msrb.mxu2 %v1743_v8 }
 0xda8   :  { %v1538_v42 = vpop.f32.mrf.mxu1 }
 0xdb0   :  { %v1540_v46 = vpop.f32.mrf.mxu1 }
 0xdb1   :  { %v2181_v47 = vpack.i.bf16 %v1540_v46, %v1538_v42  ;;  %v2151_v42 = vld [vmem:[%s3298_s13 + $0x3a0] sm:$0xff]  ;;  %v2148_v46 = vld [vmem:[%s3298_s13 + $0x388] sm:$0xff] }
 0xdb2   :  { %v1745_v50 = vpack.c.bf16 %v2152_v49, %v2148_v46  ;;  %v2108_v46 = vld [vmem:[%s3298_s13 + $0x248] sm:$0xff] }
 0xdb3   :  { %2182 = vrot.lane.b32.xlu2 %v2181_v47, %s2392_s30  ;;  %v1744_v47 = vpack.c.bf16 %v2151_v42, %v2147_v39  ;;  %v2107_v39 = vld [vmem:[%s3298_s13 + $0x240] sm:$0xff]  ;;  %v2112_v49 = vld [vmem:[%s3298_s13 + $0x268] sm:$0xff] }
 0xdb4   :  { %1778 = vmatpush.bf16.msrb.mxu0 %v1745_v50  ;;  %v2111_v42 = vld [vmem:[%s3298_s13 + $0x260] sm:$0xff]  ;;  %v1725_v53 = vpack.c.bf16 %v2112_v49, %v2108_v46  ;;  %v1910_v46 = vld [vmem:[#allocation7 + $0x270] sm:$0xff] }
 0xdb5   :  { %v1958_v49 = vld [vmem:[#allocation7 + $0x3f0] sm:$0xff] }
 0xdb8   :  { %1779 = vmatpush.bf16.msrb.mxu0 %v1741_v3  ;;  %v1721_v3 = vpack.c.bf16 %v2104_v62, %v2100_v61  ;;  %v1956_v61 = vld [vmem:[#allocation7 + $0x3e0] sm:$0xff] }
 0xde1   :  { %v1468_v13 = vpop.f32.mrf.mxu3 }
 0xde9   :  { %v1470_v14 = vpop.f32.mrf.mxu3 }
 0xe0d   :  { %v2183_v41 = vpop.permute.xlu2 %2182 }
 0xe0e   :  { %v2185_v15 = vunpack.i.h.bf16 %v2183_v41  ;;  %v2184_v52 = vunpack.i.l.bf16 %v2183_v41  ;;  %v2133_v41 = vld [vmem:[%s3298_s13 + $0x310] sm:$0xff] }
 0xe10   :  { %v1551_v43 = vsel %vm3319_vm15, %v1468_v13, %v2184_v52  ;;  %v1552_v9 = vsel %vm3320_vm6, %v1470_v14, %v2185_v15  ;;  %v2136_v13 = vld [vmem:[%s3298_s13 + $0x328] sm:$0xff]  ;;  %v2137_v15 = vld [vmem:[%s3298_s13 + $0x330] sm:$0xff] }
 0xe11   :  { %v1553_v16 = vpack.c.bf16 %v1552_v9, %v1551_v43  ;;  %v1737_v52 = vpack.c.bf16 %v2136_v13, %v2132_v11  ;;  %v1738_v14 = vpack.c.bf16 %v2137_v15, %v2133_v41  ;;  %v2134_v43 = vld [vmem:[%s3298_s13 + $0x318] sm:$0xff]  ;;  %v1723_v11 = vpack.c.bf16 %v2106_v54, %v2102_v7  ;;  %v1936_v7 = vld [vmem:[#allocation7 + $0x340] sm:$0xff] }
 0xe12   :  { %v2138_v9 = vld [vmem:[%s3298_s13 + $0x338] sm:$0xff] }
 0xe13   :  { %1592 = vmatmul.bf16.vlgmr.msra.gmra.mxu2 %v1553_v16  ;;  %v1739_v16 = vpack.c.bf16 %v2138_v9, %v2134_v43  ;;  %1780 = vmatpush.bf16.msrb.mxu0 %v1737_v52 }
 0xe14   :  { %1794 = vmatpush.bf16.msra.mxu1 %v1738_v14 }
 0xe15   :  { %1808 = vmatpush.bf16.msrb.mxu2 %v1739_v16 }
 0xe96   :  { %v1593_v18 = vpop.f32.mrf.mxu2 }
 0xe97   :  { %v1594_v20 = vadd.f32 %v2195_v17, %v1593_v18  ;;  %v2127_v18 = vld [vmem:[%s3298_s13 + $0x2e0] sm:$0xff] }
 0xe99   :  { %v3024_v21 = vadd.f32 %v1594_v20, %v2916_v32  ;;  %v2124_v20 = vld [vmem:[%s3298_s13 + $0x2c8] sm:$0xff] }
 0xe9b   :  { %1604 = vadd.xlane.f32.xlu0 %v3024_v21 }
 0xe9e   :  { %v1595_v19 = vpop.f32.mrf.mxu2 }
 0xe9f   :  { %v1596_v22 = vadd.f32 %v2195_v17, %v1595_v19  ;;  %v2123_v17 = vld [vmem:[%s3298_s13 + $0x2c0] sm:$0xff] }
 0xea0   :  { %v1732_v19 = vpack.c.bf16 %v2127_v18, %v2123_v17 }
 0xea1   :  { %v1599_v23 = vadd.f32 %v1596_v22, %v2920_v40  ;;  %v2155_v40 = vld [vmem:[%s3298_s13 + $0x3c0] sm:$0xff]  ;;  %v2128_v22 = vld [vmem:[%s3298_s13 + $0x2e8] sm:$0xff] }
 0xea2   :  { %v1748_v31 = vpack.c.bf16 %v2159_v28, %v2155_v40  ;;  %v2115_v40 = vld [vmem:[%s3298_s13 + $0x280] sm:$0xff] }
 0xea3   :  { %1606 = vadd.xlane.f32.xlu0 %v1599_v23  ;;  %v2119_v28 = vld [vmem:[%s3298_s13 + $0x2a0] sm:$0xff] }
 0xea4   :  { %1763 = vmatpush.bf16.msra.mxu3 %v1748_v31  ;;  %v1728_v31 = vpack.c.bf16 %v2119_v28, %v2115_v40 }
 0xea8   :  { %1764 = vmatpush.bf16.msra.mxu3 %v1744_v47  ;;  %v1724_v47 = vpack.c.bf16 %v2111_v42, %v2107_v39  ;;  %v1941_v39 = vld [vmem:[#allocation7 + $0x368] sm:$0xff] }
 0xea9   :  { %v1982_v42 = vpack.c.bf16 %v1941_v39, %v1940_v37  ;;  %v1931_v37 = vld [vmem:[#allocation7 + $0x318] sm:$0xff]  ;;  %v1901_v39 = vld [vmem:[#allocation7 + $0x228] sm:$0xff] }
 0xeac   :  { %1765 = vmatpush.bf16.msra.mxu3 %v1740_v59  ;;  %v2103_v59 = vld [vmem:[%s3298_s13 + $0x220] sm:$0xff] }
 0xead   :  { %v1720_v1 = vpack.c.bf16 %v2103_v59, %v2099_v55  ;;  %v1939_v55 = vld [vmem:[#allocation7 + $0x358] sm:$0xff]  ;;  %v1909_v59 = vld [vmem:[#allocation7 + $0x268] sm:$0xff] }
 0xeb0   :  { %1766 = vmatpush.bf16.msra.mxu3 %v1736_v12 }
 0xeb4   :  { %1767 = vmatpush.bf16.msra.mxu3 %v1732_v19 }
 0xeb8   :  { %1768 = vmatpush.bf16.msra.mxu3 %v1728_v31 }
 0xebc   :  { %1769 = vmatpush.bf16.msra.mxu3 %v1724_v47  ;;  %v1911_v47 = vld [vmem:[#allocation7 + $0x278] sm:$0xff] }
 0xebd   :  { %v1967_v2 = vpack.c.bf16 %v1911_v47, %v1910_v46  ;;  %v1948_v47 = vld [vmem:[#allocation7 + $0x3a0] sm:$0xff] }
 0xec0   :  { %1770 = vmatpush.bf16.msra.mxu3 %v1720_v1  ;;  %v1957_v1 = vld [vmem:[#allocation7 + $0x3e8] sm:$0xff] }
 0xec4   :  { %1997 = vmatpush.bf16.msrb.mxu3 %v1967_v2  ;;  %v1912_v2 = vld [vmem:[#allocation7 + $0x280] sm:$0xff] }
 0xf0e   :  { %v1605_v25 = vpop.xlane.xlu0 %1604 }
 0xf0f   :  { %v1608_v60 = vmul.f32 %v1605_v25, %v2529_v63  ;;  %v2129_v25 = vld [vmem:[%s3298_s13 + $0x2f0] sm:$0xff] }
 0xf11   :  { %v3030_v24 = vsub.f32 %v3024_v21, %v1608_v60  ;;  %v1733_v60 = vpack.c.bf16 %v2128_v22, %v2124_v20 }
 0xf13   :  { %v1612_v26 = vmul.f32 %v3030_v24, %v3030_v24  ;;  %1781 = vmatpush.bf16.msrb.mxu0 %v1733_v60 }
 0xf15   :  { %1614 = vadd.xlane.f32.xlu0 %v1612_v26 }
 0xf16   :  { %v1607_v27 = vpop.xlane.xlu0 %1606 }
 0xf17   :  { %v1609_v32 = vmul.f32 %v1607_v27, %v2529_v63  ;;  %v2126_v27 = vld [vmem:[%s3298_s13 + $0x2d8] sm:$0xff]  ;;  %1782 = vmatpush.bf16.msrb.mxu0 %v1729_v35 }
 0xf18   :  { %v1943_v35 = vld [vmem:[#allocation7 + $0x378] sm:$0xff] }
 0xf19   :  { %v3035_v29 = vsub.f32 %v1599_v23, %v1609_v32  ;;  %v2125_v23 = vld [vmem:[%s3298_s13 + $0x2d0] sm:$0xff]  ;;  %v2130_v32 = vld [vmem:[%s3298_s13 + $0x2f8] sm:$0xff] }
 0xf1a   :  { %v1734_v26 = vpack.c.bf16 %v2129_v25, %v2125_v23  ;;  %v2196_v25 = vld [vmem:[%s3296_s11 + $0x1] ss:$0 sm:$0xff] }
 0xf1b   :  { %v1613_v0 = vmul.f32 %v3035_v29, %v3035_v29  ;;  %1783 = vmatpush.bf16.msrb.mxu0 %v1725_v53  ;;  %v1922_v53 = vld [vmem:[#allocation7 + $0x2d0] sm:$0xff] }
 0xf1c   :  { %1795 = vmatpush.bf16.msra.mxu1 %v1734_v26 }
 0xf1d   :  { %1616 = vadd.xlane.f32.xlu2 %v1613_v0  ;;  %v1735_v0 = vpack.c.bf16 %v2130_v32, %v2126_v27 }
 0xf1f   :  { %1809 = vmatpush.bf16.msrb.mxu2 %v1735_v0  ;;  %1784 = vmatpush.bf16.msrb.mxu0 %v1721_v3  ;;  %v2197_v0 = vld [vmem:[%s3297_s12 + $0x1] ss:$0 sm:$0xff]  ;;  %v1990_v3 = vpack.c.bf16 %v1957_v1, %v1956_v61  ;;  %v1947_v1 = vld [vmem:[#allocation7 + $0x398] sm:$0xff] }
 0xf20   :  { %1796 = vmatpush.bf16.msra.mxu1 %v1730_v44  ;;  %v1983_v44 = vpack.c.bf16 %v1943_v35, %v1942_v33  ;;  %v1951_v33 = vld [vmem:[#allocation7 + $0x3b8] sm:$0xff]  ;;  %v1914_v35 = vld [vmem:[#allocation7 + $0x290] sm:$0xff] }
 0xf23   :  { %1810 = vmatpush.bf16.msrb.mxu2 %v1731_v38 }
 0xf24   :  { %1797 = vmatpush.bf16.msra.mxu1 %v1726_v51  ;;  %v1923_v51 = vld [vmem:[#allocation7 + $0x2d8] sm:$0xff] }
 0xf25   :  { %v1973_v56 = vpack.c.bf16 %v1923_v51, %v1922_v53  ;;  %v1928_v53 = vld [vmem:[#allocation7 + $0x300] sm:$0xff]  ;;  %v1929_v51 = vld [vmem:[#allocation7 + $0x308] sm:$0xff] }
 0xf27   :  { %1811 = vmatpush.bf16.msrb.mxu2 %v1727_v58  ;;  %v1908_v58 = vld [vmem:[#allocation7 + $0x260] sm:$0xff] }
 0xf28   :  { %1798 = vmatpush.bf16.msra.mxu1 %v1722_v10  ;;  %v1966_v62 = vpack.c.bf16 %v1909_v59, %v1908_v58  ;;  %v1937_v10 = vld [vmem:[#allocation7 + $0x348] sm:$0xff]  ;;  %v1899_v58 = vld [vmem:[#allocation7 + $0x218] sm:$0xff]  ;;  %v1946_v59 = vld [vmem:[#allocation7 + $0x390] sm:$0xff] }
 0xf29   :  { %v1980_v54 = vpack.c.bf16 %v1937_v10, %v1936_v7 }
 0xf2a   :  { %1998 = vmatpush.bf16.msrb.mxu3 %v1966_v62 }
 0xf2b   :  { %1812 = vmatpush.bf16.msrb.mxu2 %v1723_v11  ;;  %v1906_v11 = vld [vmem:[#allocation7 + $0x250] sm:$0xff] }
 0xf2c   :  { %2023 = vmatpush.bf16.msrb.mxu1 %v1983_v44  ;;  %v1915_v44 = vld [vmem:[#allocation7 + $0x298] sm:$0xff] }
 0xf30   :  { %2024 = vmatpush.bf16.msrb.mxu1 %v1982_v42 }
 0xf88   :  { %v1615_v50 = vpop.xlane.xlu0 %1614 }
 0xf89   :  { %v1618_v57 = vmul.f32 %v1615_v50, %v2529_v63  ;;  %v1991_v50 = vpack.c.bf16 %v1959_v45, %v1958_v49  ;;  %v1949_v49 = vld [vmem:[#allocation7 + $0x3a8] sm:$0xff] }
 0xf8a   :  { %v1986_v45 = vpack.c.bf16 %v1949_v49, %v1948_v47 }
 0xf8b   :  { %v1620_v8 = vadd.f32 1e-06, %v1618_v57  ;;  %2036 = vmatpush.bf16.msra.mxu2 %v1991_v50  ;;  %v1981_v57 = vpack.c.bf16 %v1939_v55, %v1938_v6  ;;  %v1913_v50 = vld [vmem:[#allocation7 + $0x288] sm:$0xff]  ;;  %v1976_v55 = vpack.c.bf16 %v1929_v51, %v1928_v53 }
 0xf8d   :  { %2261 = vrsqrt.f32 %v1620_v8  ;;  %vm1628_vm8 = vweird.f32 %v1620_v8  ;;  %2025 = vmatpush.bf16.msrb.mxu1 %v1981_v57  ;;  %v1898_v57 = vld [vmem:[#allocation7 + $0x210] sm:$0xff] }
 0xf8e   :  { %v1961_v62 = vpack.c.bf16 %v1899_v58, %v1898_v57 }
 0xf8f   :  { %2037 = vmatpush.bf16.msra.mxu2 %v1990_v3  ;;  %v1985_v3 = vpack.c.bf16 %v1947_v1, %v1946_v59 }
 0xf90   :  { %v1617_v12 = vpop.xlane.xlu2 %1616 }
 0xf91   :  { %v1619_v13 = vmul.f32 %v1617_v12, %v2529_v63  ;;  %v1907_v12 = vld [vmem:[#allocation7 + $0x258] sm:$0xff]  ;;  %2026 = vmatpush.bf16.msrb.mxu1 %v1980_v54 }
 0xf93   :  { %v2262_v41 = vpop.eup %2261  ;;  %v1621_v15 = vadd.f32 1e-06, %v1619_v13  ;;  %v1954_v13 = vld [vmem:[#allocation7 + $0x3d0] sm:$0xff] }
 0xf94   :  { %v1623_v52 = vmul.f32 %v2262_v41, %v1620_v8  ;;  %vm1629_vm7 = vweird.f32 %v2262_v41  ;;  %v1972_v8 = vpack.c.bf16 %v1921_v5, %v1920_v4 }
 0xf95   :  { %2263 = vrsqrt.f32 %v1621_v15  ;;  %vm1630_vm9 = vmor %vm1628_vm8, %vm1629_vm7  ;;  %vm1638_vm12 = vweird.f32 %v1621_v15 }
 0xf96   :  { %v1624_v14 = vmul.f32 %v2262_v41, %v1623_v52 }
 0xf98   :  { %v1625_v43 = vmul.f32 0.5, %v1624_v14  ;;  %v1918_v14 = vld [vmem:[#allocation7 + $0x2b0] sm:$0xff] }
 0xf9a   :  { %v1626_v9 = vsub.f32 1.5, %v1625_v43  ;;  %v1919_v43 = vld [vmem:[#allocation7 + $0x2b8] sm:$0xff] }
 0xf9b   :  { %v2264_v16 = vpop.eup %2263 }
 0xf9c   :  { %v1627_v17 = vmul.f32 %v2262_v41, %v1626_v9  ;;  %v1633_v18 = vmul.f32 %v2264_v16, %v1621_v15  ;;  %vm1639_vm11 = vweird.f32 %v2264_v16  ;;  %v1955_v15 = vld [vmem:[#allocation7 + $0x3d8] sm:$0xff]  ;;  %v1934_v9 = vld [vmem:[#allocation7 + $0x330] sm:$0xff] }
 0xf9d   :  { %vm1640_vm13 = vmor %vm1638_vm12, %vm1639_vm11  ;;  %v1989_v52 = vpack.c.bf16 %v1955_v15, %v1954_v13  ;;  %v1944_v13 = vld [vmem:[#allocation7 + $0x380] sm:$0xff] }
 0xf9e   :  { %v1634_v20 = vmul.f32 %v2264_v16, %v1633_v18  ;;  %v1631_v19 = vsel %vm1630_vm9, %v2262_v41, %v1627_v17  ;;  %v1965_v41 = vpack.c.bf16 %v1907_v12, %v1906_v11  ;;  %v1935_v17 = vld [vmem:[#allocation7 + $0x338] sm:$0xff]  ;;  %v1896_v11 = vld [vmem:[#allocation7 + $0x200] sm:$0xff]  ;;  %v1897_v12 = vld [vmem:[#allocation7 + $0x208] sm:$0xff] }
 0xf9f   :  { %v1642_v63 = vmul.f32 %v1631_v19, %v3030_v24  ;;  %v1926_v24 = vld [vmem:[#allocation7 + $0x2f0] sm:$0xff]  ;;  %2038 = vmatpush.bf16.msra.mxu2 %v1989_v52  ;;  %v1979_v18 = vpack.c.bf16 %v1935_v17, %v1934_v9  ;;  %v1905_v19 = vld [vmem:[#allocation7 + $0x248] sm:$0xff]  ;;  %v1960_v52 = vpack.c.bf16 %v1897_v12, %v1896_v11 }
 0xfa0   :  { %v1635_v22 = vmul.f32 0.5, %v1634_v20  ;;  %v1975_v34 = vpack.c.bf16 %v1927_v48, %v1926_v24  ;;  %1999 = vmatpush.bf16.msrb.mxu3 %v1965_v41  ;;  %v1904_v20 = vld [vmem:[#allocation7 + $0x240] sm:$0xff] }
 0xfa1   :  { %v1647_v32 = vmul.f32 %v2196_v25, %v1642_v63  ;;  %v1953_v63 = vld [vmem:[#allocation7 + $0x3c8] sm:$0xff]  ;;  %2027 = vmatpush.bf16.msrb.mxu1 %v1979_v18  ;;  %v3244_v24 = vld [vmem:[%s3299_s14 + $0x4] sm:$0xf] }
 0xfa2   :  { %v1636_v23 = vsub.f32 1.5, %v1635_v22  ;;  %2010 = vmatpush.bf16.msra.mxu0 %v1975_v34  ;;  %v1952_v22 = vld [vmem:[#allocation7 + $0x3c0] sm:$0xff]  ;;  %v1756_v6 = vperm.slane %v3244_v24, 1  ;;  %v1757_v61 = vperm.slane %v3244_v24, 2  ;;  %v1755_v54 = vperm.slane %v3244_v24, 0 }
 0xfa3   :  { %v1652_v28 = vadd.f32 %v2197_v0, %v1647_v32  ;;  %v1758_v15 = vperm.slane %v3244_v24, 3 }
 0xfa4   :  { %v1637_v60 = vmul.f32 %v2264_v16, %v1636_v23  ;;  %v1964_v23 = vpack.c.bf16 %v1905_v19, %v1904_v20 }
 0xfa6   :  { %v1641_v26 = vsel %vm1640_vm13, %v2264_v16, %v1637_v60  ;;  %v1971_v16 = vpack.c.bf16 %v1919_v43, %v1918_v14  ;;  %v1916_v60 = vld [vmem:[#allocation7 + $0x2a0] sm:$0xff]  ;;  %2000 = vmatpush.bf16.msrb.mxu3 %v1964_v23  ;;  %v1945_v14 = vld [vmem:[#allocation7 + $0x388] sm:$0xff] }
 0xfa7   :  { %v1643_v27 = vmul.f32 %v1641_v26, %v3035_v29  ;;  %v1924_v29 = vld [vmem:[#allocation7 + $0x2e0] sm:$0xff]  ;;  %v1917_v26 = vld [vmem:[#allocation7 + $0x2a8] sm:$0xff]  ;;  %v1984_v9 = vpack.c.bf16 %v1945_v14, %v1944_v13 }
 0xfa8   :  { %v1974_v38 = vpack.c.bf16 %v1925_v36, %v1924_v29  ;;  %v1970_v32 = vpack.c.bf16 %v1917_v26, %v1916_v60  ;;  %v1930_v29 = vld [vmem:[#allocation7 + $0x310] sm:$0xff]  ;;  %v1969_v36 = vpack.c.bf16 %v1915_v44, %v1914_v35 }
 0xfa9   :  { %v1648_v40 = vmul.f32 %v2196_v25, %v1643_v27  ;;  %v1988_v25 = vpack.c.bf16 %v1953_v63, %v1952_v22  ;;  %v1932_v27 = vld [vmem:[#allocation7 + $0x320] sm:$0xff]  ;;  %v1977_v42 = vpack.c.bf16 %v1931_v37, %v1930_v29 }
 0xfaa   :  { %2011 = vmatpush.bf16.msra.mxu0 %v1974_v38  ;;  %v1900_v38 = vld [vmem:[#allocation7 + $0x220] sm:$0xff] }
 0xfab   :  { %v1653_v30 = vadd.f32 %v2197_v0, %v1648_v40  ;;  %v1933_v0 = vld [vmem:[#allocation7 + $0x328] sm:$0xff]  ;;  %2039 = vmatpush.bf16.msra.mxu2 %v1988_v25  ;;  %v1962_v46 = vpack.c.bf16 %v1901_v39, %v1900_v38 }
 0xfac   :  { %v1978_v40 = vpack.c.bf16 %v1933_v0, %v1932_v27 }
 0xfad   :  { %v1654_v31 = vpack.c.bf16 %v1653_v30, %v1652_v28  ;;  %v1902_v28 = vld [vmem:[#allocation7 + $0x230] sm:$0xff]  ;;  %v1903_v30 = vld [vmem:[#allocation7 + $0x238] sm:$0xff] }
 0xfae   :  { %2012 = vmatpush.bf16.msra.mxu0 %v1973_v56  ;;  %v1963_v48 = vpack.c.bf16 %v1903_v30, %v1902_v28  ;;  %2028 = vmatpush.bf16.msrb.mxu1 %v1978_v40  ;;  %v1968_v56 = vpack.c.bf16 %v1913_v50, %v1912_v2 }
 0xfaf   :  { %1771 = vmatmul.bf16.vlgmr.msra.gmra.mxu3 %v1654_v31  ;;  %1785 = vmatmul.bf16.vlgmr.msrb.gmra.mxu0 %v1654_v31 }
 0xfb0   :  { %1799 = vmatmul.bf16.vlgmr.msra.gmra.mxu1 %v1654_v31  ;;  %1813 = vmatmul.bf16.vlgmr.msrb.gmra.mxu2 %v1654_v31  ;;  %v1950_v31 = vld [vmem:[#allocation7 + $0x3b0] sm:$0xff] }
 0xfb1   :  { %v1987_v34 = vpack.c.bf16 %v1951_v33, %v1950_v31  ;;  %2001 = vmatpush.bf16.msrb.mxu3 %v1963_v48 }
 0xfb2   :  { %2013 = vmatpush.bf16.msra.mxu0 %v1972_v8  ;;  %2029 = vmatpush.bf16.msrb.mxu1 %v1977_v42 }
 0xfb3   :  { %2040 = vmatpush.bf16.msra.mxu2 %v1987_v34 }
 0xfb5   :  { %2002 = vmatpush.bf16.msrb.mxu3 %v1962_v46 }
 0xfb6   :  { %2014 = vmatpush.bf16.msra.mxu0 %v1971_v16  ;;  %2030 = vmatpush.bf16.msrb.mxu1 %v1976_v55 }
 0xfb7   :  { %2041 = vmatpush.bf16.msra.mxu2 %v1986_v45 }
 0xfb9   :  { %2003 = vmatpush.bf16.msrb.mxu3 %v1961_v62 }
 0xfba   :  { %2015 = vmatpush.bf16.msra.mxu0 %v1970_v32 }
 0xfbb   :  { %2042 = vmatpush.bf16.msra.mxu2 %v1985_v3 }
 0xfbd   :  { %2004 = vmatpush.bf16.msrb.mxu3 %v1960_v52 }
 0xfbe   :  { %2016 = vmatpush.bf16.msra.mxu0 %v1969_v36 }
 0xfbf   :  { %2043 = vmatpush.bf16.msra.mxu2 %v1984_v9 }
 0xfc2   :  { %2017 = vmatpush.bf16.msra.mxu0 %v1968_v56 }
0x102c   :  { %v1786_v4 = vpop.f32.mrf.mxu0 }
0x102d   :  { %v3248_v5 = vadd.f32 %v1786_v4, %v1756_v6  ;;  %v1800_v7 = vpop.f32.mrf.mxu1 }
0x102e   :  { %v3250_v8 = vadd.f32 %v1800_v7, %v1757_v61 }
0x102f   :  { %v1828_v10 = vmul.f32 0.044715, %v3248_v5 }
0x1030   :  { %v1829_v41 = vmul.f32 0.044715, %v3250_v8 }
0x1031   :  { %v1836_v43 = vmul.f32 %v1828_v10, %v3248_v5 }
0x1032   :  { %v1837_v16 = vmul.f32 %v1829_v41, %v3250_v8  ;;  %v1772_v17 = vpop.f32.mrf.mxu3  ;;  %v1820_v41 = vmul.f32 0.5, %v3248_v5 }
0x1033   :  { %v1844_v18 = vmul.f32 %v1836_v43, %v3248_v5  ;;  %v3259_v20 = vadd.f32 %v1772_v17, %v1755_v54  ;;  %v1814_v19 = vpop.f32.mrf.mxu2  ;;  %v1821_v43 = vmul.f32 0.5, %v3250_v8 }
0x1034   :  { %v1845_v22 = vmul.f32 %v1837_v16, %v3250_v8  ;;  %v3262_v23 = vadd.f32 %v1814_v19, %v1758_v15  ;;  %v1788_v63 = vpop.f32.mrf.mxu0 }
0x1035   :  { %v1852_v25 = vadd.f32 %v1844_v18, %v3248_v5  ;;  %v1827_v60 = vmul.f32 0.044715, %v3259_v20  ;;  %v1789_v26 = vadd.f32 %v1788_v63, %v1756_v6  ;;  %v1802_v27 = vpop.f32.mrf.mxu1  ;;  %v1819_v5 = vmul.f32 0.5, %v3259_v20 }
0x1036   :  { %v1853_v32 = vadd.f32 %v1845_v22, %v3250_v8  ;;  %v1830_v0 = vmul.f32 0.044715, %v3262_v23  ;;  %v1803_v40 = vadd.f32 %v1802_v27, %v1757_v61  ;;  %v1822_v8 = vmul.f32 0.5, %v3262_v23 }
0x1037   :  { %v1835_v28 = vmul.f32 %v1827_v60, %v3259_v20  ;;  %v1832_v30 = vmul.f32 0.044715, %v1789_v26  ;;  %v1860_v48 = vmul.f32 0.7978846, %v1852_v25 }
0x1038   :  { %v1838_v31 = vmul.f32 %v1830_v0, %v3262_v23  ;;  %v1833_v24 = vmul.f32 0.044715, %v1803_v40  ;;  %v1861_v35 = vmul.f32 0.7978846, %v1853_v32  ;;  %v1825_v9 = vmul.f32 0.5, %v1803_v40 }
0x1039   :  { %v1843_v33 = vmul.f32 %v1835_v28, %v3259_v20  ;;  %v1840_v34 = vmul.f32 %v1832_v30, %v1789_v26  ;;  %2265 = vtanh.f32 %v1860_v48 }
0x103a   :  { %v1846_v44 = vmul.f32 %v1838_v31, %v3262_v23  ;;  %v1841_v29 = vmul.f32 %v1833_v24, %v1803_v40  ;;  %v1774_v36 = vpop.f32.mrf.mxu3  ;;  %2267 = vtanh.f32 %v1861_v35 }
0x103b   :  { %v1851_v37 = vadd.f32 %v1843_v33, %v3259_v20  ;;  %v1848_v38 = vmul.f32 %v1840_v34, %v1789_v26  ;;  %v1775_v39 = vadd.f32 %v1774_v36, %v1755_v54  ;;  %v1816_v42 = vpop.f32.mrf.mxu2  ;;  %v2198_v20 = vld [vmem:[%s3301_s16 + $0x1] ss:$0 sm:$0xff] }
0x103c   :  { %v1854_v46 = vadd.f32 %v1846_v44, %v3262_v23  ;;  %v1849_v47 = vmul.f32 %v1841_v29, %v1803_v40  ;;  %v1817_v49 = vadd.f32 %v1816_v42, %v1758_v15  ;;  %v1824_v15 = vmul.f32 0.5, %v1789_v26 }
0x103d   :  { %v1856_v2 = vadd.f32 %v1848_v38, %v1789_v26  ;;  %v1831_v45 = vmul.f32 0.044715, %v1775_v39  ;;  %v1859_v51 = vmul.f32 0.7978846, %v1851_v37  ;;  %v1823_v26 = vmul.f32 0.5, %v1775_v39 }
0x103e   :  { %v1857_v50 = vadd.f32 %v1849_v47, %v1803_v40  ;;  %v1834_v53 = vmul.f32 0.044715, %v1817_v49  ;;  %v1862_v55 = vmul.f32 0.7978846, %v1854_v46  ;;  %v1826_v40 = vmul.f32 0.5, %v1817_v49 }
0x103f   :  { %v1864_v6 = vmul.f32 0.7978846, %v1856_v2  ;;  %v1839_v56 = vmul.f32 %v1831_v45, %v1775_v39  ;;  %v2266_v62 = vpop.eup %2265 }
0x1040   :  { %v1865_v57 = vmul.f32 0.7978846, %v1857_v50  ;;  %v1842_v58 = vmul.f32 %v1834_v53, %v1817_v49  ;;  %v2268_v3 = vpop.eup %2267  ;;  %v1876_v54 = vadd.f32 1.0, %v2266_v62 }
0x1041   :  { %v1847_v59 = vmul.f32 %v1839_v56, %v1775_v39  ;;  %2269 = vtanh.f32 %v1864_v6  ;;  %v1877_v12 = vadd.f32 1.0, %v2268_v3 }
0x1042   :  { %v1850_v61 = vmul.f32 %v1842_v58, %v1817_v49  ;;  %2271 = vtanh.f32 %v1865_v57  ;;  %v1884_v18 = vmul.f32 %v1876_v54, %v1820_v41 }
0x1043   :  { %v1855_v1 = vadd.f32 %v1847_v59, %v1775_v39  ;;  %2273 = vtanh.f32 %v1859_v51  ;;  %v1885_v22 = vmul.f32 %v1877_v12, %v1821_v43 }
0x1044   :  { %v1858_v4 = vadd.f32 %v1850_v61, %v1817_v49  ;;  %2275 = vtanh.f32 %v1862_v55 }
0x1045   :  { %v1863_v7 = vmul.f32 0.7978846, %v1855_v1 }
0x1046   :  { %v1866_v10 = vmul.f32 0.7978846, %v1858_v4 }
0x1047   :  { %v2270_v11 = vpop.eup %2269  ;;  %2277 = vtanh.f32 %v1863_v7 }
0x1048   :  { %v2272_v13 = vpop.eup %2271  ;;  %v1880_v52 = vadd.f32 1.0, %v2270_v11  ;;  %2279 = vtanh.f32 %v1866_v10 }
0x1049   :  { %v2274_v14 = vpop.eup %2273  ;;  %v1881_v16 = vadd.f32 1.0, %v2272_v13 }
0x104a   :  { %v2276_v17 = vpop.eup %2275  ;;  %v1888_v19 = vmul.f32 %v1880_v52, %v1824_v15  ;;  %v1875_v60 = vadd.f32 1.0, %v2274_v14 }
0x104b   :  { %v1889_v63 = vmul.f32 %v1881_v16, %v1825_v9  ;;  %v1878_v0 = vadd.f32 1.0, %v2276_v17 }
0x104c   :  { %v1892_v25 = vpack.c.bf16 %v1888_v19, %v1884_v18  ;;  %v1883_v24 = vmul.f32 %v1875_v60, %v1819_v5 }
0x104d   :  { %v2278_v27 = vpop.eup %2277  ;;  %v1893_v32 = vpack.c.bf16 %v1889_v63, %v1885_v22  ;;  %v1886_v33 = vmul.f32 %v1878_v0, %v1822_v8 }
0x104e   :  { %v2280_v28 = vpop.eup %2279  ;;  %2018 = vmatmul.bf16.vlgmr.msra.gmra.mxu0 %v1892_v25  ;;  %v1879_v30 = vadd.f32 1.0, %v2278_v27 }
0x104f   :  { %2031 = vmatmul.bf16.vlgmr.msrb.gmra.mxu1 %v1893_v32  ;;  %v1882_v31 = vadd.f32 1.0, %v2280_v28 }
0x1050   :  { %v1887_v48 = vmul.f32 %v1879_v30, %v1823_v26 }
0x1051   :  { %v1890_v34 = vmul.f32 %v1882_v31, %v1826_v40 }
0x1052   :  { %v1891_v35 = vpack.c.bf16 %v1887_v48, %v1883_v24 }
0x1053   :  { %v1894_v44 = vpack.c.bf16 %v1890_v34, %v1886_v33 }
0x1054   :  { %2005 = vmatmul.bf16.vlgmr.msrb.gmra.mxu3 %v1891_v35 }
0x1055   :  { %2044 = vmatmul.bf16.vlgmr.msra.gmra.mxu2 %v1894_v44 }
0x10cb   :  { %v2019_v29 = vpop.f32.mrf.mxu0 }
0x10cc   :  { %v2032_v36 = vpop.f32.mrf.mxu1 }
0x10d3   :  { %v2021_v37 = vpop.f32.mrf.mxu0 }
0x10d4   :  { %v2034_v38 = vpop.f32.mrf.mxu1 }
0x10d7   :  { %v2006_v39 = vpop.f32.mrf.mxu3 }
0x10d8   :  { %v2007_v23 = vadd.f32 %v2198_v20, %v2006_v39  ;;  %v2045_v42 = vpop.f32.mrf.mxu2 }
0x10da   :  { %v2020_v46 = vadd.f32 %v2019_v29, %v2007_v23 }
0x10dc   :  { %v2033_v47 = vadd.f32 %v2032_v36, %v2020_v46 }
0x10de   :  { %v2046_v49 = vadd.f32 %v2045_v42, %v2033_v47 }
0x10df   :  { %v2008_v2 = vpop.f32.mrf.mxu3 }
0x10e0   :  { %v2049_v45 = vadd.f32 %v2046_v49, %v3024_v21  ;;  %v2047_v50 = vpop.f32.mrf.mxu2 }
0x10e2   :  { %2050 = vst [vmem:[#allocation8] sm:$0xff] %v2049_v45 }
0x10e3   :  { %2061 = dma.vmem_to_hbm [thread:$0]  %s2057_s20, 128, %s2059_s7, [#allocation4]  }
0x10e4   :  { %2381 = dma.done.wait [#allocation4], 128  }
0x10e5   :  { %2382 = vsyncadd [#allocation4], 4294967168 }
0x10e6   :  { %2066 = vsyncpa [#allocation3], 1 }
0x10e7   :  { %2067 = vsyncpa [#allocation6], 1 }
0x10e8   :  { %2068 = vsyncpa [#allocation4], 1 }

</bundles_post_ra>
